<compile_context>
chip_gen: v5e
topology: v5e:2x2
jax: 0.10.0
libtpu: 0.0.40
codegen_flags: <defaults>
</compile_context>

<pallas_src>
import math

import jax
import jax.numpy as jnp
from jax.experimental import pallas as pl
from jax.experimental.pallas import tpu as pltpu

P_DROP = 0.3
LANE = 128

# Flipped to False if this jax build rejects pipeline_mode=pl.Buffered(1).
_SINGLE_BUFFER_WEIGHTS_OK = [True]


def _round_up(n, m):
    return (n + m - 1) // m * m


def _pick_row_tile(n_rows):
    """~2 grid steps for small batches (keeps both v7x TCs fed, minimal
    per-step overhead on single-TC v5e/v6e); 512-row tiles for large batches
    (measured ~85% of HBM roofline for streaming kernels)."""
    if n_rows <= 1024:
        return max(8, _round_up(pl.cdiv(n_rows, 2), 8))
    return 512


def _make_mlp_kernel(num_layers: int):
    """Fused kernel: (num_layers-1) x (linear+relu) + final linear.

    The (1 - p_drop) scale is already folded into the hidden-layer params.
    """

    def kernel(*refs):
        # refs = x_ref, (w_ref, b_ref) * num_layers, o_ref
        x_ref = refs[0]
        o_ref = refs[-1]
        param_refs = refs[1:-1]

        h = x_ref[...]                       # stream dtype (f32 or bf16)
        for layer in range(num_layers):
            w_ref = param_refs[2 * layer]
            b_ref = param_refs[2 * layer + 1]
            lhs = h if h.dtype == w_ref.dtype else h.astype(w_ref.dtype)
            h = jnp.dot(lhs, w_ref[...], preferred_element_type=jnp.float32)
            h = h + b_ref[...]               # (1, out_p) broadcast, f32 VPU
            if layer < num_layers - 1:
                h = jnp.maximum(h, 0.0)      # ReLU; keep-scale pre-folded
        o_ref[...] = h.astype(o_ref.dtype)

    return kernel


def init_linear(key, in_dim, out_dim, dtype=jnp.float32):
    """PyTorch-style nn.Linear init; returns W transposed as (in, out)."""
    kw, kb = jax.random.split(key)
    bound = 1.0 / math.sqrt(in_dim)
    w = jax.random.uniform(kw, (out_dim, in_dim), dtype, -bound, bound)
    b = jax.random.uniform(kb, (out_dim,), dtype, -bound, bound)
    return w.T, b


def prepare_params(params, *, p_drop=P_DROP, weight_dtype=jnp.float32, lane=LANE):
    """One-time param prep (NOT per call): fold (1 - p_drop) into hidden-layer
    weights/biases, pad output feature dims to multiples of `lane`, and pad
    input dims of layers >= 1 to match the previous layer's padded output.
    Layer 0 keeps its raw K so x can be streamed unpadded.  Biases stay f32."""
    keep = 1.0 - p_drop
    prepped = []
    n = len(params)
    for idx, (w_t, b) in enumerate(params):
        w_t = jnp.asarray(w_t, jnp.float32)
        b = jnp.asarray(b, jnp.float32)
        if idx < n - 1:                       # hidden layer: fold the keep scale
            w_t = w_t * keep
            b = b * keep
        in_d, out_d = w_t.shape
        in_p = in_d if idx == 0 else _round_up(in_d, lane)
        out_p = _round_up(out_d, lane)
        w_pad = jnp.zeros((in_p, out_p), jnp.float32).at[:in_d, :out_d].set(w_t)
        b_pad = jnp.zeros((1, out_p), jnp.float32).at[0, :out_d].set(b)
        prepped.append((w_pad.astype(weight_dtype), b_pad))
    return prepped


def moment_prop_forward(x, prepped_params, out_dim, *, row_tile=None):
    """x: (..., in_dim).  prepped_params: output of prepare_params()."""
    *lead, in_dim = x.shape
    n_rows = 1
    for d in lead:
        n_rows *= d
    n_rows = max(n_rows, 1)

    in_k = prepped_params[0][0].shape[0]
    assert in_k == in_dim, "layer-0 K must match the x feature dim"
    out_pad = prepped_params[-1][0].shape[1]

    # Stream dtype follows the weights: bf16 weights -> bf16 x/out streams
    # (halves HBM bytes on the dominant tensors); otherwise keep x's dtype.
    stream_dtype = (jnp.bfloat16 if prepped_params[0][0].dtype == jnp.bfloat16
                    else x.dtype)

    # No padded copy: a reshape (view) + optional cheap cast.
    x2d = x.reshape(n_rows, in_dim).astype(stream_dtype)

    if row_tile is None:
        row_tile = _pick_row_tile(n_rows)
    n_blocks = pl.cdiv(n_rows, row_tile)      # partial last block masked by Pallas

    num_layers = len(prepped_params)
    kernel = _make_mlp_kernel(num_layers)

    flat_params = []
    for (w_p, b_p) in prepped_params:
        flat_params.extend([w_p, b_p])

    elem = jnp.dtype(stream_dtype).itemsize
    param_bytes = sum(a.size * a.dtype.itemsize for a in flat_params)
    x_bytes = x2d.size * x2d.dtype.itemsize
    out_bytes = n_rows * out_pad * elem
    flops = 2 * n_blocks * row_tile * sum(
        w.shape[0] * w.shape[1] for w, _ in prepped_params)
    tile_in_bytes = row_tile * in_dim * elem
    tile_out_bytes = row_tile * out_pad * elem
    act_bytes = sum(row_tile * w.shape[1] * 4 for w, _ in prepped_params)

    def run(weight_mode):
        wkw = {} if weight_mode is None else {"pipeline_mode": weight_mode}
        in_specs = [pl.BlockSpec((row_tile, in_dim), lambda i: (i, 0))]
        for (w_p, b_p) in prepped_params:
            # Constant block index -> weights/biases stay resident in VMEM.
            in_specs.append(pl.BlockSpec(w_p.shape, lambda i: (0, 0), **wkw))
            in_specs.append(pl.BlockSpec(b_p.shape, lambda i: (0, 0), **wkw))
        out_spec = pl.BlockSpec((row_tile, out_pad), lambda i: (i, 0))

        # Accurate VMEM budget: resident params (+ optional second buffer),
        # double-buffered x/out tiles, in-kernel f32 activations, headroom.
        weight_bufs = 1 if weight_mode is not None else 2
        vmem_est = (weight_bufs * param_bytes
                    + 2 * tile_in_bytes + 2 * tile_out_bytes
                    + act_bytes
                    + (16 << 20))                       # scheduler/scratch headroom
        vmem_limit = int(min(vmem_est, 56 << 20))       # stay under v7x 64 MiB/TC

        return pl.pallas_call(
            kernel,
            out_shape=jax.ShapeDtypeStruct((n_rows, out_pad), stream_dtype),
            grid_spec=pltpu.PrefetchScalarGridSpec(
                num_scalar_prefetch=0,
                grid=(n_blocks,),
                in_specs=in_specs,
                out_specs=out_spec,
            ),
            compiler_params=pltpu.CompilerParams(
                dimension_semantics=("parallel",),      # megacore / v7x dual-TC
                vmem_limit_bytes=vmem_limit,
            ),
            cost_estimate=pl.CostEstimate(
                flops=int(flops),
                transcendentals=0,
                bytes_accessed=int(param_bytes + x_bytes + out_bytes)),
        )(x2d, *flat_params)

    if _SINGLE_BUFFER_WEIGHTS_OK[0]:
        try:
            y2d = run(pl.Buffered(1))       # resident weights: single-buffered
        except Exception:
            _SINGLE_BUFFER_WEIGHTS_OK[0] = False
            y2d = run(None)                 # fallback: default double-buffering
    else:
        y2d = run(None)

    # Cheap post-kernel slice (keeps only valid output columns) + cast back.
    y = y2d[:, :out_dim].reshape(*lead, out_dim)
    return y.astype(x.dtype)


def reference_forward(x, params, p_drop=P_DROP):
    """Pure-JAX reference matching the PyTorch eval/sample-mode forward."""
    h = x
    for (w_t, b) in params[:-1]:
        h = jnp.maximum(h @ w_t + b, 0.0) * (1.0 - p_drop)
    w_t, b = params[-1]
    return h @ w_t + b


if __name__ == "__main__":
    # Small shapes consistent with the module docstring (batch, seq, in_dim);
    # seq=500 deliberately exercises the partial-last-block (masked) path.
    batch, seq = 2, 500
    in_dim, hidden_dim, out_dim = 30, [64, 32], 16

    key = jax.random.PRNGKey(0)
    k_x, k1, k2, k3 = jax.random.split(key, 4)
    x = jax.random.normal(k_x, (batch, seq, in_dim), jnp.float32)

    raw_params = []
    h_in = in_dim
    for k, h_out in zip((k1, k2), hidden_dim):
        raw_params.append(init_linear(k, h_in, h_out))
        h_in = h_out
    raw_params.append(init_linear(k3, h_in, out_dim))

    y_ref = reference_forward(x, raw_params)

    # f32 weights / f32 streams: tight correctness check.
    params_f32 = prepare_params(raw_params, p_drop=P_DROP, weight_dtype=jnp.float32)
    y = jax.block_until_ready(moment_prop_forward(x, params_f32, out_dim))
    assert y.shape == (batch, seq, out_dim)
    assert jnp.allclose(y, y_ref, atol=1e-4, rtol=1e-4), "f32 mismatch vs reference"

    # bf16 weights + bf16 streams (f32 accumulation): relaxed check.
    params_bf16 = prepare_params(raw_params, p_drop=P_DROP, weight_dtype=jnp.bfloat16)
    y_bf16 = jax.block_until_ready(moment_prop_forward(x, params_bf16, out_dim))
    assert y_bf16.shape == (batch, seq, out_dim)
    assert jnp.allclose(y_bf16, y_ref, atol=1.5e-1, rtol=5e-2), "bf16 mismatch"

    print("KERNEL_OK")
</pallas_src>

<mosaic_0001>
module attributes {stable_mosaic.version = 11 : i64} {
  func.func @kernel(%arg0: i32, %arg1: memref<504x30xf32, #tpu.memory_space<vmem>>, %arg2: memref<30x128xf32, #tpu.memory_space<vmem>>, %arg3: memref<1x128xf32, #tpu.memory_space<vmem>>, %arg4: memref<128x128xf32, #tpu.memory_space<vmem>>, %arg5: memref<1x128xf32, #tpu.memory_space<vmem>>, %arg6: memref<128x128xf32, #tpu.memory_space<vmem>>, %arg7: memref<1x128xf32, #tpu.memory_space<vmem>>, %arg8: memref<504x128xf32, #tpu.memory_space<vmem>>) attributes {dimension_semantics = [#tpu.dimension_semantics<parallel>], iteration_bounds = array<i64: 2>, scalar_prefetch = 0 : i64, scratch_operands = 0 : i64, tpu.core_type = #tpu.core_type<tc>, window_params = [{transform_indices = @transform_0, window_bounds = array<i64: 504, 30>}, {pipeline_mode = #tpu.pipeline_mode<synchronous>, transform_indices = @transform_1, window_bounds = array<i64: 30, 128>}, {pipeline_mode = #tpu.pipeline_mode<synchronous>, transform_indices = @transform_2, window_bounds = array<i64: 1, 128>}, {pipeline_mode = #tpu.pipeline_mode<synchronous>, transform_indices = @transform_3, window_bounds = array<i64: 128, 128>}, {pipeline_mode = #tpu.pipeline_mode<synchronous>, transform_indices = @transform_4, window_bounds = array<i64: 1, 128>}, {pipeline_mode = #tpu.pipeline_mode<synchronous>, transform_indices = @transform_5, window_bounds = array<i64: 128, 128>}, {pipeline_mode = #tpu.pipeline_mode<synchronous>, transform_indices = @transform_6, window_bounds = array<i64: 1, 128>}, {transform_indices = @transform_7, window_bounds = array<i64: 504, 128>}]} {
    %c0 = arith.constant 0 : index
    %c0_0 = arith.constant 0 : index
    %0 = vector.load %arg1[%c0, %c0_0] : memref<504x30xf32, #tpu.memory_space<vmem>>, vector<504x30xf32>
    %c0_1 = arith.constant 0 : index
    %c0_2 = arith.constant 0 : index
    %1 = vector.load %arg2[%c0_1, %c0_2] : memref<30x128xf32, #tpu.memory_space<vmem>>, vector<30x128xf32>
    %cst = arith.constant dense<0.000000e+00> : vector<504x128xf32>
    %2 = tpu.matmul %0, %1, %cst {dimension_numbers = #tpu.dot_dimension_numbers<[1], [0], [0], [1], [0, 0, 1, 1], [], []>} : vector<504x30xf32>, vector<30x128xf32>, vector<504x128xf32> -> vector<504x128xf32>
    %c0_3 = arith.constant 0 : index
    %c0_4 = arith.constant 0 : index
    %3 = vector.load %arg3[%c0_3, %c0_4] : memref<1x128xf32, #tpu.memory_space<vmem>>, vector<1x128xf32>
    %4 = vector.broadcast %3 : vector<1x128xf32> to vector<504x128xf32>
    %5 = arith.addf %2, %4 : vector<504x128xf32>
    %cst_5 = arith.constant 0.000000e+00 : f32
    %6 = vector.broadcast %cst_5 : f32 to vector<504x128xf32>
    %7 = arith.maximumf %5, %6 : vector<504x128xf32>
    %c0_6 = arith.constant 0 : index
    %c0_7 = arith.constant 0 : index
    %8 = vector.load %arg4[%c0_6, %c0_7] : memref<128x128xf32, #tpu.memory_space<vmem>>, vector<128x128xf32>
    %cst_8 = arith.constant dense<0.000000e+00> : vector<504x128xf32>
    %9 = tpu.matmul %7, %8, %cst_8 {dimension_numbers = #tpu.dot_dimension_numbers<[1], [0], [0], [1], [0, 0, 1, 1], [], []>} : vector<504x128xf32>, vector<128x128xf32>, vector<504x128xf32> -> vector<504x128xf32>
    %c0_9 = arith.constant 0 : index
    %c0_10 = arith.constant 0 : index
    %10 = vector.load %arg5[%c0_9, %c0_10] : memref<1x128xf32, #tpu.memory_space<vmem>>, vector<1x128xf32>
    %11 = vector.broadcast %10 : vector<1x128xf32> to vector<504x128xf32>
    %12 = arith.addf %9, %11 : vector<504x128xf32>
    %cst_11 = arith.constant 0.000000e+00 : f32
    %13 = vector.broadcast %cst_11 : f32 to vector<504x128xf32>
    %14 = arith.maximumf %12, %13 : vector<504x128xf32>
    %c0_12 = arith.constant 0 : index
    %c0_13 = arith.constant 0 : index
    %15 = vector.load %arg6[%c0_12, %c0_13] : memref<128x128xf32, #tpu.memory_space<vmem>>, vector<128x128xf32>
    %cst_14 = arith.constant dense<0.000000e+00> : vector<504x128xf32>
    %16 = tpu.matmul %14, %15, %cst_14 {dimension_numbers = #tpu.dot_dimension_numbers<[1], [0], [0], [1], [0, 0, 1, 1], [], []>} : vector<504x128xf32>, vector<128x128xf32>, vector<504x128xf32> -> vector<504x128xf32>
    %c0_15 = arith.constant 0 : index
    %c0_16 = arith.constant 0 : index
    %17 = vector.load %arg7[%c0_15, %c0_16] : memref<1x128xf32, #tpu.memory_space<vmem>>, vector<1x128xf32>
    %18 = vector.broadcast %17 : vector<1x128xf32> to vector<504x128xf32>
    %19 = arith.addf %16, %18 : vector<504x128xf32>
    %c0_17 = arith.constant 0 : index
    %c0_18 = arith.constant 0 : index
    %20 = vector.load %arg8[%c0_17, %c0_18] : memref<504x128xf32, #tpu.memory_space<vmem>>, vector<504x128xf32>
    tpu.vector_store %arg8[%c0_17, %c0_18], %19 {strides = array<i32>} : memref<504x128xf32, #tpu.memory_space<vmem>>, vector<504x128xf32>,
    return
  }
  func.func @transform_0(%arg0: i32) -> (i32, i32) {
    %c0_i32 = arith.constant 0 : i32
    %c0_i32_0 = arith.constant 0 : i32
    return %arg0, %c0_i32 : i32, i32
  }
  func.func @transform_1(%arg0: i32) -> (i32, i32) {
    %c0_i32 = arith.constant 0 : i32
    %c0_i32_0 = arith.constant 0 : i32
    %c0_i32_1 = arith.constant 0 : i32
    return %c0_i32, %c0_i32_0 : i32, i32
  }
  func.func @transform_2(%arg0: i32) -> (i32, i32) {
    %c0_i32 = arith.constant 0 : i32
    %c0_i32_0 = arith.constant 0 : i32
    %c0_i32_1 = arith.constant 0 : i32
    return %c0_i32, %c0_i32_0 : i32, i32
  }
  func.func @transform_3(%arg0: i32) -> (i32, i32) {
    %c0_i32 = arith.constant 0 : i32
    %c0_i32_0 = arith.constant 0 : i32
    %c0_i32_1 = arith.constant 0 : i32
    return %c0_i32, %c0_i32_0 : i32, i32
  }
  func.func @transform_4(%arg0: i32) -> (i32, i32) {
    %c0_i32 = arith.constant 0 : i32
    %c0_i32_0 = arith.constant 0 : i32
    %c0_i32_1 = arith.constant 0 : i32
    return %c0_i32, %c0_i32_0 : i32, i32
  }
  func.func @transform_5(%arg0: i32) -> (i32, i32) {
    %c0_i32 = arith.constant 0 : i32
    %c0_i32_0 = arith.constant 0 : i32
    %c0_i32_1 = arith.constant 0 : i32
    return %c0_i32, %c0_i32_0 : i32, i32
  }
  func.func @transform_6(%arg0: i32) -> (i32, i32) {
    %c0_i32 = arith.constant 0 : i32
    %c0_i32_0 = arith.constant 0 : i32
    %c0_i32_1 = arith.constant 0 : i32
    return %c0_i32, %c0_i32_0 : i32, i32
  }
  func.func @transform_7(%arg0: i32) -> (i32, i32) {
    %c0_i32 = arith.constant 0 : i32
    %c0_i32_0 = arith.constant 0 : i32
    return %arg0, %c0_i32 : i32, i32
  }
}

module attributes {stable_mosaic.version = 11 : i64} {
  func.func @kernel(%arg0: i32, %arg1: memref<504x30xf32, #tpu.memory_space<vmem>>, %arg2: memref<30x128xf32, #tpu.memory_space<vmem>>, %arg3: memref<1x128xf32, #tpu.memory_space<vmem>>, %arg4: memref<128x128xf32, #tpu.memory_space<vmem>>, %arg5: memref<1x128xf32, #tpu.memory_space<vmem>>, %arg6: memref<128x128xf32, #tpu.memory_space<vmem>>, %arg7: memref<1x128xf32, #tpu.memory_space<vmem>>, %arg8: memref<504x128xf32, #tpu.memory_space<vmem>>) attributes {dimension_semantics = [#tpu.dimension_semantics<parallel>], iteration_bounds = array<i64: 2>, scalar_prefetch = 0 : i64, scratch_operands = 0 : i64, tpu.core_type = #tpu.core_type<tc>, window_params = [{transform_indices = @transform_0, window_bounds = array<i64: 504, 30>}, {pipeline_mode = #tpu.pipeline_mode<synchronous>, transform_indices = @transform_1, window_bounds = array<i64: 30, 128>}, {pipeline_mode = #tpu.pipeline_mode<synchronous>, transform_indices = @transform_2, window_bounds = array<i64: 1, 128>}, {pipeline_mode = #tpu.pipeline_mode<synchronous>, transform_indices = @transform_3, window_bounds = array<i64: 128, 128>}, {pipeline_mode = #tpu.pipeline_mode<synchronous>, transform_indices = @transform_4, window_bounds = array<i64: 1, 128>}, {pipeline_mode = #tpu.pipeline_mode<synchronous>, transform_indices = @transform_5, window_bounds = array<i64: 128, 128>}, {pipeline_mode = #tpu.pipeline_mode<synchronous>, transform_indices = @transform_6, window_bounds = array<i64: 1, 128>}, {transform_indices = @transform_7, window_bounds = array<i64: 504, 128>}]} {
    %c0 = arith.constant 0 : index
    %c0_0 = arith.constant 0 : index
    %0 = vector.load %arg1[%c0, %c0_0] : memref<504x30xf32, #tpu.memory_space<vmem>>, vector<504x30xf32>
    %c0_1 = arith.constant 0 : index
    %c0_2 = arith.constant 0 : index
    %1 = vector.load %arg2[%c0_1, %c0_2] : memref<30x128xf32, #tpu.memory_space<vmem>>, vector<30x128xf32>
    %cst = arith.constant dense<0.000000e+00> : vector<504x128xf32>
    %2 = tpu.matmul %0, %1, %cst {dimension_numbers = #tpu.dot_dimension_numbers<[1], [0], [0], [1], [0, 0, 1, 1], [], []>} : vector<504x30xf32>, vector<30x128xf32>, vector<504x128xf32> -> vector<504x128xf32>
    %c0_3 = arith.constant 0 : index
    %c0_4 = arith.constant 0 : index
    %3 = vector.load %arg3[%c0_3, %c0_4] : memref<1x128xf32, #tpu.memory_space<vmem>>, vector<1x128xf32>
    %4 = vector.broadcast %3 : vector<1x128xf32> to vector<504x128xf32>
    %5 = arith.addf %2, %4 : vector<504x128xf32>
    %cst_5 = arith.constant 0.000000e+00 : f32
    %6 = vector.broadcast %cst_5 : f32 to vector<504x128xf32>
    %7 = arith.maximumf %5, %6 : vector<504x128xf32>
    %c0_6 = arith.constant 0 : index
    %c0_7 = arith.constant 0 : index
    %8 = vector.load %arg4[%c0_6, %c0_7] : memref<128x128xf32, #tpu.memory_space<vmem>>, vector<128x128xf32>
    %cst_8 = arith.constant dense<0.000000e+00> : vector<504x128xf32>
    %9 = tpu.matmul %7, %8, %cst_8 {dimension_numbers = #tpu.dot_dimension_numbers<[1], [0], [0], [1], [0, 0, 1, 1], [], []>} : vector<504x128xf32>, vector<128x128xf32>, vector<504x128xf32> -> vector<504x128xf32>
    %c0_9 = arith.constant 0 : index
    %c0_10 = arith.constant 0 : index
    %10 = vector.load %arg5[%c0_9, %c0_10] : memref<1x128xf32, #tpu.memory_space<vmem>>, vector<1x128xf32>
    %11 = vector.broadcast %10 : vector<1x128xf32> to vector<504x128xf32>
    %12 = arith.addf %9, %11 : vector<504x128xf32>
    %cst_11 = arith.constant 0.000000e+00 : f32
    %13 = vector.broadcast %cst_11 : f32 to vector<504x128xf32>
    %14 = arith.maximumf %12, %13 : vector<504x128xf32>
    %c0_12 = arith.constant 0 : index
    %c0_13 = arith.constant 0 : index
    %15 = vector.load %arg6[%c0_12, %c0_13] : memref<128x128xf32, #tpu.memory_space<vmem>>, vector<128x128xf32>
    %cst_14 = arith.constant dense<0.000000e+00> : vector<504x128xf32>
    %16 = tpu.matmul %14, %15, %cst_14 {dimension_numbers = #tpu.dot_dimension_numbers<[1], [0], [0], [1], [0, 0, 1, 1], [], []>} : vector<504x128xf32>, vector<128x128xf32>, vector<504x128xf32> -> vector<504x128xf32>
    %c0_15 = arith.constant 0 : index
    %c0_16 = arith.constant 0 : index
    %17 = vector.load %arg7[%c0_15, %c0_16] : memref<1x128xf32, #tpu.memory_space<vmem>>, vector<1x128xf32>
    %18 = vector.broadcast %17 : vector<1x128xf32> to vector<504x128xf32>
    %19 = arith.addf %16, %18 : vector<504x128xf32>
    %c0_17 = arith.constant 0 : index
    %c0_18 = arith.constant 0 : index
    %20 = vector.load %arg8[%c0_17, %c0_18] : memref<504x128xf32, #tpu.memory_space<vmem>>, vector<504x128xf32>
    tpu.vector_store %arg8[%c0_17, %c0_18], %19 {strides = array<i32>} : memref<504x128xf32, #tpu.memory_space<vmem>>, vector<504x128xf32>,
    return
  }
  func.func @transform_0(%arg0: i32) -> (i32, i32) {
    %c0_i32 = arith.constant 0 : i32
    %c0_i32_0 = arith.constant 0 : i32
    return %arg0, %c0_i32 : i32, i32
  }
  func.func @transform_1(%arg0: i32) -> (i32, i32) {
    %c0_i32 = arith.constant 0 : i32
    %c0_i32_0 = arith.constant 0 : i32
    %c0_i32_1 = arith.constant 0 : i32
    return %c0_i32, %c0_i32_0 : i32, i32
  }
  func.func @transform_2(%arg0: i32) -> (i32, i32) {
    %c0_i32 = arith.constant 0 : i32
    %c0_i32_0 = arith.constant 0 : i32
    %c0_i32_1 = arith.constant 0 : i32
    return %c0_i32, %c0_i32_0 : i32, i32
  }
  func.func @transform_3(%arg0: i32) -> (i32, i32) {
    %c0_i32 = arith.constant 0 : i32
    %c0_i32_0 = arith.constant 0 : i32
    %c0_i32_1 = arith.constant 0 : i32
    return %c0_i32, %c0_i32_0 : i32, i32
  }
  func.func @transform_4(%arg0: i32) -> (i32, i32) {
    %c0_i32 = arith.constant 0 : i32
    %c0_i32_0 = arith.constant 0 : i32
    %c0_i32_1 = arith.constant 0 : i32
    return %c0_i32, %c0_i32_0 : i32, i32
  }
  func.func @transform_5(%arg0: i32) -> (i32, i32) {
    %c0_i32 = arith.constant 0 : i32
    %c0_i32_0 = arith.constant 0 : i32
    %c0_i32_1 = arith.constant 0 : i32
    return %c0_i32, %c0_i32_0 : i32, i32
  }
  func.func @transform_6(%arg0: i32) -> (i32, i32) {
    %c0_i32 = arith.constant 0 : i32
    %c0_i32_0 = arith.constant 0 : i32
    %c0_i32_1 = arith.constant 0 : i32
    return %c0_i32, %c0_i32_0 : i32, i32
  }
  func.func @transform_7(%arg0: i32) -> (i32, i32) {
    %c0_i32 = arith.constant 0 : i32
    %c0_i32_0 = arith.constant 0 : i32
    return %arg0, %c0_i32 : i32, i32
  }
}

</mosaic_0001>

<bundles_post_ra>
// kernel: tpu_custom_call.1
= control target key start
LH: loop header
LB: loop body
LE: loop exit
PB: predicated region body
PF: predicated region fallthrough
CT: control target
= control target key end

     0   :  { %12 = vsyncpa [#allocation3], 0  ;;  %s2479_s0 = inlined_call_operand.vmem [shape: f32[1000,30], index: 0, kind: input, shape index: {}]   ;;  %s2480_s1 = inlined_call_operand.vmem [shape: f32[30,128], index: 1, kind: input, shape index: {}]   ;;  %s2481_s2 = inlined_call_operand.vmem [shape: f32[1,128], index: 2, kind: input, shape index: {}]   ;;  %s2482_s3 = inlined_call_operand.vmem [shape: f32[128,128], index: 3, kind: input, shape index: {}]   ;;  %s2483_s4 = inlined_call_operand.vmem [shape: f32[1,128], index: 4, kind: input, shape index: {}]   ;;  %s2484_s5 = inlined_call_operand.vmem [shape: f32[128,128], index: 5, kind: input, shape index: {}]   ;;  %s2485_s6 = inlined_call_operand.vmem [shape: f32[1,128], index: 6, kind: input, shape index: {}]   ;;  %s2486_s7 = inlined_call_operand.hbm [shape: f32[1000,128], index: 7, kind: output, shape index: {}]  }
   0x1   :  { %14 = vsyncpa [#allocation3 + $0x1], 0  ;;  %s1778_s24 = smov 0   ;;  %s1780_s25 = smov 0  }
   0x2   :  { %s1782_s26 = smov 0   ;;  %s1784_s27 = smov 0  }
   0x3 LB: > { %s1799_s28 = sadd.s32 4294967295, %s1733_s27   ;;  %s1501_s29 = sadd.s32 4294967294, %s1733_s27   ;;  %s1733_s27 = sphi %s1784_s27, %s2495_s27   ;;  %s1729_s26 = sphi %s1782_s26, %s2494_s26   ;;  %s1725_s25 = sphi %s1780_s25, %s2493_s25   ;;  %s1721_s24 = sphi %s1778_s24, %s2492_s24  }
   0x4   : > { %s1803_s30 = sadd.s32 1, %s1733_s27   ;;  %s179_s8 = sadd.s32 1, %s1729_s26 }
   0x5   : > { %s176_s9 = ssub.s32 %s1733_s27, %s1803_s30  ;;  %p189_p0 = scmp.ne.s32.totalorder %s1729_s26, %s1725_s25 }
   0x6   : > { %p177_p1 = scmp.eq.s32.totalorder %s176_s9, 0  ;;  %p190_p2 = scmp.eq.s32.totalorder %s1799_s28, 1 }
   0x7   : > { %p195_p3 = scmp.ne.s32.totalorder %s1725_s25, %s1721_s24  ;;  %p196_p4 = scmp.eq.s32.totalorder %s1501_s29, 1 }
   0x8   : > { %s1814_s10 = scalar_select %p177_p1, %s1729_s26, %s179_s8  }
   0x9   : > { %p1816_p5 = por %p190_p2, %p189_p0  ;;  %p1820_p6 = por %p196_p4, %p195_p3 }
   0xa   : > { %p1504_p7 = scmp.ge.s32.totalorder %s1733_s27, 1  ;;  %p249_p8 = scmp.lt.s32.totalorder %s1733_s27, 3 }
   0xc   : > { %p250_p9 = pnand %p1504_p7, %p249_p8 }
   0xd   : > { %s1833_s17 = smul.u32 (!%p250_p9), 63, %s1799_s28 }
   0xe   : > { %253 = sbr.rel (%p250_p9) target bundleno = 956 (0x3bc), region = 48 }
   0xf   : > { %p290_p10 = scmp.lt.s32.totalorder (!%p250_p9), %s1833_s17, 124 }
  0x13   : > { %v370_v0 = vld [vmem:[%s2480_s1 + $0x18] sm:$0x3f]  ;;  %vm565_vm0 = vcmask 1045504   ;;  %v369_v1 = vld [vmem:[%s2480_s1 + $0x10] sm:$0xff]  ;;  %v368_v2 = vld [vmem:[%s2480_s1 + $0x8] sm:$0xff]  ;;  %s291_s22 = scalar_select %p290_p10, %s1833_s17, 124 }
  0x14   : > { %1506 = vmatpush.msk.msra.mxu0 %vm565_vm0, %v370_v0  ;;  %1578 = vmatpush.msk.msra.mxu3 %vm565_vm0, %v370_v0  ;;  %v367_v3 = vld [vmem:[%s2480_s1] sm:$0xff]  ;;  %vm375_vm1 = vcmask 244736   ;;  %v853_v13 = vld [vmem:[%s2482_s3 + $0x78] sm:$0xff]  ;;  %v852_v14 = vld [vmem:[%s2482_s3 + $0x70] sm:$0xff]  ;;  %s1425_s19 = ssub.s32 (%p1816_p5), 125, %s1833_s17 }
  0x15   : > { %s1505_s23 = sshll.u32 %s291_s22, 3  ;;  %858 = vmatpush.msra.mxu1 %v853_v13  ;;  %v851_v15 = vld [vmem:[%s2482_s3 + $0x68] sm:$0xff]  ;;  %v850_v17 = vld [vmem:[%s2482_s3 + $0x60] sm:$0xff]  ;;  %v849_v18 = vld [vmem:[%s2482_s3 + $0x58] sm:$0xff]  ;;  %s282_s22 = sand.u32 1, %s1725_s25  }
  0x16   : > { %582 = vmatpush.msra.mxu0 %v369_v1  ;;  %1579 = vmatpush.msra.mxu3 %v369_v1  ;;  %s1846_s9 = scalar_lea.vmem %s2479_s0, %s1505_s23  ;;  %v848_v19 = vld [vmem:[%s2482_s3 + $0x50] sm:$0xff]  ;;  %v847_v20 = vld [vmem:[%s2482_s3 + $0x48] sm:$0xff]  ;;  %v846_v22 = vld [vmem:[%s2482_s3 + $0x40] sm:$0xff]  ;;  %s1614_s23 = smul.u32 504, %s282_s22 }
  0x17   : > { %v304_v4 = vld [vmem:[%s1846_s9] sm:$0xff]  ;;  %v305_v5 = vld [vmem:[%s1846_s9 + $0x8] sm:$0xff]  ;;  %v306_v6 = vld [vmem:[%s1846_s9 + $0x10] sm:$0xff]  ;;  %859 = vmatpush.msra.mxu1 %v852_v14  ;;  %s2418_s18 = scalar_lea.sflag [#allocation3], %s282_s22  ;;  %p1426_p11 = scmp.lt.s32.totalorder (%p1816_p5), %s1425_s19, 63 }
  0x18   : > { %583 = vmatpush.msra.mxu0 %v368_v2  ;;  %1580 = vmatpush.msra.mxu3 %v368_v2  ;;  %v307_v7 = vld [vmem:[%s1846_s9 + $0x18] sm:$0xff]  ;;  %v308_v8 = vld [vmem:[%s1846_s9 + $0x20] sm:$0xff]  ;;  %v309_v9 = vld [vmem:[%s1846_s9 + $0x28] sm:$0xff]  ;;  %s2188_s13 = scalar_lea.vmem [#allocation2], %s1614_s23 }
  0x19   : > { %v310_v10 = vld [vmem:[%s1846_s9 + $0x30] sm:$0xff]  ;;  %v311_v11 = vld [vmem:[%s1846_s9 + $0x38] sm:$0xff]  ;;  %v312_v12 = vld [vmem:[%s1846_s9 + $0x40] sm:$0xff]  ;;  %860 = vmatpush.msra.mxu1 %v851_v15 }
  0x1a   : > { %584 = vmatpush.msra.mxu0 %v367_v3  ;;  %1581 = vmatpush.msra.mxu3 %v367_v3  ;;  %v313_v16 = vld [vmem:[%s1846_s9 + $0x48] sm:$0xff]  ;;  %v314_v21 = vld [vmem:[%s1846_s9 + $0x50] sm:$0xff]  ;;  %v845_v23 = vld [vmem:[%s2482_s3 + $0x38] sm:$0xff] }
  0x1b   : > { %1507 = vmatmul.msk.f32.vlgmr.msra.gmra.mxu0 %vm375_vm1, %v304_v4  ;;  %861 = vmatpush.msra.mxu1 %v850_v17  ;;  %v844_v24 = vld [vmem:[%s2482_s3 + $0x30] sm:$0xff]  ;;  %v843_v25 = vld [vmem:[%s2482_s3 + $0x28] sm:$0xff]  ;;  %v315_v26 = vld [vmem:[%s1846_s9 + $0x58] sm:$0xff] }
  0x1c   : > { %1582 = vmatpush.msrb.mxu3 %v853_v13  ;;  %v842_v27 = vld [vmem:[%s2482_s3 + $0x20] sm:$0xff]  ;;  %v841_v28 = vld [vmem:[%s2482_s3 + $0x18] sm:$0xff]  ;;  %v840_v29 = vld [vmem:[%s2482_s3 + $0x10] sm:$0xff] }
  0x1d   : > { %862 = vmatpush.msra.mxu1 %v849_v18  ;;  %v316_v30 = vld [vmem:[%s1846_s9 + $0x60] sm:$0xff]  ;;  %v839_v31 = vld [vmem:[%s2482_s3 + $0x8] sm:$0xff]  ;;  %v318_v34 = vld [vmem:[%s1846_s9 + $0x70] sm:$0xff] }
  0x1e   : > { %1583 = vmatpush.msrb.mxu3 %v852_v14  ;;  %v838_v32 = vld [vmem:[%s2482_s3] sm:$0xff]  ;;  %v317_v33 = vld [vmem:[%s1846_s9 + $0x68] sm:$0xff]  ;;  %v319_v35 = vld [vmem:[%s1846_s9 + $0x78] sm:$0xff] }
  0x1f   : > { %863 = vmatpush.msra.mxu1 %v848_v19  ;;  %v1931_v36 = vld [vmem:[%s2481_s2] ss:$0 sm:$0xff]  ;;  %v321_v42 = vld [vmem:[%s1846_s9 + $0x88] sm:$0xff]  ;;  %v322_v46 = vld [vmem:[%s1846_s9 + $0x90] sm:$0xff] }
  0x20   : > { %1584 = vmatpush.msrb.mxu3 %v851_v15  ;;  %v320_v38 = vld [vmem:[%s1846_s9 + $0x80] sm:$0xff]  ;;  %v323_v50 = vld [vmem:[%s1846_s9 + $0x98] sm:$0xff]  ;;  %v325_v58 = vld [vmem:[%s1846_s9 + $0xa8] sm:$0xff] }
  0x21   : > { %864 = vmatpush.msra.mxu1 %v847_v20  ;;  %v324_v54 = vld [vmem:[%s1846_s9 + $0xa0] sm:$0xff]  ;;  %v326_v62 = vld [vmem:[%s1846_s9 + $0xb0] sm:$0xff]  ;;  %v327_v2 = vld [vmem:[%s1846_s9 + $0xb8] sm:$0xff] }
  0x22   : > { %1585 = vmatpush.msrb.mxu3 %v850_v17  ;;  %v1971_v13 = vld [vmem:[%s2484_s5 + $0x70] sm:$0xff]  ;;  %v1978_v15 = vld [vmem:[%s2484_s5 + $0x68] sm:$0xff]  ;;  %v1990_v17 = vld [vmem:[%s2484_s5 + $0x58] sm:$0xff] }
  0x23   : > { %1508 = vmatmul.msk.f32.gmra.mxu0 %vm375_vm1, %v305_v5  ;;  %865 = vmatpush.msra.mxu1 %v846_v22 }
  0x24   : > { %1586 = vmatpush.msrb.mxu3 %v849_v18 }
  0x25   : > { %866 = vmatpush.msra.mxu1 %v845_v23 }
  0x26   : > { %1587 = vmatpush.msrb.mxu3 %v848_v19  ;;  %v330_v19 = vld [vmem:[%s1846_s9 + $0xd0] sm:$0xff] }
  0x27   : > { %867 = vmatpush.msra.mxu1 %v844_v24 }
  0x28   : > { %1588 = vmatpush.msrb.mxu3 %v847_v20 }
  0x29   : > { %868 = vmatpush.msra.mxu1 %v843_v25 }
  0x2a   : > { %1589 = vmatpush.msrb.mxu3 %v846_v22 }
  0x2b   : > { %1509 = vmatmul.msk.f32.gmra.mxu0 %vm375_vm1, %v306_v6  ;;  %869 = vmatpush.msra.mxu1 %v842_v27  ;;  %v328_v6 = vld [vmem:[%s1846_s9 + $0xc0] sm:$0xff] }
  0x2c   : > { %1590 = vmatpush.msrb.mxu3 %v845_v23  ;;  %v2005_v23 = vld [vmem:[%s2484_s5 + $0x48] sm:$0xff] }
  0x2d   : > { %870 = vmatpush.msra.mxu1 %v841_v28 }
  0x2e   : > { %1591 = vmatpush.msrb.mxu3 %v844_v24  ;;  %v2011_v24 = vld [vmem:[%s2484_s5 + $0x40] sm:$0xff] }
  0x2f   : > { %871 = vmatpush.msra.mxu1 %v840_v29 }
  0x30   : > { %1592 = vmatpush.msrb.mxu3 %v843_v25  ;;  %v2017_v25 = vld [vmem:[%s2484_s5 + $0x38] sm:$0xff] }
  0x31   : > { %872 = vmatpush.msra.mxu1 %v839_v31 }
  0x32   : > { %1593 = vmatpush.msrb.mxu3 %v842_v27  ;;  %v331_v27 = vld [vmem:[%s1846_s9 + $0xd8] sm:$0xff] }
  0x33   : > { %1510 = vmatmul.msk.f32.gmra.mxu0 %vm375_vm1, %v307_v7  ;;  %873 = vmatpush.msra.mxu1 %v838_v32 }
  0x34   : > { %1594 = vmatpush.msrb.mxu3 %v841_v28 }
  0x36   : > { %1595 = vmatpush.msrb.mxu3 %v840_v29  ;;  %v2025_v29 = vld [vmem:[%s2484_s5 + $0x30] sm:$0xff] }
  0x38   : > { %1596 = vmatpush.msrb.mxu3 %v839_v31  ;;  %v2032_v31 = vld [vmem:[%s2484_s5 + $0x28] sm:$0xff] }
  0x3a   : > { %1597 = vmatpush.msrb.mxu3 %v838_v32  ;;  %v2038_v32 = vld [vmem:[%s2484_s5 + $0x20] sm:$0xff] }
  0x3b   : > { %1511 = vmatmul.msk.f32.gmra.mxu0 %vm375_vm1, %v308_v8 }
  0x43   : > { %1512 = vmatmul.msk.f32.gmra.mxu0 %vm375_vm1, %v309_v9  ;;  %v1963_v9 = vld [vmem:[%s2484_s5 + $0x78] sm:$0xff] }
  0x44   : > { %1147 = vmatpush.msra.mxu2 %v1963_v9 }
  0x46   : > { %1148 = vmatpush.msra.mxu2 %v1971_v13 }
  0x48   : > { %1149 = vmatpush.msra.mxu2 %v1978_v15 }
  0x4b   : > { %1513 = vmatmul.msk.f32.gmra.mxu0 %vm375_vm1, %v310_v10 }
  0x53   : > { %1514 = vmatmul.msk.f32.gmra.mxu0 %vm375_vm1, %v311_v11  ;;  %v329_v11 = vld [vmem:[%s1846_s9 + $0xc8] sm:$0xff] }
  0x5b   : > { %1515 = vmatmul.msk.f32.gmra.mxu0 %vm375_vm1, %v312_v12 }
  0x63   : > { %1516 = vmatmul.msk.f32.gmra.mxu0 %vm375_vm1, %v313_v16  ;;  %v1984_v16 = vld [vmem:[%s2484_s5 + $0x60] sm:$0xff] }
  0x64   : > { %1150 = vmatpush.msra.mxu2 %v1984_v16 }
  0x66   : > { %1151 = vmatpush.msra.mxu2 %v1990_v17 }
  0x6b   : > { %1517 = vmatmul.msk.f32.gmra.mxu0 %vm375_vm1, %v314_v21  ;;  %v1998_v21 = vld [vmem:[%s2484_s5 + $0x50] sm:$0xff] }
  0x6c   : > { %1152 = vmatpush.msra.mxu2 %v1998_v21 }
  0x6e   : > { %1153 = vmatpush.msra.mxu2 %v2005_v23 }
  0x70   : > { %1154 = vmatpush.msra.mxu2 %v2011_v24 }
  0x72   : > { %1155 = vmatpush.msra.mxu2 %v2017_v25 }
  0x73   : > { %1518 = vmatmul.msk.f32.gmra.mxu0 %vm375_vm1, %v315_v26 }
  0x74   : > { %1156 = vmatpush.msra.mxu2 %v2025_v29 }
  0x76   : > { %1157 = vmatpush.msra.mxu2 %v2032_v31 }
  0x78   : > { %1158 = vmatpush.msra.mxu2 %v2038_v32 }
  0x7b   : > { %1519 = vmatmul.msk.f32.gmra.mxu0 %vm375_vm1, %v316_v30 }
  0x83   : > { %1520 = vmatmul.msk.f32.gmra.mxu0 %vm375_vm1, %v317_v33  ;;  %v2044_v33 = vld [vmem:[%s2484_s5 + $0x18] sm:$0xff] }
  0x84   : > { %1159 = vmatpush.msra.mxu2 %v2044_v33 }
  0x8b   : > { %1521 = vmatmul.msk.f32.gmra.mxu0 %vm375_vm1, %v318_v34 }
  0x93   : > { %1522 = vmatmul.msk.f32.gmra.mxu0 %vm375_vm1, %v319_v35  ;;  %v332_v35 = vld [vmem:[%s1846_s9 + $0xe0] sm:$0xff] }
  0x98   : > { %v586_v37 = vpop.f32.mrf.mxu0 }
  0x99   : > { %v587_v39 = vadd.f32 %v1931_v36, %v586_v37 }
  0x9b   : > { %1523 = vmatmul.msk.f32.gmra.mxu0 %vm375_vm1, %v320_v38  ;;  %v775_v40 = vmax.f32 %v587_v39, 0.0  ;;  %v2052_v38 = vld [vmem:[%s2484_s5 + $0x10] sm:$0xff] }
  0x9c   : > { %1160 = vmatpush.msra.mxu2 %v2052_v38 }
  0x9d   : > { %874 = vmatmul.f32.vlgmr.msra.gmra.mxu1 %v775_v40  ;;  %v2059_v40 = vld [vmem:[%s2484_s5 + $0x8] sm:$0xff] }
  0x9e   : > { %1161 = vmatpush.msra.mxu2 %v2059_v40 }
  0xa0   : > { %v589_v41 = vpop.f32.mrf.mxu0 }
  0xa1   : > { %v590_v43 = vadd.f32 %v1931_v36, %v589_v41  ;;  %v2065_v41 = vld [vmem:[%s2484_s5] sm:$0xff] }
  0xa2   : > { %1162 = vmatpush.msra.mxu2 %v2065_v41 }
  0xa3   : > { %1524 = vmatmul.msk.f32.gmra.mxu0 %vm375_vm1, %v321_v42  ;;  %v776_v44 = vmax.f32 %v590_v43, 0.0  ;;  %v333_v43 = vld [vmem:[%s1846_s9 + $0xe8] sm:$0xff] }
  0xa5   : > { %877 = vmatmul.f32.gmra.mxu1 %v776_v44 }
  0xa8   : > { %v592_v45 = vpop.f32.mrf.mxu0 }
  0xa9   : > { %v593_v47 = vadd.f32 %v1931_v36, %v592_v45 }
  0xab   : > { %1525 = vmatmul.msk.f32.gmra.mxu0 %vm375_vm1, %v322_v46  ;;  %v777_v48 = vmax.f32 %v593_v47, 0.0  ;;  %v334_v47 = vld [vmem:[%s1846_s9 + $0xf0] sm:$0xff] }
  0xad   : > { %880 = vmatmul.f32.gmra.mxu1 %v777_v48 }
  0xb0   : > { %v595_v49 = vpop.f32.mrf.mxu0 }
  0xb1   : > { %v596_v51 = vadd.f32 %v1931_v36, %v595_v49 }
  0xb3   : > { %1526 = vmatmul.msk.f32.gmra.mxu0 %vm375_vm1, %v323_v50  ;;  %v778_v52 = vmax.f32 %v596_v51, 0.0  ;;  %v335_v51 = vld [vmem:[%s1846_s9 + $0xf8] sm:$0xff] }
  0xb5   : > { %883 = vmatmul.f32.gmra.mxu1 %v778_v52 }
  0xb8   : > { %v598_v53 = vpop.f32.mrf.mxu0 }
  0xb9   : > { %v599_v55 = vadd.f32 %v1931_v36, %v598_v53 }
  0xbb   : > { %1527 = vmatmul.msk.f32.gmra.mxu0 %vm375_vm1, %v324_v54  ;;  %v779_v56 = vmax.f32 %v599_v55, 0.0  ;;  %v2080_v54 = vld [vmem:[%s2483_s4] ss:$0 sm:$0xff] }
  0xbd   : > { %886 = vmatmul.f32.gmra.mxu1 %v779_v56  ;;  %v336_v56 = vld [vmem:[%s1846_s9 + $0x100] sm:$0xff] }
  0xc0   : > { %v601_v57 = vpop.f32.mrf.mxu0 }
  0xc1   : > { %v602_v59 = vadd.f32 %v1931_v36, %v601_v57 }
  0xc3   : > { %1528 = vmatmul.msk.f32.gmra.mxu0 %vm375_vm1, %v325_v58  ;;  %v780_v60 = vmax.f32 %v602_v59, 0.0 }
  0xc5   : > { %889 = vmatmul.f32.gmra.mxu1 %v780_v60 }
  0xc8   : > { %v604_v61 = vpop.f32.mrf.mxu0 }
  0xc9   : > { %v605_v63 = vadd.f32 %v1931_v36, %v604_v61 }
  0xcb   : > { %1529 = vmatmul.msk.f32.gmra.mxu0 %vm375_vm1, %v326_v62  ;;  %v781_v0 = vmax.f32 %v605_v63, 0.0  ;;  %v337_v63 = vld [vmem:[%s1846_s9 + $0x108] sm:$0xff] }
  0xcd   : > { %892 = vmatmul.f32.gmra.mxu1 %v781_v0 }
  0xd0   : > { %v607_v1 = vpop.f32.mrf.mxu0 }
  0xd1   : > { %v608_v3 = vadd.f32 %v1931_v36, %v607_v1 }
  0xd3   : > { %1530 = vmatmul.msk.f32.gmra.mxu0 %vm375_vm1, %v327_v2  ;;  %v782_v4 = vmax.f32 %v608_v3, 0.0 }
  0xd5   : > { %895 = vmatmul.f32.gmra.mxu1 %v782_v4 }
  0xd8   : > { %v610_v5 = vpop.f32.mrf.mxu0 }
  0xd9   : > { %v611_v7 = vadd.f32 %v1931_v36, %v610_v5 }
  0xdb   : > { %1531 = vmatmul.msk.f32.gmra.mxu0 %vm375_vm1, %v328_v6  ;;  %v783_v8 = vmax.f32 %v611_v7, 0.0  ;;  %v338_v6 = vld [vmem:[%s1846_s9 + $0x110] sm:$0xff] }
  0xdd   : > { %898 = vmatmul.f32.gmra.mxu1 %v783_v8 }
  0xe0   : > { %v613_v10 = vpop.f32.mrf.mxu0 }
  0xe1   : > { %v614_v12 = vadd.f32 %v1931_v36, %v613_v10 }
  0xe3   : > { %1532 = vmatmul.msk.f32.gmra.mxu0 %vm375_vm1, %v329_v11  ;;  %v784_v14 = vmax.f32 %v614_v12, 0.0 }
  0xe5   : > { %901 = vmatmul.f32.gmra.mxu1 %v784_v14 }
  0xe8   : > { %v616_v18 = vpop.f32.mrf.mxu0 }
  0xe9   : > { %v617_v20 = vadd.f32 %v1931_v36, %v616_v18  ;;  %v339_v18 = vld [vmem:[%s1846_s9 + $0x118] sm:$0xff] }
  0xeb   : > { %1533 = vmatmul.msk.f32.gmra.mxu0 %vm375_vm1, %v330_v19  ;;  %v785_v22 = vmax.f32 %v617_v20, 0.0 }
  0xed   : > { %904 = vmatmul.f32.gmra.mxu1 %v785_v22 }
  0xf0   : > { %v619_v26 = vpop.f32.mrf.mxu0 }
  0xf1   : > { %v620_v28 = vadd.f32 %v1931_v36, %v619_v26 }
  0xf3   : > { %1534 = vmatmul.msk.f32.gmra.mxu0 %vm375_vm1, %v331_v27  ;;  %v786_v30 = vmax.f32 %v620_v28, 0.0 }
  0xf5   : > { %907 = vmatmul.f32.gmra.mxu1 %v786_v30  ;;  %v340_v30 = vld [vmem:[%s1846_s9 + $0x120] sm:$0xff] }
  0xf8   : > { %v622_v34 = vpop.f32.mrf.mxu0 }
  0xf9   : > { %v623_v37 = vadd.f32 %v1931_v36, %v622_v34 }
  0xfb   : > { %1535 = vmatmul.msk.f32.gmra.mxu0 %vm375_vm1, %v332_v35  ;;  %v787_v39 = vmax.f32 %v623_v37, 0.0 }
  0xfd   : > { %910 = vmatmul.f32.gmra.mxu1 %v787_v39 }
 0x100   : > { %v625_v42 = vpop.f32.mrf.mxu0 }
 0x101   : > { %v626_v44 = vadd.f32 %v1931_v36, %v625_v42 }
 0x103   : > { %1536 = vmatmul.msk.f32.gmra.mxu0 %vm375_vm1, %v333_v43  ;;  %v788_v45 = vmax.f32 %v626_v44, 0.0  ;;  %v341_v44 = vld [vmem:[%s1846_s9 + $0x128] sm:$0xff] }
 0x105   : > { %913 = vmatmul.f32.gmra.mxu1 %v788_v45 }
 0x108   : > { %v628_v46 = vpop.f32.mrf.mxu0 }
 0x109   : > { %v629_v48 = vadd.f32 %v1931_v36, %v628_v46 }
 0x10b   : > { %1537 = vmatmul.msk.f32.gmra.mxu0 %vm375_vm1, %v334_v47  ;;  %v789_v49 = vmax.f32 %v629_v48, 0.0 }
 0x10d   : > { %916 = vmatmul.f32.gmra.mxu1 %v789_v49 }
 0x110   : > { %v631_v50 = vpop.f32.mrf.mxu0 }
 0x111   : > { %v632_v52 = vadd.f32 %v1931_v36, %v631_v50 }
 0x113   : > { %1538 = vmatmul.msk.f32.gmra.mxu0 %vm375_vm1, %v335_v51  ;;  %v790_v53 = vmax.f32 %v632_v52, 0.0  ;;  %v342_v51 = vld [vmem:[%s1846_s9 + $0x130] sm:$0xff] }
 0x115   : > { %919 = vmatmul.f32.gmra.mxu1 %v790_v53 }
 0x118   : > { %v634_v55 = vpop.f32.mrf.mxu0 }
 0x119   : > { %v635_v57 = vadd.f32 %v1931_v36, %v634_v55 }
 0x11a   : > { %v875_v58 = vpop.f32.mrf.mxu1 }
 0x11b   : > { %v876_v59 = vadd.f32 %v2080_v54, %v875_v58  ;;  %1539 = vmatmul.msk.f32.gmra.mxu0 %vm375_vm1, %v336_v56  ;;  %v791_v60 = vmax.f32 %v635_v57, 0.0 }
 0x11d   : > { %922 = vmatmul.f32.gmra.mxu1 %v791_v60  ;;  %v1064_v61 = vmax.f32 %v876_v59, 0.0  ;;  %v343_v59 = vld [vmem:[%s1846_s9 + $0x138] sm:$0xff] }
 0x11f   : > { %1163 = vmatmul.f32.vlgmr.msra.gmra.mxu2 %v1064_v61 }
 0x120   : > { %v637_v62 = vpop.f32.mrf.mxu0 }
 0x121   : > { %v638_v0 = vadd.f32 %v1931_v36, %v637_v62 }
 0x122   : > { %v878_v1 = vpop.f32.mrf.mxu1 }
 0x123   : > { %v879_v2 = vadd.f32 %v2080_v54, %v878_v1  ;;  %1540 = vmatmul.msk.f32.gmra.mxu0 %vm375_vm1, %v337_v63  ;;  %v792_v3 = vmax.f32 %v638_v0, 0.0 }
 0x125   : > { %925 = vmatmul.f32.gmra.mxu1 %v792_v3  ;;  %v1065_v4 = vmax.f32 %v879_v2, 0.0  ;;  %v344_v2 = vld [vmem:[%s1846_s9 + $0x140] sm:$0xff] }
 0x127   : > { %1166 = vmatmul.f32.gmra.mxu2 %v1065_v4 }
 0x128   : > { %v640_v5 = vpop.f32.mrf.mxu0 }
 0x129   : > { %v641_v7 = vadd.f32 %v1931_v36, %v640_v5 }
 0x12a   : > { %v881_v8 = vpop.f32.mrf.mxu1 }
 0x12b   : > { %v882_v10 = vadd.f32 %v2080_v54, %v881_v8  ;;  %1541 = vmatmul.msk.f32.gmra.mxu0 %vm375_vm1, %v338_v6  ;;  %v793_v11 = vmax.f32 %v641_v7, 0.0 }
 0x12d   : > { %928 = vmatmul.f32.gmra.mxu1 %v793_v11  ;;  %v1066_v12 = vmax.f32 %v882_v10, 0.0  ;;  %v345_v10 = vld [vmem:[%s1846_s9 + $0x148] sm:$0xff] }
 0x12f   : > { %1169 = vmatmul.f32.gmra.mxu2 %v1066_v12 }
 0x130   : > { %v643_v14 = vpop.f32.mrf.mxu0 }
 0x131   : > { %v644_v19 = vadd.f32 %v1931_v36, %v643_v14 }
 0x132   : > { %v884_v20 = vpop.f32.mrf.mxu1 }
 0x133   : > { %v885_v22 = vadd.f32 %v2080_v54, %v884_v20  ;;  %1542 = vmatmul.msk.f32.gmra.mxu0 %vm375_vm1, %v339_v18  ;;  %v794_v26 = vmax.f32 %v644_v19, 0.0 }
 0x135   : > { %931 = vmatmul.f32.gmra.mxu1 %v794_v26  ;;  %v1067_v27 = vmax.f32 %v885_v22, 0.0  ;;  %v346_v22 = vld [vmem:[%s1846_s9 + $0x150] sm:$0xff] }
 0x137   : > { %1172 = vmatmul.f32.gmra.mxu2 %v1067_v27 }
 0x138   : > { %v646_v28 = vpop.f32.mrf.mxu0 }
 0x139   : > { %v647_v34 = vadd.f32 %v1931_v36, %v646_v28 }
 0x13a   : > { %v887_v35 = vpop.f32.mrf.mxu1 }
 0x13b   : > { %v888_v37 = vadd.f32 %v2080_v54, %v887_v35  ;;  %1543 = vmatmul.msk.f32.gmra.mxu0 %vm375_vm1, %v340_v30  ;;  %v795_v39 = vmax.f32 %v647_v34, 0.0 }
 0x13d   : > { %934 = vmatmul.f32.gmra.mxu1 %v795_v39  ;;  %v1068_v42 = vmax.f32 %v888_v37, 0.0  ;;  %v347_v37 = vld [vmem:[%s1846_s9 + $0x158] sm:$0xff] }
 0x13f   : > { %1175 = vmatmul.f32.gmra.mxu2 %v1068_v42 }
 0x140   : > { %v649_v43 = vpop.f32.mrf.mxu0 }
 0x141   : > { %v650_v45 = vadd.f32 %v1931_v36, %v649_v43 }
 0x142   : > { %v890_v46 = vpop.f32.mrf.mxu1 }
 0x143   : > { %v891_v47 = vadd.f32 %v2080_v54, %v890_v46  ;;  %1544 = vmatmul.msk.f32.gmra.mxu0 %vm375_vm1, %v341_v44  ;;  %v796_v48 = vmax.f32 %v650_v45, 0.0 }
 0x145   : > { %937 = vmatmul.f32.gmra.mxu1 %v796_v48  ;;  %v1069_v49 = vmax.f32 %v891_v47, 0.0  ;;  %v348_v47 = vld [vmem:[%s1846_s9 + $0x160] sm:$0xff] }
 0x147   : > { %1178 = vmatmul.f32.gmra.mxu2 %v1069_v49 }
 0x148   : > { %v652_v50 = vpop.f32.mrf.mxu0 }
 0x149   : > { %v653_v52 = vadd.f32 %v1931_v36, %v652_v50 }
 0x14a   : > { %v893_v53 = vpop.f32.mrf.mxu1 }
 0x14b   : > { %v894_v55 = vadd.f32 %v2080_v54, %v893_v53  ;;  %1545 = vmatmul.msk.f32.gmra.mxu0 %vm375_vm1, %v342_v51  ;;  %v797_v56 = vmax.f32 %v653_v52, 0.0  ;;  %v353_v52 = vld [vmem:[%s1846_s9 + $0x188] sm:$0xff] }
 0x14c   : > { %1556 = vmatmul.msk.f32.vlgmr.msra.gmra.mxu3 %vm375_vm1, %v353_v52 }
 0x14d   : > { %940 = vmatmul.f32.gmra.mxu1 %v797_v56  ;;  %v1070_v57 = vmax.f32 %v894_v55, 0.0  ;;  %1598 = vmatpush.msra.mxu3 %v1963_v9  ;;  %v349_v56 = vld [vmem:[%s1846_s9 + $0x168] sm:$0xff]  ;;  %v354_v9 = vld [vmem:[%s1846_s9 + $0x190] sm:$0xff] }
 0x14f   : > { %1181 = vmatmul.f32.gmra.mxu2 %v1070_v57  ;;  %1599 = vmatpush.msra.mxu3 %v1971_v13 }
 0x150   : > { %v655_v58 = vpop.f32.mrf.mxu0 }
 0x151   : > { %v656_v60 = vadd.f32 %v1931_v36, %v655_v58  ;;  %1600 = vmatpush.msra.mxu3 %v1978_v15 }
 0x152   : > { %v896_v61 = vpop.f32.mrf.mxu1 }
 0x153   : > { %v897_v62 = vadd.f32 %v2080_v54, %v896_v61  ;;  %1546 = vmatmul.msk.f32.gmra.mxu0 %vm375_vm1, %v343_v59  ;;  %v798_v63 = vmax.f32 %v656_v60, 0.0  ;;  %1601 = vmatpush.msra.mxu3 %v1984_v16 }
 0x154   : > { %1557 = vmatmul.msk.f32.gmra.mxu3 %vm375_vm1, %v354_v9 }
 0x155   : > { %943 = vmatmul.f32.gmra.mxu1 %v798_v63  ;;  %v1071_v0 = vmax.f32 %v897_v62, 0.0  ;;  %1602 = vmatpush.msra.mxu3 %v1990_v17  ;;  %v350_v62 = vld [vmem:[%s1846_s9 + $0x170] sm:$0xff] }
 0x157   : > { %1184 = vmatmul.f32.gmra.mxu2 %v1071_v0  ;;  %1603 = vmatpush.msra.mxu3 %v1998_v21 }
 0x158   : > { %v658_v1 = vpop.f32.mrf.mxu0 }
 0x159   : > { %v659_v3 = vadd.f32 %v1931_v36, %v658_v1  ;;  %1604 = vmatpush.msra.mxu3 %v2005_v23  ;;  %v355_v1 = vld [vmem:[%s1846_s9 + $0x198] sm:$0xff] }
 0x15a   : > { %v899_v4 = vpop.f32.mrf.mxu1 }
 0x15b   : > { %v799_v5 = vmax.f32 %v659_v3, 0.0  ;;  %v900_v6 = vadd.f32 %v2080_v54, %v899_v4  ;;  %1547 = vmatmul.msk.f32.gmra.mxu0 %vm375_vm1, %v344_v2  ;;  %1605 = vmatpush.msra.mxu3 %v2011_v24  ;;  %v351_v2 = vld [vmem:[%s1846_s9 + $0x178] sm:$0xff] }
 0x15c   : > { %1558 = vmatmul.msk.f32.gmra.mxu3 %vm375_vm1, %v355_v1  ;;  %v362_v1 = vld [vmem:[%s1846_s9 + $0x1d0] sm:$0xff] }
 0x15d   : > { %946 = vmatmul.f32.gmra.mxu1 %v799_v5  ;;  %v1072_v7 = vmax.f32 %v900_v6, 0.0  ;;  %1606 = vmatpush.msra.mxu3 %v2017_v25  ;;  %v356_v5 = vld [vmem:[%s1846_s9 + $0x1a0] sm:$0xff] }
 0x15f   : > { %1187 = vmatmul.f32.gmra.mxu2 %v1072_v7  ;;  %1607 = vmatpush.msra.mxu3 %v2025_v29 }
 0x160   : > { %v661_v8 = vpop.f32.mrf.mxu0 }
 0x161   : > { %v662_v11 = vadd.f32 %v1931_v36, %v661_v8  ;;  %1608 = vmatpush.msra.mxu3 %v2032_v31  ;;  %v352_v31 = vld [vmem:[%s1846_s9 + $0x180] sm:$0xff] }
 0x162   : > { %v902_v12 = vpop.f32.mrf.mxu1 }
 0x163   : > { %v800_v14 = vmax.f32 %v662_v11, 0.0  ;;  %v903_v18 = vadd.f32 %v2080_v54, %v902_v12  ;;  %1548 = vmatmul.msk.f32.gmra.mxu0 %vm375_vm1, %v345_v10  ;;  %1609 = vmatpush.msra.mxu3 %v2038_v32  ;;  %v357_v10 = vld [vmem:[%s1846_s9 + $0x1a8] sm:$0xff] }
 0x164   : > { %1559 = vmatmul.msk.f32.gmra.mxu3 %vm375_vm1, %v356_v5 }
 0x165   : > { %949 = vmatmul.f32.gmra.mxu1 %v800_v14  ;;  %v1073_v19 = vmax.f32 %v903_v18, 0.0  ;;  %1610 = vmatpush.msra.mxu3 %v2044_v33 }
 0x167   : > { %1190 = vmatmul.f32.gmra.mxu2 %v1073_v19  ;;  %1611 = vmatpush.msra.mxu3 %v2052_v38  ;;  %v2182_v38 = vld [vmem:[%s2485_s6] ss:$0 sm:$0xff] }
 0x168   : > { %v664_v20 = vpop.f32.mrf.mxu0 }
 0x169   : > { %v665_v26 = vadd.f32 %v1931_v36, %v664_v20  ;;  %1612 = vmatpush.msra.mxu3 %v2059_v40  ;;  %v358_v20 = vld [vmem:[%s1846_s9 + $0x1b0] sm:$0xff] }
 0x16a   : > { %v905_v27 = vpop.f32.mrf.mxu1 }
 0x16b   : > { %v801_v28 = vmax.f32 %v665_v26, 0.0  ;;  %v906_v30 = vadd.f32 %v2080_v54, %v905_v27  ;;  %1549 = vmatmul.msk.f32.gmra.mxu0 %vm375_vm1, %v346_v22  ;;  %1613 = vmatpush.msra.mxu3 %v2065_v41 }
 0x16c   : > { %1560 = vmatmul.msk.f32.gmra.mxu3 %vm375_vm1, %v357_v10 }
 0x16d   : > { %952 = vmatmul.f32.gmra.mxu1 %v801_v28  ;;  %v1074_v34 = vmax.f32 %v906_v30, 0.0 }
 0x16f   : > { %1193 = vmatmul.f32.gmra.mxu2 %v1074_v34 }
 0x170   : > { %v667_v35 = vpop.f32.mrf.mxu0 }
 0x171   : > { %v668_v39 = vadd.f32 %v1931_v36, %v667_v35 }
 0x172   : > { %v908_v42 = vpop.f32.mrf.mxu1 }
 0x173   : > { %v802_v43 = vmax.f32 %v668_v39, 0.0  ;;  %v909_v44 = vadd.f32 %v2080_v54, %v908_v42  ;;  %1550 = vmatmul.msk.f32.gmra.mxu0 %vm375_vm1, %v347_v37  ;;  %v359_v39 = vld [vmem:[%s1846_s9 + $0x1b8] sm:$0xff] }
 0x174   : > { %1561 = vmatmul.msk.f32.gmra.mxu3 %vm375_vm1, %v358_v20 }
 0x175   : > { %955 = vmatmul.f32.gmra.mxu1 %v802_v43  ;;  %v1075_v45 = vmax.f32 %v909_v44, 0.0 }
 0x177   : > { %1196 = vmatmul.f32.gmra.mxu2 %v1075_v45 }
 0x178   : > { %v670_v46 = vpop.f32.mrf.mxu0 }
 0x179   : > { %v671_v48 = vadd.f32 %v1931_v36, %v670_v46 }
 0x17a   : > { %v911_v49 = vpop.f32.mrf.mxu1 }
 0x17b   : > { %v803_v50 = vmax.f32 %v671_v48, 0.0  ;;  %v912_v51 = vadd.f32 %v2080_v54, %v911_v49  ;;  %1551 = vmatmul.msk.f32.gmra.mxu0 %vm375_vm1, %v348_v47 }
 0x17c   : > { %1562 = vmatmul.msk.f32.gmra.mxu3 %vm375_vm1, %v359_v39 }
 0x17d   : > { %958 = vmatmul.f32.gmra.mxu1 %v803_v50  ;;  %v1076_v53 = vmax.f32 %v912_v51, 0.0  ;;  %v360_v50 = vld [vmem:[%s1846_s9 + $0x1c0] sm:$0xff] }
 0x17f   : > { %1199 = vmatmul.f32.gmra.mxu2 %v1076_v53 }
 0x180   : > { %v673_v55 = vpop.f32.mrf.mxu0 }
 0x181   : > { %v674_v57 = vadd.f32 %v1931_v36, %v673_v55 }
 0x182   : > { %v914_v58 = vpop.f32.mrf.mxu1 }
 0x183   : > { %v804_v59 = vmax.f32 %v674_v57, 0.0  ;;  %v915_v60 = vadd.f32 %v2080_v54, %v914_v58  ;;  %1552 = vmatmul.msk.f32.gmra.mxu0 %vm375_vm1, %v349_v56 }
 0x184   : > { %1563 = vmatmul.msk.f32.gmra.mxu3 %vm375_vm1, %v360_v50 }
 0x185   : > { %961 = vmatmul.f32.gmra.mxu1 %v804_v59  ;;  %v1077_v61 = vmax.f32 %v915_v60, 0.0  ;;  %v361_v60 = vld [vmem:[%s1846_s9 + $0x1c8] sm:$0xff] }
 0x187   : > { %1202 = vmatmul.f32.gmra.mxu2 %v1077_v61 }
 0x188   : > { %v676_v13 = vpop.f32.mrf.mxu0 }
 0x189   : > { %v677_v15 = vadd.f32 %v1931_v36, %v676_v13 }
 0x18a   : > { %v917_v63 = vpop.f32.mrf.mxu1 }
 0x18b   : > { %v805_v16 = vmax.f32 %v677_v15, 0.0  ;;  %v918_v0 = vadd.f32 %v2080_v54, %v917_v63  ;;  %1553 = vmatmul.msk.f32.gmra.mxu0 %vm375_vm1, %v350_v62 }
 0x18c   : > { %1564 = vmatmul.msk.f32.gmra.mxu3 %vm375_vm1, %v361_v60 }
 0x18d   : > { %964 = vmatmul.f32.gmra.mxu1 %v805_v16  ;;  %v1078_v17 = vmax.f32 %v918_v0, 0.0 }
 0x18f   : > { %1205 = vmatmul.f32.gmra.mxu2 %v1078_v17 }
 0x190   : > { %v679_v21 = vpop.f32.mrf.mxu0 }
 0x191   : > { %v680_v23 = vadd.f32 %v1931_v36, %v679_v21 }
 0x192   : > { %v920_v3 = vpop.f32.mrf.mxu1 }
 0x193   : > { %v806_v4 = vmax.f32 %v680_v23, 0.0  ;;  %v921_v24 = vadd.f32 %v2080_v54, %v920_v3  ;;  %1554 = vmatmul.msk.f32.gmra.mxu0 %vm375_vm1, %v351_v2 }
 0x194   : > { %1565 = vmatmul.msk.f32.gmra.mxu3 %vm375_vm1, %v362_v1 }
 0x195   : > { %967 = vmatmul.f32.gmra.mxu1 %v806_v4  ;;  %v1079_v25 = vmax.f32 %v921_v24, 0.0 }
 0x197   : > { %1208 = vmatmul.f32.gmra.mxu2 %v1079_v25  ;;  %v363_v25 = vld [vmem:[%s1846_s9 + $0x1d8] sm:$0xff] }
 0x198   : > { %v682_v29 = vpop.f32.mrf.mxu0 }
 0x199   : > { %v683_v6 = vadd.f32 %v1931_v36, %v682_v29 }
 0x19a   : > { %v923_v7 = vpop.f32.mrf.mxu1 }
 0x19b   : > { %v807_v8 = vmax.f32 %v683_v6, 0.0  ;;  %v924_v32 = vadd.f32 %v2080_v54, %v923_v7  ;;  %1555 = vmatmul.msk.f32.gmra.mxu0 %vm375_vm1, %v352_v31 }
 0x19c   : > { %1566 = vmatmul.msk.f32.gmra.mxu3 %vm375_vm1, %v363_v25 }
 0x19d   : > { %970 = vmatmul.f32.gmra.mxu1 %v807_v8  ;;  %v1080_v33 = vmax.f32 %v924_v32, 0.0 }
 0x19f   : > { %1211 = vmatmul.f32.gmra.mxu2 %v1080_v33 }
 0x1a0   : > { %v685_v40 = vpop.f32.mrf.mxu0 }
 0x1a1   : > { %v686_v11 = vadd.f32 %v1931_v36, %v685_v40  ;;  %v364_v40 = vld [vmem:[%s1846_s9 + $0x1e0] sm:$0xff] }
 0x1a2   : > { %v926_v12 = vpop.f32.mrf.mxu1  ;;  %v1164_v14 = vpop.f32.mrf.mxu2 }
 0x1a3   : > { %v808_v18 = vmax.f32 %v686_v11, 0.0  ;;  %v927_v41 = vadd.f32 %v2080_v54, %v926_v12  ;;  %v1165_v19 = vadd.f32 %v2182_v38, %v1164_v14 }
 0x1a4   : > { %1567 = vmatmul.msk.f32.gmra.mxu3 %vm375_vm1, %v364_v40 }
 0x1a5   : > { %1353 = vst [vmem:[%s2188_s13] sm:$0xff] %v1165_v19  ;;  %973 = vmatmul.f32.gmra.mxu1 %v808_v18  ;;  %v1081_v22 = vmax.f32 %v927_v41, 0.0 }
 0x1a7   : > { %1214 = vmatmul.f32.gmra.mxu2 %v1081_v22 }
 0x1a8   : > { %v688_v26 = vpop.f32.mrf.mxu0 }
 0x1a9   : > { %v689_v27 = vadd.f32 %v1931_v36, %v688_v26  ;;  %v365_v26 = vld [vmem:[%s1846_s9 + $0x1e8] sm:$0xff] }
 0x1aa   : > { %v929_v28 = vpop.f32.mrf.mxu1  ;;  %v1167_v30 = vpop.f32.mrf.mxu2 }
 0x1ab   : > { %v809_v34 = vmax.f32 %v689_v27, 0.0  ;;  %v930_v35 = vadd.f32 %v2080_v54, %v929_v28  ;;  %v1168_v37 = vadd.f32 %v2182_v38, %v1167_v30 }
 0x1ac   : > { %1568 = vmatmul.msk.f32.gmra.mxu3 %vm375_vm1, %v365_v26 }
 0x1ad   : > { %1354 = vst [vmem:[%s2188_s13 + $0x8] sm:$0xff] %v1168_v37  ;;  %976 = vmatmul.f32.gmra.mxu1 %v809_v34  ;;  %v1082_v42 = vmax.f32 %v930_v35, 0.0 }
 0x1af   : > { %1217 = vmatmul.f32.gmra.mxu2 %v1082_v42 }
 0x1b0   : > { %v691_v43 = vpop.f32.mrf.mxu0 }
 0x1b1   : > { %v692_v44 = vadd.f32 %v1931_v36, %v691_v43  ;;  %v366_v43 = vld [vmem:[%s1846_s9 + $0x1f0] sm:$0xff] }
 0x1b2   : > { %v932_v45 = vpop.f32.mrf.mxu1  ;;  %v1170_v46 = vpop.f32.mrf.mxu2 }
 0x1b3   : > { %v810_v47 = vmax.f32 %v692_v44, 0.0  ;;  %v933_v48 = vadd.f32 %v2080_v54, %v932_v45  ;;  %v1171_v49 = vadd.f32 %v2182_v38, %v1170_v46 }
 0x1b4   : > { %1569 = vmatmul.msk.f32.gmra.mxu3 %vm375_vm1, %v366_v43 }
 0x1b5   : > { %1355 = vst [vmem:[%s2188_s13 + $0x10] sm:$0xff] %v1171_v49  ;;  %979 = vmatmul.f32.gmra.mxu1 %v810_v47  ;;  %v1083_v51 = vmax.f32 %v933_v48, 0.0 }
 0x1b7   : > { %1220 = vmatmul.f32.gmra.mxu2 %v1083_v51 }
 0x1b8   : > { %v694_v52 = vpop.f32.mrf.mxu0 }
 0x1b9   : > { %v695_v53 = vadd.f32 %v1931_v36, %v694_v52 }
 0x1ba   : > { %v935_v55 = vpop.f32.mrf.mxu1  ;;  %v1173_v56 = vpop.f32.mrf.mxu2 }
 0x1bb   : > { %v811_v57 = vmax.f32 %v695_v53, 0.0  ;;  %v936_v58 = vadd.f32 %v2080_v54, %v935_v55  ;;  %v1174_v59 = vadd.f32 %v2182_v38, %v1173_v56 }
 0x1bd   : > { %1356 = vst [vmem:[%s2188_s13 + $0x18] sm:$0xff] %v1174_v59  ;;  %982 = vmatmul.f32.gmra.mxu1 %v811_v57  ;;  %v1084_v9 = vmax.f32 %v936_v58, 0.0 }
 0x1bf   : > { %1223 = vmatmul.f32.gmra.mxu2 %v1084_v9 }
 0x1c0   : > { %v697_v61 = vpop.f32.mrf.mxu0 }
 0x1c1   : > { %v698_v13 = vadd.f32 %v1931_v36, %v697_v61 }
 0x1c2   : > { %v938_v62 = vpop.f32.mrf.mxu1  ;;  %v1176_v15 = vpop.f32.mrf.mxu2 }
 0x1c3   : > { %v812_v63 = vmax.f32 %v698_v13, 0.0  ;;  %v939_v16 = vadd.f32 %v2080_v54, %v938_v62  ;;  %v1177_v0 = vadd.f32 %v2182_v38, %v1176_v15 }
 0x1c5   : > { %1357 = vst [vmem:[%s2188_s13 + $0x20] sm:$0xff] %v1177_v0  ;;  %985 = vmatmul.f32.gmra.mxu1 %v812_v63  ;;  %v1085_v17 = vmax.f32 %v939_v16, 0.0 }
 0x1c7   : > { %1226 = vmatmul.f32.gmra.mxu2 %v1085_v17 }
 0x1c8   : > { %v700_v21 = vpop.f32.mrf.mxu0 }
 0x1c9   : > { %v701_v2 = vadd.f32 %v1931_v36, %v700_v21 }
 0x1ca   : > { %v941_v23 = vpop.f32.mrf.mxu1  ;;  %v1179_v3 = vpop.f32.mrf.mxu2 }
 0x1cb   : > { %v813_v4 = vmax.f32 %v701_v2, 0.0  ;;  %v942_v24 = vadd.f32 %v2080_v54, %v941_v23  ;;  %v1180_v5 = vadd.f32 %v2182_v38, %v1179_v3 }
 0x1cd   : > { %1358 = vst [vmem:[%s2188_s13 + $0x28] sm:$0xff] %v1180_v5  ;;  %988 = vmatmul.f32.gmra.mxu1 %v813_v4  ;;  %v1086_v29 = vmax.f32 %v942_v24, 0.0 }
 0x1cf   : > { %1229 = vmatmul.f32.gmra.mxu2 %v1086_v29  ;;  %v733_v17 = vpop.f32.mrf.mxu3 }
 0x1d0   : > { %v703_v31 = vpop.f32.mrf.mxu0 }
 0x1d1   : > { %v704_v6 = vadd.f32 %v1931_v36, %v703_v31 }
 0x1d2   : > { %v944_v7 = vpop.f32.mrf.mxu1  ;;  %v1182_v8 = vpop.f32.mrf.mxu2 }
 0x1d3   : > { %v814_v32 = vmax.f32 %v704_v6, 0.0  ;;  %v945_v10 = vadd.f32 %v2080_v54, %v944_v7  ;;  %v1183_v33 = vadd.f32 %v2182_v38, %v1182_v8 }
 0x1d5   : > { %v1087_v11 = vmax.f32 %v945_v10, 0.0  ;;  %1359 = vst [vmem:[%s2188_s13 + $0x30] sm:$0xff] %v1183_v33  ;;  %991 = vmatmul.f32.gmra.mxu1 %v814_v32 }
 0x1d7   : > { %1232 = vmatmul.f32.gmra.mxu2 %v1087_v11  ;;  %v736_v6 = vpop.f32.mrf.mxu3 }
 0x1d8   : > { %v706_v12 = vpop.f32.mrf.mxu0 }
 0x1d9   : > { %v707_v14 = vadd.f32 %v1931_v36, %v706_v12 }
 0x1da   : > { %v947_v18 = vpop.f32.mrf.mxu1  ;;  %v1185_v41 = vpop.f32.mrf.mxu2 }
 0x1db   : > { %v815_v19 = vmax.f32 %v707_v14, 0.0  ;;  %v948_v20 = vadd.f32 %v2080_v54, %v947_v18  ;;  %v1186_v22 = vadd.f32 %v2182_v38, %v1185_v41 }
 0x1dd   : > { %v1088_v27 = vmax.f32 %v948_v20, 0.0  ;;  %1360 = vst [vmem:[%s2188_s13 + $0x38] sm:$0xff] %v1186_v22  ;;  %994 = vmatmul.f32.gmra.mxu1 %v815_v19 }
 0x1df   : > { %1235 = vmatmul.f32.gmra.mxu2 %v1088_v27  ;;  %v739_v22 = vpop.f32.mrf.mxu3 }
 0x1e0   : > { %v709_v28 = vpop.f32.mrf.mxu0 }
 0x1e1   : > { %v710_v30 = vadd.f32 %v1931_v36, %v709_v28  ;;  %v2267_v28 = vld [vmem:[%s2481_s2] ss:$0 sm:$0xff] }
 0x1e2   : > { %v950_v34 = vpop.f32.mrf.mxu1  ;;  %v1188_v35 = vpop.f32.mrf.mxu2  ;;  %v734_v43 = vadd.f32 %v2267_v28, %v733_v17 }
 0x1e3   : > { %v816_v37 = vmax.f32 %v710_v30, 0.0  ;;  %v951_v39 = vadd.f32 %v2080_v54, %v950_v34  ;;  %v1189_v42 = vadd.f32 %v2182_v38, %v1188_v35 }
 0x1e5   : > { %v1089_v44 = vmax.f32 %v951_v39, 0.0  ;;  %1361 = vst [vmem:[%s2188_s13 + $0x40] sm:$0xff] %v1189_v42  ;;  %997 = vmatmul.f32.gmra.mxu1 %v816_v37 }
 0x1e7   : > { %1238 = vmatmul.f32.gmra.mxu2 %v1089_v44  ;;  %v742_v44 = vpop.f32.mrf.mxu3 }
 0x1e8   : > { %v712_v45 = vpop.f32.mrf.mxu0 }
 0x1e9   : > { %v713_v46 = vadd.f32 %v1931_v36, %v712_v45  ;;  %v824_v45 = vmax.f32 %v734_v43, 0.0 }
 0x1ea   : > { %v953_v47 = vpop.f32.mrf.mxu1  ;;  %v1191_v48 = vpop.f32.mrf.mxu2 }
 0x1eb   : > { %v817_v49 = vmax.f32 %v713_v46, 0.0  ;;  %v954_v50 = vadd.f32 %v2080_v54, %v953_v47  ;;  %v1192_v51 = vadd.f32 %v2182_v38, %v1191_v48 }
 0x1ed   : > { %v1090_v52 = vmax.f32 %v954_v50, 0.0  ;;  %1362 = vst [vmem:[%s2188_s13 + $0x48] sm:$0xff] %v1192_v51  ;;  %1000 = vmatmul.f32.gmra.mxu1 %v817_v49  ;;  %v737_v51 = vadd.f32 %v2267_v28, %v736_v6 }
 0x1ef   : > { %1241 = vmatmul.f32.gmra.mxu2 %v1090_v52  ;;  %v745_v52 = vpop.f32.mrf.mxu3 }
 0x1f0   : > { %v715_v53 = vpop.f32.mrf.mxu0 }
 0x1f1   : > { %v716_v55 = vadd.f32 %v1931_v36, %v715_v53  ;;  %v825_v53 = vmax.f32 %v737_v51, 0.0 }
 0x1f2   : > { %v956_v56 = vpop.f32.mrf.mxu1  ;;  %v1194_v57 = vpop.f32.mrf.mxu2 }
 0x1f3   : > { %v818_v58 = vmax.f32 %v716_v55, 0.0  ;;  %v957_v59 = vadd.f32 %v2080_v54, %v956_v56  ;;  %v1195_v60 = vadd.f32 %v2182_v38, %v1194_v57 }
 0x1f5   : > { %v1091_v9 = vmax.f32 %v957_v59, 0.0  ;;  %1363 = vst [vmem:[%s2188_s13 + $0x50] sm:$0xff] %v1195_v60  ;;  %1003 = vmatmul.f32.gmra.mxu1 %v818_v58  ;;  %v740_v60 = vadd.f32 %v2267_v28, %v739_v22 }
 0x1f7   : > { %1244 = vmatmul.f32.gmra.mxu2 %v1091_v9  ;;  %v826_v9 = vmax.f32 %v740_v60, 0.0 }
 0x1f8   : > { %v718_v61 = vpop.f32.mrf.mxu0 }
 0x1f9   : > { %v719_v13 = vadd.f32 %v1931_v36, %v718_v61  ;;  %v748_v61 = vpop.f32.mrf.mxu3 }
 0x1fa   : > { %v959_v62 = vpop.f32.mrf.mxu1  ;;  %v1197_v15 = vpop.f32.mrf.mxu2 }
 0x1fb   : > { %v819_v63 = vmax.f32 %v719_v13, 0.0  ;;  %v960_v16 = vadd.f32 %v2080_v54, %v959_v62  ;;  %v1198_v0 = vadd.f32 %v2182_v38, %v1197_v15 }
 0x1fd   : > { %v1092_v1 = vmax.f32 %v960_v16, 0.0  ;;  %1364 = vst [vmem:[%s2188_s13 + $0x58] sm:$0xff] %v1198_v0  ;;  %1006 = vmatmul.f32.gmra.mxu1 %v819_v63  ;;  %v743_v0 = vadd.f32 %v2267_v28, %v742_v44 }
 0x1ff   : > { %1247 = vmatmul.f32.gmra.mxu2 %v1092_v1  ;;  %v827_v1 = vmax.f32 %v743_v0, 0.0 }
 0x200   : > { %v721_v21 = vpop.f32.mrf.mxu0 }
 0x201   : > { %v722_v2 = vadd.f32 %v1931_v36, %v721_v21 }
 0x202   : > { %v962_v23 = vpop.f32.mrf.mxu1  ;;  %v1200_v3 = vpop.f32.mrf.mxu2 }
 0x203   : > { %v820_v4 = vmax.f32 %v722_v2, 0.0  ;;  %v963_v24 = vadd.f32 %v2080_v54, %v962_v23  ;;  %v1201_v5 = vadd.f32 %v2182_v38, %v1200_v3  ;;  %v751_v3 = vpop.f32.mrf.mxu3 }
 0x205   : > { %v1093_v25 = vmax.f32 %v963_v24, 0.0  ;;  %1365 = vst [vmem:[%s2188_s13 + $0x60] sm:$0xff] %v1201_v5  ;;  %1009 = vmatmul.f32.gmra.mxu1 %v820_v4  ;;  %v746_v24 = vadd.f32 %v2267_v28, %v745_v52 }
 0x207   : > { %1250 = vmatmul.f32.gmra.mxu2 %v1093_v25  ;;  %v828_v5 = vmax.f32 %v746_v24, 0.0 }
 0x208   : > { %v724_v29 = vpop.f32.mrf.mxu0 }
 0x209   : > { %v725_v31 = vadd.f32 %v1931_v36, %v724_v29 }
 0x20a   : > { %v965_v7 = vpop.f32.mrf.mxu1  ;;  %v1203_v8 = vpop.f32.mrf.mxu2 }
 0x20b   : > { %v821_v32 = vmax.f32 %v725_v31, 0.0  ;;  %v966_v10 = vadd.f32 %v2080_v54, %v965_v7  ;;  %v1204_v33 = vadd.f32 %v2182_v38, %v1203_v8  ;;  %v749_v8 = vadd.f32 %v2267_v28, %v748_v61 }
 0x20d   : > { %v1094_v40 = vmax.f32 %v966_v10, 0.0  ;;  %1366 = vst [vmem:[%s2188_s13 + $0x68] sm:$0xff] %v1204_v33  ;;  %1012 = vmatmul.f32.gmra.mxu1 %v821_v32  ;;  %v754_v32 = vpop.f32.mrf.mxu3  ;;  %v829_v10 = vmax.f32 %v749_v8, 0.0 }
 0x20f   : > { %1253 = vmatmul.f32.gmra.mxu2 %v1094_v40 }
 0x210   : > { %v727_v11 = vpop.f32.mrf.mxu0 }
 0x211   : > { %v728_v12 = vadd.f32 %v1931_v36, %v727_v11 }
 0x212   : > { %v968_v14 = vpop.f32.mrf.mxu1  ;;  %v1206_v18 = vpop.f32.mrf.mxu2 }
 0x213   : > { %v822_v41 = vmax.f32 %v728_v12, 0.0  ;;  %v969_v19 = vadd.f32 %v2080_v54, %v968_v14  ;;  %v1207_v20 = vadd.f32 %v2182_v38, %v1206_v18  ;;  %v752_v18 = vadd.f32 %v2267_v28, %v751_v3  ;;  %v2321_v3 = vld [vmem:[%s2483_s4] ss:$0 sm:$0xff] }
 0x215   : > { %v1095_v26 = vmax.f32 %v969_v19, 0.0  ;;  %1367 = vst [vmem:[%s2188_s13 + $0x70] sm:$0xff] %v1207_v20  ;;  %1015 = vmatmul.f32.vlgmr.msrb.gmra.mxu3 %v822_v41  ;;  %v757_v41 = vpop.f32.mrf.mxu3  ;;  %v830_v19 = vmax.f32 %v752_v18, 0.0 }
 0x217   : > { %1256 = vmatmul.f32.gmra.mxu2 %v1095_v26 }
 0x218   : > { %v730_v27 = vpop.f32.mrf.mxu0 }
 0x219   : > { %v731_v36 = vadd.f32 %v2267_v28, %v730_v27 }
 0x21a   : > { %v971_v30 = vpop.f32.mrf.mxu1  ;;  %v1209_v34 = vpop.f32.mrf.mxu2 }
 0x21b   : > { %v823_v35 = vmax.f32 %v731_v36, 0.0  ;;  %v972_v37 = vadd.f32 %v2080_v54, %v971_v30  ;;  %v1210_v39 = vadd.f32 %v2182_v38, %v1209_v34  ;;  %v755_v30 = vadd.f32 %v2267_v28, %v754_v32 }
 0x21d   : > { %v1096_v42 = vmax.f32 %v972_v37, 0.0  ;;  %1368 = vst [vmem:[%s2188_s13 + $0x78] sm:$0xff] %v1210_v39  ;;  %1018 = vmatmul.f32.gmra.mxu3 %v823_v35  ;;  %v831_v34 = vmax.f32 %v755_v30, 0.0  ;;  %v760_v35 = vpop.f32.mrf.mxu3 }
 0x21f   : > { %1259 = vmatmul.f32.gmra.mxu2 %v1096_v42 }
 0x222   : > { %v974_v46 = vpop.f32.mrf.mxu1  ;;  %v1212_v47 = vpop.f32.mrf.mxu2 }
 0x223   : > { %v975_v48 = vadd.f32 %v2080_v54, %v974_v46  ;;  %v1213_v49 = vadd.f32 %v2182_v38, %v1212_v47 }
 0x225   : > { %v1097_v50 = vmax.f32 %v975_v48, 0.0  ;;  %1369 = vst [vmem:[%s2188_s13 + $0x80] sm:$0xff] %v1213_v49  ;;  %1021 = vmatmul.f32.gmra.mxu3 %v824_v45  ;;  %v758_v45 = vadd.f32 %v2267_v28, %v757_v41  ;;  %v763_v51 = vpop.f32.mrf.mxu3 }
 0x227   : > { %1262 = vmatmul.f32.gmra.mxu2 %v1097_v50  ;;  %v832_v46 = vmax.f32 %v758_v45, 0.0 }
 0x22a   : > { %v977_v55 = vpop.f32.mrf.mxu1  ;;  %v1215_v56 = vpop.f32.mrf.mxu2 }
 0x22b   : > { %v978_v57 = vadd.f32 %v2080_v54, %v977_v55  ;;  %v1216_v58 = vadd.f32 %v2182_v38, %v1215_v56 }
 0x22d   : > { %v1098_v59 = vmax.f32 %v978_v57, 0.0  ;;  %1370 = vst [vmem:[%s2188_s13 + $0x88] sm:$0xff] %v1216_v58  ;;  %1024 = vmatmul.f32.gmra.mxu3 %v825_v53  ;;  %v761_v53 = vadd.f32 %v2267_v28, %v760_v35  ;;  %v766_v61 = vpop.f32.mrf.mxu3 }
 0x22f   : > { %1265 = vmatmul.f32.gmra.mxu2 %v1098_v59  ;;  %v833_v55 = vmax.f32 %v761_v53, 0.0 }
 0x232   : > { %v980_v13 = vpop.f32.mrf.mxu1  ;;  %v1218_v62 = vpop.f32.mrf.mxu2 }
 0x233   : > { %v981_v15 = vadd.f32 %v2080_v54, %v980_v13  ;;  %v1219_v63 = vadd.f32 %v2182_v38, %v1218_v62 }
 0x235   : > { %v1099_v16 = vmax.f32 %v981_v15, 0.0  ;;  %1371 = vst [vmem:[%s2188_s13 + $0x90] sm:$0xff] %v1219_v63  ;;  %1027 = vmatmul.f32.gmra.mxu3 %v826_v9  ;;  %v764_v9 = vadd.f32 %v2267_v28, %v763_v51 }
 0x237   : > { %1268 = vmatmul.f32.gmra.mxu2 %v1099_v16  ;;  %v834_v13 = vmax.f32 %v764_v9, 0.0 }
 0x23a   : > { %v983_v17 = vpop.f32.mrf.mxu1  ;;  %v1221_v21 = vpop.f32.mrf.mxu2 }
 0x23b   : > { %v984_v2 = vadd.f32 %v2080_v54, %v983_v17  ;;  %v1222_v23 = vadd.f32 %v2182_v38, %v1221_v21  ;;  %v769_v17 = vpop.f32.mrf.mxu3 }
 0x23d   : > { %v1100_v4 = vmax.f32 %v984_v2, 0.0  ;;  %1372 = vst [vmem:[%s2188_s13 + $0x98] sm:$0xff] %v1222_v23  ;;  %1030 = vmatmul.f32.gmra.mxu3 %v827_v1  ;;  %v767_v1 = vadd.f32 %v2267_v28, %v766_v61 }
 0x23f   : > { %1271 = vmatmul.f32.gmra.mxu2 %v1100_v4  ;;  %v835_v21 = vmax.f32 %v767_v1, 0.0 }
 0x242   : > { %v986_v25 = vpop.f32.mrf.mxu1  ;;  %v1224_v29 = vpop.f32.mrf.mxu2 }
 0x243   : > { %v987_v31 = vadd.f32 %v2080_v54, %v986_v25  ;;  %v1225_v6 = vadd.f32 %v2182_v38, %v1224_v29  ;;  %v772_v29 = vpop.f32.mrf.mxu3 }
 0x245   : > { %v1101_v7 = vmax.f32 %v987_v31, 0.0  ;;  %1373 = vst [vmem:[%s2188_s13 + $0xa0] sm:$0xff] %v1225_v6  ;;  %1033 = vmatmul.f32.gmra.mxu3 %v828_v5  ;;  %v770_v5 = vadd.f32 %v2267_v28, %v769_v17 }
 0x247   : > { %1274 = vmatmul.f32.gmra.mxu2 %v1101_v7  ;;  %v836_v25 = vmax.f32 %v770_v5, 0.0 }
 0x24a   : > { %v989_v33 = vpop.f32.mrf.mxu1  ;;  %v1227_v40 = vpop.f32.mrf.mxu2 }
 0x24b   : > { %v990_v11 = vadd.f32 %v2080_v54, %v989_v33  ;;  %v1228_v12 = vadd.f32 %v2182_v38, %v1227_v40 }
 0x24d   : > { %v1102_v14 = vmax.f32 %v990_v11, 0.0  ;;  %1374 = vst [vmem:[%s2188_s13 + $0xa8] sm:$0xff] %v1228_v12  ;;  %1036 = vmatmul.f32.gmra.mxu3 %v829_v10  ;;  %v773_v10 = vadd.f32 %v2267_v28, %v772_v29 }
 0x24f   : > { %1277 = vmatmul.f32.gmra.mxu2 %v1102_v14  ;;  %v837_v33 = vmax.f32 %v773_v10, 0.0 }
 0x252   : > { %v992_v20 = vpop.f32.mrf.mxu1  ;;  %v1230_v22 = vpop.f32.mrf.mxu2 }
 0x253   : > { %v993_v26 = vadd.f32 %v2080_v54, %v992_v20  ;;  %v1231_v27 = vadd.f32 %v2182_v38, %v1230_v22 }
 0x255   : > { %v1103_v36 = vmax.f32 %v993_v26, 0.0  ;;  %1375 = vst [vmem:[%s2188_s13 + $0xb0] sm:$0xff] %v1231_v27  ;;  %1039 = vmatmul.f32.gmra.mxu3 %v830_v19 }
 0x257   : > { %1280 = vmatmul.f32.gmra.mxu2 %v1103_v36 }
 0x25a   : > { %v995_v37 = vpop.f32.mrf.mxu1  ;;  %v1233_v39 = vpop.f32.mrf.mxu2 }
 0x25b   : > { %v996_v42 = vadd.f32 %v2080_v54, %v995_v37  ;;  %v1234_v43 = vadd.f32 %v2182_v38, %v1233_v39 }
 0x25d   : > { %v1104_v44 = vmax.f32 %v996_v42, 0.0  ;;  %1376 = vst [vmem:[%s2188_s13 + $0xb8] sm:$0xff] %v1234_v43  ;;  %1042 = vmatmul.f32.gmra.mxu3 %v831_v34 }
 0x25f   : > { %1283 = vmatmul.f32.gmra.mxu2 %v1104_v44 }
 0x262   : > { %v998_v47 = vpop.f32.mrf.mxu1  ;;  %v1236_v48 = vpop.f32.mrf.mxu2 }
 0x263   : > { %v999_v49 = vadd.f32 %v2080_v54, %v998_v47  ;;  %v1237_v50 = vadd.f32 %v2182_v38, %v1236_v48 }
 0x265   : > { %v1105_v52 = vmax.f32 %v999_v49, 0.0  ;;  %1377 = vst [vmem:[%s2188_s13 + $0xc0] sm:$0xff] %v1237_v50  ;;  %1045 = vmatmul.f32.gmra.mxu3 %v832_v46 }
 0x267   : > { %1286 = vmatmul.f32.gmra.mxu2 %v1105_v52 }
 0x26a   : > { %v1001_v56 = vpop.f32.mrf.mxu1  ;;  %v1239_v57 = vpop.f32.mrf.mxu2 }
 0x26b   : > { %v1002_v58 = vadd.f32 %v2080_v54, %v1001_v56  ;;  %v1240_v59 = vadd.f32 %v2182_v38, %v1239_v57 }
 0x26d   : > { %v1106_v60 = vmax.f32 %v1002_v58, 0.0  ;;  %1378 = vst [vmem:[%s2188_s13 + $0xc8] sm:$0xff] %v1240_v59  ;;  %1048 = vmatmul.f32.gmra.mxu3 %v833_v55 }
 0x26f   : > { %1289 = vmatmul.f32.gmra.mxu2 %v1106_v60 }
 0x272   : > { %v1004_v62 = vpop.f32.mrf.mxu1  ;;  %v1242_v15 = vpop.f32.mrf.mxu2 }
 0x273   : > { %v1005_v63 = vadd.f32 %v2080_v54, %v1004_v62  ;;  %v1243_v16 = vadd.f32 %v2182_v38, %v1242_v15 }
 0x275   : > { %v1107_v0 = vmax.f32 %v1005_v63, 0.0  ;;  %1379 = vst [vmem:[%s2188_s13 + $0xd0] sm:$0xff] %v1243_v16  ;;  %1051 = vmatmul.f32.gmra.mxu3 %v834_v13 }
 0x277   : > { %1292 = vmatmul.f32.gmra.mxu2 %v1107_v0 }
 0x27a   : > { %v1007_v2 = vpop.f32.mrf.mxu1  ;;  %v1245_v23 = vpop.f32.mrf.mxu2 }
 0x27b   : > { %v1008_v54 = vadd.f32 %v2321_v3, %v1007_v2  ;;  %v1246_v4 = vadd.f32 %v2182_v38, %v1245_v23 }
 0x27d   : > { %v1108_v24 = vmax.f32 %v1008_v54, 0.0  ;;  %1380 = vst [vmem:[%s2188_s13 + $0xd8] sm:$0xff] %v1246_v4  ;;  %1054 = vmatmul.f32.gmra.mxu3 %v835_v21 }
 0x27f   : > { %1295 = vmatmul.f32.gmra.mxu2 %v1108_v24 }
 0x282   : > { %v1010_v31 = vpop.f32.mrf.mxu1  ;;  %v1248_v6 = vpop.f32.mrf.mxu2 }
 0x283   : > { %v1011_v7 = vadd.f32 %v2321_v3, %v1010_v31  ;;  %v1249_v8 = vadd.f32 %v2182_v38, %v1248_v6 }
 0x285   : > { %v1109_v32 = vmax.f32 %v1011_v7, 0.0  ;;  %1381 = vst [vmem:[%s2188_s13 + $0xe0] sm:$0xff] %v1249_v8  ;;  %1057 = vmatmul.f32.gmra.mxu3 %v836_v25 }
 0x287   : > { %1298 = vmatmul.f32.gmra.mxu2 %v1109_v32 }
 0x28a   : > { %v1013_v40 = vpop.f32.mrf.mxu1  ;;  %v1251_v11 = vpop.f32.mrf.mxu2 }
 0x28b   : > { %v1014_v12 = vadd.f32 %v2321_v3, %v1013_v40  ;;  %v1252_v14 = vadd.f32 %v2182_v38, %v1251_v11 }
 0x28d   : > { %v1110_v18 = vmax.f32 %v1014_v12, 0.0  ;;  %1382 = vst [vmem:[%s2188_s13 + $0xe8] sm:$0xff] %v1252_v14  ;;  %1060 = vmatmul.f32.gmra.mxu3 %v837_v33 }
 0x28f   : > { %1301 = vmatmul.f32.gmra.mxu2 %v1110_v18 }
 0x292   : > { %v1254_v41 = vpop.f32.mrf.mxu2 }
 0x293   : > { %v1255_v19 = vadd.f32 %v2182_v38, %v1254_v41 }
 0x295   : > { %1383 = vst [vmem:[%s2188_s13 + $0xf0] sm:$0xff] %v1255_v19 }
 0x298   : > { %v1016_v20 = vpop.f32.mrf.mxu3 }
 0x299   : > { %v1017_v28 = vadd.f32 %v2321_v3, %v1016_v20 }
 0x29a   : > { %v1257_v22 = vpop.f32.mrf.mxu2 }
 0x29b   : > { %v1111_v26 = vmax.f32 %v1017_v28, 0.0  ;;  %v1258_v27 = vadd.f32 %v2182_v38, %v1257_v22 }
 0x29d   : > { %1384 = vst [vmem:[%s2188_s13 + $0xf8] sm:$0xff] %v1258_v27  ;;  %1304 = vmatmul.f32.vlgmr.msra.gmra.mxu3 %v1111_v26 }
 0x2a0   : > { %v1019_v36 = vpop.f32.mrf.mxu3 }
 0x2a1   : > { %v1020_v30 = vadd.f32 %v2321_v3, %v1019_v36 }
 0x2a2   : > { %v1260_v34 = vpop.f32.mrf.mxu2 }
 0x2a3   : > { %v1112_v35 = vmax.f32 %v1020_v30, 0.0  ;;  %v1261_v37 = vadd.f32 %v2182_v38, %v1260_v34 }
 0x2a5   : > { %1385 = vst [vmem:[%s2188_s13 + $0x100] sm:$0xff] %v1261_v37  ;;  %1307 = vmatmul.f32.gmra.mxu3 %v1112_v35 }
 0x2a8   : > { %v1022_v39 = vpop.f32.mrf.mxu3 }
 0x2a9   : > { %v1023_v42 = vadd.f32 %v2321_v3, %v1022_v39 }
 0x2aa   : > { %v1263_v43 = vpop.f32.mrf.mxu2 }
 0x2ab   : > { %v1113_v44 = vmax.f32 %v1023_v42, 0.0  ;;  %v1264_v45 = vadd.f32 %v2182_v38, %v1263_v43 }
 0x2ad   : > { %1386 = vst [vmem:[%s2188_s13 + $0x108] sm:$0xff] %v1264_v45  ;;  %1310 = vmatmul.f32.gmra.mxu3 %v1113_v44 }
 0x2b0   : > { %v1025_v46 = vpop.f32.mrf.mxu3 }
 0x2b1   : > { %v1026_v47 = vadd.f32 %v2321_v3, %v1025_v46 }
 0x2b2   : > { %v1266_v48 = vpop.f32.mrf.mxu2 }
 0x2b3   : > { %v1114_v49 = vmax.f32 %v1026_v47, 0.0  ;;  %v1267_v50 = vadd.f32 %v2182_v38, %v1266_v48 }
 0x2b5   : > { %1387 = vst [vmem:[%s2188_s13 + $0x110] sm:$0xff] %v1267_v50  ;;  %1313 = vmatmul.f32.gmra.mxu3 %v1114_v49 }
 0x2b8   : > { %v1028_v51 = vpop.f32.mrf.mxu3 }
 0x2b9   : > { %v1029_v52 = vadd.f32 %v2321_v3, %v1028_v51 }
 0x2ba   : > { %v1269_v53 = vpop.f32.mrf.mxu2 }
 0x2bb   : > { %v1115_v55 = vmax.f32 %v1029_v52, 0.0  ;;  %v1270_v56 = vadd.f32 %v2182_v38, %v1269_v53 }
 0x2bd   : > { %1388 = vst [vmem:[%s2188_s13 + $0x118] sm:$0xff] %v1270_v56  ;;  %1316 = vmatmul.f32.gmra.mxu3 %v1115_v55 }
 0x2c0   : > { %v1031_v57 = vpop.f32.mrf.mxu3 }
 0x2c1   : > { %v1032_v58 = vadd.f32 %v2321_v3, %v1031_v57 }
 0x2c2   : > { %v1272_v59 = vpop.f32.mrf.mxu2 }
 0x2c3   : > { %v1116_v60 = vmax.f32 %v1032_v58, 0.0  ;;  %v1273_v9 = vadd.f32 %v2182_v38, %v1272_v59 }
 0x2c5   : > { %1389 = vst [vmem:[%s2188_s13 + $0x120] sm:$0xff] %v1273_v9  ;;  %1319 = vmatmul.f32.gmra.mxu3 %v1116_v60 }
 0x2c8   : > { %v1034_v61 = vpop.f32.mrf.mxu3 }
 0x2c9   : > { %v1035_v13 = vadd.f32 %v2321_v3, %v1034_v61 }
 0x2ca   : > { %v1275_v62 = vpop.f32.mrf.mxu2 }
 0x2cb   : > { %v1117_v15 = vmax.f32 %v1035_v13, 0.0  ;;  %v1276_v63 = vadd.f32 %v2182_v38, %v1275_v62 }
 0x2cd   : > { %1390 = vst [vmem:[%s2188_s13 + $0x128] sm:$0xff] %v1276_v63  ;;  %1322 = vmatmul.f32.gmra.mxu3 %v1117_v15 }
 0x2d0   : > { %v1037_v16 = vpop.f32.mrf.mxu3 }
 0x2d1   : > { %v1038_v0 = vadd.f32 %v2321_v3, %v1037_v16 }
 0x2d2   : > { %v1278_v1 = vpop.f32.mrf.mxu2 }
 0x2d3   : > { %v1118_v17 = vmax.f32 %v1038_v0, 0.0  ;;  %v1279_v21 = vadd.f32 %v2182_v38, %v1278_v1 }
 0x2d5   : > { %1391 = vst [vmem:[%s2188_s13 + $0x130] sm:$0xff] %v1279_v21  ;;  %1325 = vmatmul.f32.gmra.mxu3 %v1118_v17 }
 0x2d8   : > { %v1040_v2 = vpop.f32.mrf.mxu3 }
 0x2d9   : > { %v1041_v23 = vadd.f32 %v2321_v3, %v1040_v2 }
 0x2da   : > { %v1281_v54 = vpop.f32.mrf.mxu2 }
 0x2db   : > { %v1119_v4 = vmax.f32 %v1041_v23, 0.0  ;;  %v1282_v24 = vadd.f32 %v2182_v38, %v1281_v54 }
 0x2dd   : > { %1392 = vst [vmem:[%s2188_s13 + $0x138] sm:$0xff] %v1282_v24  ;;  %1328 = vmatmul.f32.gmra.mxu3 %v1119_v4 }
 0x2e0   : > { %v1043_v5 = vpop.f32.mrf.mxu3 }
 0x2e1   : > { %v1044_v25 = vadd.f32 %v2321_v3, %v1043_v5 }
 0x2e2   : > { %v1284_v29 = vpop.f32.mrf.mxu2 }
 0x2e3   : > { %v1120_v31 = vmax.f32 %v1044_v25, 0.0  ;;  %v1285_v6 = vadd.f32 %v2182_v38, %v1284_v29 }
 0x2e5   : > { %1393 = vst [vmem:[%s2188_s13 + $0x140] sm:$0xff] %v1285_v6  ;;  %1331 = vmatmul.f32.gmra.mxu3 %v1120_v31 }
 0x2e8   : > { %v1046_v7 = vpop.f32.mrf.mxu3 }
 0x2e9   : > { %v1047_v8 = vadd.f32 %v2321_v3, %v1046_v7 }
 0x2ea   : > { %v1287_v32 = vpop.f32.mrf.mxu2 }
 0x2eb   : > { %v1121_v10 = vmax.f32 %v1047_v8, 0.0  ;;  %v1288_v33 = vadd.f32 %v2182_v38, %v1287_v32 }
 0x2ed   : > { %1394 = vst [vmem:[%s2188_s13 + $0x148] sm:$0xff] %v1288_v33  ;;  %1334 = vmatmul.f32.gmra.mxu3 %v1121_v10 }
 0x2f0   : > { %v1049_v40 = vpop.f32.mrf.mxu3 }
 0x2f1   : > { %v1050_v11 = vadd.f32 %v2321_v3, %v1049_v40 }
 0x2f2   : > { %v1290_v12 = vpop.f32.mrf.mxu2 }
 0x2f3   : > { %v1122_v14 = vmax.f32 %v1050_v11, 0.0  ;;  %v1291_v18 = vadd.f32 %v2182_v38, %v1290_v12 }
 0x2f5   : > { %1395 = vst [vmem:[%s2188_s13 + $0x150] sm:$0xff] %v1291_v18  ;;  %1337 = vmatmul.f32.gmra.mxu3 %v1122_v14 }
 0x2f8   : > { %v1052_v41 = vpop.f32.mrf.mxu3 }
 0x2f9   : > { %v1053_v19 = vadd.f32 %v2321_v3, %v1052_v41 }
 0x2fa   : > { %v1293_v20 = vpop.f32.mrf.mxu2 }
 0x2fb   : > { %v1123_v28 = vmax.f32 %v1053_v19, 0.0  ;;  %v1294_v22 = vadd.f32 %v2182_v38, %v1293_v20 }
 0x2fd   : > { %1396 = vst [vmem:[%s2188_s13 + $0x158] sm:$0xff] %v1294_v22  ;;  %1340 = vmatmul.f32.gmra.mxu3 %v1123_v28 }
 0x300   : > { %v1055_v26 = vpop.f32.mrf.mxu3 }
 0x301   : > { %v1056_v27 = vadd.f32 %v2321_v3, %v1055_v26 }
 0x302   : > { %v1296_v36 = vpop.f32.mrf.mxu2 }
 0x303   : > { %v1124_v30 = vmax.f32 %v1056_v27, 0.0  ;;  %v1297_v34 = vadd.f32 %v2182_v38, %v1296_v36 }
 0x305   : > { %1397 = vst [vmem:[%s2188_s13 + $0x160] sm:$0xff] %v1297_v34  ;;  %1343 = vmatmul.f32.gmra.mxu3 %v1124_v30 }
 0x308   : > { %v1058_v35 = vpop.f32.mrf.mxu3 }
 0x309   : > { %v1059_v37 = vadd.f32 %v2321_v3, %v1058_v35 }
 0x30a   : > { %v1299_v39 = vpop.f32.mrf.mxu2 }
 0x30b   : > { %v1125_v42 = vmax.f32 %v1059_v37, 0.0  ;;  %v1300_v43 = vadd.f32 %v2182_v38, %v1299_v39 }
 0x30d   : > { %1398 = vst [vmem:[%s2188_s13 + $0x168] sm:$0xff] %v1300_v43  ;;  %1346 = vmatmul.f32.gmra.mxu3 %v1125_v42 }
 0x310   : > { %v1061_v44 = vpop.f32.mrf.mxu3 }
 0x311   : > { %v1062_v45 = vadd.f32 %v2321_v3, %v1061_v44 }
 0x312   : > { %v1302_v46 = vpop.f32.mrf.mxu2 }
 0x313   : > { %v1126_v47 = vmax.f32 %v1062_v45, 0.0  ;;  %v1303_v48 = vadd.f32 %v2182_v38, %v1302_v46 }
 0x315   : > { %1399 = vst [vmem:[%s2188_s13 + $0x170] sm:$0xff] %v1303_v48  ;;  %1349 = vmatmul.f32.gmra.mxu3 %v1126_v47 }
 0x320   : > { %v1305_v49 = vpop.f32.mrf.mxu3 }
 0x321   : > { %v1306_v50 = vadd.f32 %v2182_v38, %v1305_v49 }
 0x323   : > { %1400 = vst [vmem:[%s2188_s13 + $0x178] sm:$0xff] %v1306_v50 }
 0x328   : > { %v1308_v51 = vpop.f32.mrf.mxu3 }
 0x329   : > { %v1309_v52 = vadd.f32 %v2182_v38, %v1308_v51 }
 0x32b   : > { %1401 = vst [vmem:[%s2188_s13 + $0x180] sm:$0xff] %v1309_v52 }
 0x330   : > { %v1311_v53 = vpop.f32.mrf.mxu3 }
 0x331   : > { %v1312_v3 = vadd.f32 %v2182_v38, %v1311_v53 }
 0x333   : > { %1402 = vst [vmem:[%s2188_s13 + $0x188] sm:$0xff] %v1312_v3 }
 0x338   : > { %v1314_v55 = vpop.f32.mrf.mxu3 }
 0x339   : > { %v1315_v56 = vadd.f32 %v2182_v38, %v1314_v55 }
 0x33b   : > { %1403 = vst [vmem:[%s2188_s13 + $0x190] sm:$0xff] %v1315_v56 }
 0x340   : > { %v1317_v57 = vpop.f32.mrf.mxu3 }
 0x341   : > { %v1318_v58 = vadd.f32 %v2182_v38, %v1317_v57 }
 0x343   : > { %1404 = vst [vmem:[%s2188_s13 + $0x198] sm:$0xff] %v1318_v58 }
 0x348   : > { %v1320_v59 = vpop.f32.mrf.mxu3 }
 0x349   : > { %v1321_v60 = vadd.f32 %v2182_v38, %v1320_v59 }
 0x34b   : > { %1405 = vst [vmem:[%s2188_s13 + $0x1a0] sm:$0xff] %v1321_v60 }
 0x350   : > { %v1323_v9 = vpop.f32.mrf.mxu3 }
 0x351   : > { %v1324_v61 = vadd.f32 %v2182_v38, %v1323_v9 }
 0x353   : > { %1406 = vst [vmem:[%s2188_s13 + $0x1a8] sm:$0xff] %v1324_v61 }
 0x358   : > { %v1326_v13 = vpop.f32.mrf.mxu3 }
 0x359   : > { %v1327_v62 = vadd.f32 %v2182_v38, %v1326_v13 }
 0x35b   : > { %1407 = vst [vmem:[%s2188_s13 + $0x1b0] sm:$0xff] %v1327_v62 }
 0x360   : > { %v1329_v15 = vpop.f32.mrf.mxu3 }
 0x361   : > { %v1330_v63 = vadd.f32 %v2182_v38, %v1329_v15 }
 0x363   : > { %1408 = vst [vmem:[%s2188_s13 + $0x1b8] sm:$0xff] %v1330_v63 }
 0x368   : > { %v1332_v16 = vpop.f32.mrf.mxu3 }
 0x369   : > { %v1333_v0 = vadd.f32 %v2182_v38, %v1332_v16 }
 0x36b   : > { %1409 = vst [vmem:[%s2188_s13 + $0x1c0] sm:$0xff] %v1333_v0 }
 0x370   : > { %v1335_v1 = vpop.f32.mrf.mxu3 }
 0x371   : > { %v1336_v17 = vadd.f32 %v2182_v38, %v1335_v1 }
 0x373   : > { %1410 = vst [vmem:[%s2188_s13 + $0x1c8] sm:$0xff] %v1336_v17 }
 0x378   : > { %v1338_v21 = vpop.f32.mrf.mxu3 }
 0x379   : > { %v1339_v2 = vadd.f32 %v2182_v38, %v1338_v21 }
 0x37b   : > { %1411 = vst [vmem:[%s2188_s13 + $0x1d0] sm:$0xff] %v1339_v2 }
 0x380   : > { %v1341_v23 = vpop.f32.mrf.mxu3 }
 0x381   : > { %v1342_v54 = vadd.f32 %v2182_v38, %v1341_v23 }
 0x383   : > { %1412 = vst [vmem:[%s2188_s13 + $0x1d8] sm:$0xff] %v1342_v54 }
 0x388   : > { %v1344_v4 = vpop.f32.mrf.mxu3 }
 0x389   : > { %v1345_v24 = vadd.f32 %v2182_v38, %v1344_v4 }
 0x38b   : > { %1413 = vst [vmem:[%s2188_s13 + $0x1e0] sm:$0xff] %v1345_v24 }
 0x390   : > { %v1347_v5 = vpop.f32.mrf.mxu3 }
 0x391   : > { %v1348_v25 = vadd.f32 %v2182_v38, %v1347_v5 }
 0x393   : > { %1414 = vst [vmem:[%s2188_s13 + $0x1e8] sm:$0xff] %v1348_v25 }
 0x397   : > { %1423 = sbr.rel (!%p1816_p5) target bundleno = 956 (0x3bc), region = 52 }
 0x398   : > { %v1350_v29 = vpop.f32.mrf.mxu3 }
 0x399   : > { %v1351_v31 = vadd.f32 %v2182_v38, %v1350_v29 }
 0x39b   : > { %1415 = vst [vmem:[%s2188_s13 + $0x1f0] sm:$0xff] %v1351_v31 }
 0x39c   : > { %s2497_s19 = smov (!%p1426_p11, %s1425_s19), 63 }
 0x39d   : > { %s1570_s20 = sshll.u32 %s2497_s19, 3 }
 0x39e   : > { %s1429_s21 = ssub.s32 504, %s1570_s20 }
 0x39f   : > { %s1430_s23 = sshll.u32 %s1429_s21, 4 }
 0x3a0   : > { %1431 = vsyncadd %s2418_s18, %s1430_s23  ;;  %p2427_p12 = scmp.ne.s32.totalorder %s1570_s20, 0  ;;  %s1577_s11 = smul.u32 504, %s1799_s28 }
 0x3a1   : > { %s1436_s29 = sshll.u32 %s2188_s13, 4  ;;  %s2487_s17 = sshll.u32 %s2497_s19, 7  ;;  %s2437_s29 = int_to_ptr.vmem [resolvable:$true] %s1436_s29 }
 0x3a2   : > { %s1434_s14 = scalar_lea.hbm %s2486_s7, %s1577_s11  ;;  %s1660_s16 = sshra.s32 %s2437_s29, 4  ;;  %s1661_s16 = int_to_ptr.vmem [resolvable:$true] %s1660_s16 }
 0x3a3   : > { %s1438_s15 = sshll.u32 %s1434_s14, 4  ;;  %s1662_s20 = sshrl.u32 %s2487_s17, 4  ;;  %s2439_s15 = int_to_ptr.hbm [resolvable:$true] %s1438_s15 }
 0x3a4   : > { %s1667_s21 = scalar_lea.vmem %s1661_s16, %s1662_s20  ;;  %s1735_s28 = smov [#allocation2]  }
 0x3a5   : > { %p1668_p13 = scmp.ne.s32.totalorder %s1661_s16, %s1667_s21  ;;  %s1671_s13 = scalar_lea.vmem %s1735_s28, 1008 }
 0x3a6   : > { %p1673_p2 = scmp.lt.s32.totalorder %s1671_s13, %s1667_s21 }
 0x3a7   : > { %p1669_p0 = pnand %p1668_p13, %p2427_p12 }
 0x3a9   : > { %p1670_p1 = pneg %p1669_p0 }
 0x3ab   : > { %p1675_p3 = pnand %p1673_p2, %p1670_p1 }
 0x3ad   : > { %1678 = shalt.err (!%p1675_p3)
}
 0x3ae   : > { %s1679_s23 = sshra.s32 %s2439_s15, 4  ;;  %s1690_s14 = scalar_lea.hbm %s2486_s7, 1000  ;;  %s1680_s23 = int_to_ptr.hbm [resolvable:$true] %s1679_s23 }
 0x3af   : > { %s1686_s11 = scalar_lea.hbm %s1680_s23, %s1662_s20  ;;  %p1691_p8 = scmp.lt.s32.totalorder %s1680_s23, %s2486_s7 }
 0x3b0   : > { %p1687_p4 = scmp.ne.s32.totalorder %s1680_s23, %s1686_s11  ;;  %p1692_p9 = scmp.lt.s32.totalorder %s1690_s14, %s1686_s11 }
 0x3b2   : > { %p1688_p5 = pnand %p1687_p4, %p2427_p12  ;;  %p1693_p10 = por %p1692_p9, %p1691_p8 }
 0x3b4   : > { %p1689_p7 = pneg %p1688_p5 }
 0x3b6   : > { %p1694_p11 = pnand %p1693_p10, %p1689_p7 }
 0x3b8   : > { %1697 = shalt.err (!%p1694_p11)
}
 0x3b9   : > { %s1736_s21 = smov 128   ;;  %s1737_s20 = smov 8  }
 0x3ba   : > { %s2491_s28 = sshll.u32 %s2497_s19, 7 }
 0x3bb   : > { %1444 = dma.vmem_to_hbm [thread:$0]  (%p2427_p12), %s2437_s29, %s2491_s28, %s2439_s15, %s2418_s18, %s1736_s21, %s1736_s21, %s1737_s20  }
 0x3bc PF: > { %p1620_p13 = scmp.ge.s32.totalorder %s1733_s27, 2  ;;  %s1453_s17 = sand.u32 1, %s1721_s24  }
 0x3bd   : > { %s1454_s13 = scalar_lea.sflag [#allocation3], %s1453_s17 }
 0x3be   : > { %p1617_p0 = pnand %p1620_p13, %p1820_p6 }
 0x3c0   : > { %p1618_p1 = pneg %p1617_p0 }
 0x3c2   : > { %1716 = dma.done.wait (%p1618_p1), %s1454_s13, 8064  }
 0x3c3   : > { %1718 = vsyncadd (%p1618_p1), %s1454_s13, 4294959232  ;;  %p17_p2 = scmp.ge.s32.totalorder %s1803_s30, 4   ;;  %s2492_s24 = smov %s1725_s25 }
 0x3c4   : > { %s2493_s25 = smov %s1729_s26  ;;  %s2494_s26 = smov %s1814_s10 }
 0x3c5   : > { %s2495_s27 = smov %s1803_s30  ;;  %19 = sbr.rel (!%p17_p2) target bundleno = 3 (0x3), region = 83 }
 0x3ca   :  { %1460 = vsyncpa [#allocation3], 1 }
 0x3cb   :  { %1462 = vsyncpa [#allocation3 + $0x1], 1 }

// kernel: tpu_custom_call.1
= control target key start
LH: loop header
LB: loop body
LE: loop exit
PB: predicated region body
PF: predicated region fallthrough
CT: control target
= control target key end

     0   :  { %12 = vsyncpa [#allocation3], 0  ;;  %s2479_s0 = inlined_call_operand.vmem [shape: f32[1000,30], index: 0, kind: input, shape index: {}]   ;;  %s2480_s1 = inlined_call_operand.vmem [shape: f32[30,128], index: 1, kind: input, shape index: {}]   ;;  %s2481_s2 = inlined_call_operand.vmem [shape: f32[1,128], index: 2, kind: input, shape index: {}]   ;;  %s2482_s3 = inlined_call_operand.vmem [shape: f32[128,128], index: 3, kind: input, shape index: {}]   ;;  %s2483_s4 = inlined_call_operand.vmem [shape: f32[1,128], index: 4, kind: input, shape index: {}]   ;;  %s2484_s5 = inlined_call_operand.vmem [shape: f32[128,128], index: 5, kind: input, shape index: {}]   ;;  %s2485_s6 = inlined_call_operand.vmem [shape: f32[1,128], index: 6, kind: input, shape index: {}]   ;;  %s2486_s7 = inlined_call_operand.hbm [shape: f32[1000,128], index: 7, kind: output, shape index: {}]  }
   0x1   :  { %14 = vsyncpa [#allocation3 + $0x1], 0  ;;  %s1778_s24 = smov 0   ;;  %s1780_s25 = smov 0  }
   0x2   :  { %s1782_s26 = smov 0   ;;  %s1784_s27 = smov 0  }
   0x3 LB: > { %s1799_s28 = sadd.s32 4294967295, %s1733_s27   ;;  %s1501_s29 = sadd.s32 4294967294, %s1733_s27   ;;  %s1733_s27 = sphi %s1784_s27, %s2495_s27   ;;  %s1729_s26 = sphi %s1782_s26, %s2494_s26   ;;  %s1725_s25 = sphi %s1780_s25, %s2493_s25   ;;  %s1721_s24 = sphi %s1778_s24, %s2492_s24  }
   0x4   : > { %s1803_s30 = sadd.s32 1, %s1733_s27   ;;  %s179_s8 = sadd.s32 1, %s1729_s26 }
   0x5   : > { %s176_s9 = ssub.s32 %s1733_s27, %s1803_s30  ;;  %p189_p0 = scmp.ne.s32.totalorder %s1729_s26, %s1725_s25 }
   0x6   : > { %p177_p1 = scmp.eq.s32.totalorder %s176_s9, 0  ;;  %p190_p2 = scmp.eq.s32.totalorder %s1799_s28, 1 }
   0x7   : > { %p195_p3 = scmp.ne.s32.totalorder %s1725_s25, %s1721_s24  ;;  %p196_p4 = scmp.eq.s32.totalorder %s1501_s29, 1 }
   0x8   : > { %s1814_s10 = scalar_select %p177_p1, %s1729_s26, %s179_s8  }
   0x9   : > { %p1816_p5 = por %p190_p2, %p189_p0  ;;  %p1820_p6 = por %p196_p4, %p195_p3 }
   0xa   : > { %p1504_p7 = scmp.ge.s32.totalorder %s1733_s27, 1  ;;  %p249_p8 = scmp.lt.s32.totalorder %s1733_s27, 3 }
   0xc   : > { %p250_p9 = pnand %p1504_p7, %p249_p8 }
   0xd   : > { %s1833_s17 = smul.u32 (!%p250_p9), 63, %s1799_s28 }
   0xe   : > { %253 = sbr.rel (%p250_p9) target bundleno = 956 (0x3bc), region = 48 }
   0xf   : > { %p290_p10 = scmp.lt.s32.totalorder (!%p250_p9), %s1833_s17, 124 }
  0x13   : > { %v370_v0 = vld [vmem:[%s2480_s1 + $0x18] sm:$0x3f]  ;;  %vm565_vm0 = vcmask 1045504   ;;  %v369_v1 = vld [vmem:[%s2480_s1 + $0x10] sm:$0xff]  ;;  %v368_v2 = vld [vmem:[%s2480_s1 + $0x8] sm:$0xff]  ;;  %s291_s22 = scalar_select %p290_p10, %s1833_s17, 124 }
  0x14   : > { %1506 = vmatpush.msk.msra.mxu0 %vm565_vm0, %v370_v0  ;;  %1578 = vmatpush.msk.msra.mxu3 %vm565_vm0, %v370_v0  ;;  %v367_v3 = vld [vmem:[%s2480_s1] sm:$0xff]  ;;  %vm375_vm1 = vcmask 244736   ;;  %v853_v13 = vld [vmem:[%s2482_s3 + $0x78] sm:$0xff]  ;;  %v852_v14 = vld [vmem:[%s2482_s3 + $0x70] sm:$0xff]  ;;  %s1425_s19 = ssub.s32 (%p1816_p5), 125, %s1833_s17 }
  0x15   : > { %s1505_s23 = sshll.u32 %s291_s22, 3  ;;  %858 = vmatpush.msra.mxu1 %v853_v13  ;;  %v851_v15 = vld [vmem:[%s2482_s3 + $0x68] sm:$0xff]  ;;  %v850_v17 = vld [vmem:[%s2482_s3 + $0x60] sm:$0xff]  ;;  %v849_v18 = vld [vmem:[%s2482_s3 + $0x58] sm:$0xff]  ;;  %s282_s22 = sand.u32 1, %s1725_s25  }
  0x16   : > { %582 = vmatpush.msra.mxu0 %v369_v1  ;;  %1579 = vmatpush.msra.mxu3 %v369_v1  ;;  %s1846_s9 = scalar_lea.vmem %s2479_s0, %s1505_s23  ;;  %v848_v19 = vld [vmem:[%s2482_s3 + $0x50] sm:$0xff]  ;;  %v847_v20 = vld [vmem:[%s2482_s3 + $0x48] sm:$0xff]  ;;  %v846_v22 = vld [vmem:[%s2482_s3 + $0x40] sm:$0xff]  ;;  %s1614_s23 = smul.u32 504, %s282_s22 }
  0x17   : > { %v304_v4 = vld [vmem:[%s1846_s9] sm:$0xff]  ;;  %v305_v5 = vld [vmem:[%s1846_s9 + $0x8] sm:$0xff]  ;;  %v306_v6 = vld [vmem:[%s1846_s9 + $0x10] sm:$0xff]  ;;  %859 = vmatpush.msra.mxu1 %v852_v14  ;;  %s2418_s18 = scalar_lea.sflag [#allocation3], %s282_s22  ;;  %p1426_p11 = scmp.lt.s32.totalorder (%p1816_p5), %s1425_s19, 63 }
  0x18   : > { %583 = vmatpush.msra.mxu0 %v368_v2  ;;  %1580 = vmatpush.msra.mxu3 %v368_v2  ;;  %v307_v7 = vld [vmem:[%s1846_s9 + $0x18] sm:$0xff]  ;;  %v308_v8 = vld [vmem:[%s1846_s9 + $0x20] sm:$0xff]  ;;  %v309_v9 = vld [vmem:[%s1846_s9 + $0x28] sm:$0xff]  ;;  %s2188_s13 = scalar_lea.vmem [#allocation2], %s1614_s23 }
  0x19   : > { %v310_v10 = vld [vmem:[%s1846_s9 + $0x30] sm:$0xff]  ;;  %v311_v11 = vld [vmem:[%s1846_s9 + $0x38] sm:$0xff]  ;;  %v312_v12 = vld [vmem:[%s1846_s9 + $0x40] sm:$0xff]  ;;  %860 = vmatpush.msra.mxu1 %v851_v15 }
  0x1a   : > { %584 = vmatpush.msra.mxu0 %v367_v3  ;;  %1581 = vmatpush.msra.mxu3 %v367_v3  ;;  %v313_v16 = vld [vmem:[%s1846_s9 + $0x48] sm:$0xff]  ;;  %v314_v21 = vld [vmem:[%s1846_s9 + $0x50] sm:$0xff]  ;;  %v845_v23 = vld [vmem:[%s2482_s3 + $0x38] sm:$0xff] }
  0x1b   : > { %1507 = vmatmul.msk.f32.vlgmr.msra.gmra.mxu0 %vm375_vm1, %v304_v4  ;;  %861 = vmatpush.msra.mxu1 %v850_v17  ;;  %v844_v24 = vld [vmem:[%s2482_s3 + $0x30] sm:$0xff]  ;;  %v843_v25 = vld [vmem:[%s2482_s3 + $0x28] sm:$0xff]  ;;  %v315_v26 = vld [vmem:[%s1846_s9 + $0x58] sm:$0xff] }
  0x1c   : > { %1582 = vmatpush.msrb.mxu3 %v853_v13  ;;  %v842_v27 = vld [vmem:[%s2482_s3 + $0x20] sm:$0xff]  ;;  %v841_v28 = vld [vmem:[%s2482_s3 + $0x18] sm:$0xff]  ;;  %v840_v29 = vld [vmem:[%s2482_s3 + $0x10] sm:$0xff] }
  0x1d   : > { %862 = vmatpush.msra.mxu1 %v849_v18  ;;  %v316_v30 = vld [vmem:[%s1846_s9 + $0x60] sm:$0xff]  ;;  %v839_v31 = vld [vmem:[%s2482_s3 + $0x8] sm:$0xff]  ;;  %v318_v34 = vld [vmem:[%s1846_s9 + $0x70] sm:$0xff] }
  0x1e   : > { %1583 = vmatpush.msrb.mxu3 %v852_v14  ;;  %v838_v32 = vld [vmem:[%s2482_s3] sm:$0xff]  ;;  %v317_v33 = vld [vmem:[%s1846_s9 + $0x68] sm:$0xff]  ;;  %v319_v35 = vld [vmem:[%s1846_s9 + $0x78] sm:$0xff] }
  0x1f   : > { %863 = vmatpush.msra.mxu1 %v848_v19  ;;  %v1931_v36 = vld [vmem:[%s2481_s2] ss:$0 sm:$0xff]  ;;  %v321_v42 = vld [vmem:[%s1846_s9 + $0x88] sm:$0xff]  ;;  %v322_v46 = vld [vmem:[%s1846_s9 + $0x90] sm:$0xff] }
  0x20   : > { %1584 = vmatpush.msrb.mxu3 %v851_v15  ;;  %v320_v38 = vld [vmem:[%s1846_s9 + $0x80] sm:$0xff]  ;;  %v323_v50 = vld [vmem:[%s1846_s9 + $0x98] sm:$0xff]  ;;  %v325_v58 = vld [vmem:[%s1846_s9 + $0xa8] sm:$0xff] }
  0x21   : > { %864 = vmatpush.msra.mxu1 %v847_v20  ;;  %v324_v54 = vld [vmem:[%s1846_s9 + $0xa0] sm:$0xff]  ;;  %v326_v62 = vld [vmem:[%s1846_s9 + $0xb0] sm:$0xff]  ;;  %v327_v2 = vld [vmem:[%s1846_s9 + $0xb8] sm:$0xff] }
  0x22   : > { %1585 = vmatpush.msrb.mxu3 %v850_v17  ;;  %v1971_v13 = vld [vmem:[%s2484_s5 + $0x70] sm:$0xff]  ;;  %v1978_v15 = vld [vmem:[%s2484_s5 + $0x68] sm:$0xff]  ;;  %v1990_v17 = vld [vmem:[%s2484_s5 + $0x58] sm:$0xff] }
  0x23   : > { %1508 = vmatmul.msk.f32.gmra.mxu0 %vm375_vm1, %v305_v5  ;;  %865 = vmatpush.msra.mxu1 %v846_v22 }
  0x24   : > { %1586 = vmatpush.msrb.mxu3 %v849_v18 }
  0x25   : > { %866 = vmatpush.msra.mxu1 %v845_v23 }
  0x26   : > { %1587 = vmatpush.msrb.mxu3 %v848_v19  ;;  %v330_v19 = vld [vmem:[%s1846_s9 + $0xd0] sm:$0xff] }
  0x27   : > { %867 = vmatpush.msra.mxu1 %v844_v24 }
  0x28   : > { %1588 = vmatpush.msrb.mxu3 %v847_v20 }
  0x29   : > { %868 = vmatpush.msra.mxu1 %v843_v25 }
  0x2a   : > { %1589 = vmatpush.msrb.mxu3 %v846_v22 }
  0x2b   : > { %1509 = vmatmul.msk.f32.gmra.mxu0 %vm375_vm1, %v306_v6  ;;  %869 = vmatpush.msra.mxu1 %v842_v27  ;;  %v328_v6 = vld [vmem:[%s1846_s9 + $0xc0] sm:$0xff] }
  0x2c   : > { %1590 = vmatpush.msrb.mxu3 %v845_v23  ;;  %v2005_v23 = vld [vmem:[%s2484_s5 + $0x48] sm:$0xff] }
  0x2d   : > { %870 = vmatpush.msra.mxu1 %v841_v28 }
  0x2e   : > { %1591 = vmatpush.msrb.mxu3 %v844_v24  ;;  %v2011_v24 = vld [vmem:[%s2484_s5 + $0x40] sm:$0xff] }
  0x2f   : > { %871 = vmatpush.msra.mxu1 %v840_v29 }
  0x30   : > { %1592 = vmatpush.msrb.mxu3 %v843_v25  ;;  %v2017_v25 = vld [vmem:[%s2484_s5 + $0x38] sm:$0xff] }
  0x31   : > { %872 = vmatpush.msra.mxu1 %v839_v31 }
  0x32   : > { %1593 = vmatpush.msrb.mxu3 %v842_v27  ;;  %v331_v27 = vld [vmem:[%s1846_s9 + $0xd8] sm:$0xff] }
  0x33   : > { %1510 = vmatmul.msk.f32.gmra.mxu0 %vm375_vm1, %v307_v7  ;;  %873 = vmatpush.msra.mxu1 %v838_v32 }
  0x34   : > { %1594 = vmatpush.msrb.mxu3 %v841_v28 }
  0x36   : > { %1595 = vmatpush.msrb.mxu3 %v840_v29  ;;  %v2025_v29 = vld [vmem:[%s2484_s5 + $0x30] sm:$0xff] }
  0x38   : > { %1596 = vmatpush.msrb.mxu3 %v839_v31  ;;  %v2032_v31 = vld [vmem:[%s2484_s5 + $0x28] sm:$0xff] }
  0x3a   : > { %1597 = vmatpush.msrb.mxu3 %v838_v32  ;;  %v2038_v32 = vld [vmem:[%s2484_s5 + $0x20] sm:$0xff] }
  0x3b   : > { %1511 = vmatmul.msk.f32.gmra.mxu0 %vm375_vm1, %v308_v8 }
  0x43   : > { %1512 = vmatmul.msk.f32.gmra.mxu0 %vm375_vm1, %v309_v9  ;;  %v1963_v9 = vld [vmem:[%s2484_s5 + $0x78] sm:$0xff] }
  0x44   : > { %1147 = vmatpush.msra.mxu2 %v1963_v9 }
  0x46   : > { %1148 = vmatpush.msra.mxu2 %v1971_v13 }
  0x48   : > { %1149 = vmatpush.msra.mxu2 %v1978_v15 }
  0x4b   : > { %1513 = vmatmul.msk.f32.gmra.mxu0 %vm375_vm1, %v310_v10 }
  0x53   : > { %1514 = vmatmul.msk.f32.gmra.mxu0 %vm375_vm1, %v311_v11  ;;  %v329_v11 = vld [vmem:[%s1846_s9 + $0xc8] sm:$0xff] }
  0x5b   : > { %1515 = vmatmul.msk.f32.gmra.mxu0 %vm375_vm1, %v312_v12 }
  0x63   : > { %1516 = vmatmul.msk.f32.gmra.mxu0 %vm375_vm1, %v313_v16  ;;  %v1984_v16 = vld [vmem:[%s2484_s5 + $0x60] sm:$0xff] }
  0x64   : > { %1150 = vmatpush.msra.mxu2 %v1984_v16 }
  0x66   : > { %1151 = vmatpush.msra.mxu2 %v1990_v17 }
  0x6b   : > { %1517 = vmatmul.msk.f32.gmra.mxu0 %vm375_vm1, %v314_v21  ;;  %v1998_v21 = vld [vmem:[%s2484_s5 + $0x50] sm:$0xff] }
  0x6c   : > { %1152 = vmatpush.msra.mxu2 %v1998_v21 }
  0x6e   : > { %1153 = vmatpush.msra.mxu2 %v2005_v23 }
  0x70   : > { %1154 = vmatpush.msra.mxu2 %v2011_v24 }
  0x72   : > { %1155 = vmatpush.msra.mxu2 %v2017_v25 }
  0x73   : > { %1518 = vmatmul.msk.f32.gmra.mxu0 %vm375_vm1, %v315_v26 }
  0x74   : > { %1156 = vmatpush.msra.mxu2 %v2025_v29 }
  0x76   : > { %1157 = vmatpush.msra.mxu2 %v2032_v31 }
  0x78   : > { %1158 = vmatpush.msra.mxu2 %v2038_v32 }
  0x7b   : > { %1519 = vmatmul.msk.f32.gmra.mxu0 %vm375_vm1, %v316_v30 }
  0x83   : > { %1520 = vmatmul.msk.f32.gmra.mxu0 %vm375_vm1, %v317_v33  ;;  %v2044_v33 = vld [vmem:[%s2484_s5 + $0x18] sm:$0xff] }
  0x84   : > { %1159 = vmatpush.msra.mxu2 %v2044_v33 }
  0x8b   : > { %1521 = vmatmul.msk.f32.gmra.mxu0 %vm375_vm1, %v318_v34 }
  0x93   : > { %1522 = vmatmul.msk.f32.gmra.mxu0 %vm375_vm1, %v319_v35  ;;  %v332_v35 = vld [vmem:[%s1846_s9 + $0xe0] sm:$0xff] }
  0x98   : > { %v586_v37 = vpop.f32.mrf.mxu0 }
  0x99   : > { %v587_v39 = vadd.f32 %v1931_v36, %v586_v37 }
  0x9b   : > { %1523 = vmatmul.msk.f32.gmra.mxu0 %vm375_vm1, %v320_v38  ;;  %v775_v40 = vmax.f32 %v587_v39, 0.0  ;;  %v2052_v38 = vld [vmem:[%s2484_s5 + $0x10] sm:$0xff] }
  0x9c   : > { %1160 = vmatpush.msra.mxu2 %v2052_v38 }
  0x9d   : > { %874 = vmatmul.f32.vlgmr.msra.gmra.mxu1 %v775_v40  ;;  %v2059_v40 = vld [vmem:[%s2484_s5 + $0x8] sm:$0xff] }
  0x9e   : > { %1161 = vmatpush.msra.mxu2 %v2059_v40 }
  0xa0   : > { %v589_v41 = vpop.f32.mrf.mxu0 }
  0xa1   : > { %v590_v43 = vadd.f32 %v1931_v36, %v589_v41  ;;  %v2065_v41 = vld [vmem:[%s2484_s5] sm:$0xff] }
  0xa2   : > { %1162 = vmatpush.msra.mxu2 %v2065_v41 }
  0xa3   : > { %1524 = vmatmul.msk.f32.gmra.mxu0 %vm375_vm1, %v321_v42  ;;  %v776_v44 = vmax.f32 %v590_v43, 0.0  ;;  %v333_v43 = vld [vmem:[%s1846_s9 + $0xe8] sm:$0xff] }
  0xa5   : > { %877 = vmatmul.f32.gmra.mxu1 %v776_v44 }
  0xa8   : > { %v592_v45 = vpop.f32.mrf.mxu0 }
  0xa9   : > { %v593_v47 = vadd.f32 %v1931_v36, %v592_v45 }
  0xab   : > { %1525 = vmatmul.msk.f32.gmra.mxu0 %vm375_vm1, %v322_v46  ;;  %v777_v48 = vmax.f32 %v593_v47, 0.0  ;;  %v334_v47 = vld [vmem:[%s1846_s9 + $0xf0] sm:$0xff] }
  0xad   : > { %880 = vmatmul.f32.gmra.mxu1 %v777_v48 }
  0xb0   : > { %v595_v49 = vpop.f32.mrf.mxu0 }
  0xb1   : > { %v596_v51 = vadd.f32 %v1931_v36, %v595_v49 }
  0xb3   : > { %1526 = vmatmul.msk.f32.gmra.mxu0 %vm375_vm1, %v323_v50  ;;  %v778_v52 = vmax.f32 %v596_v51, 0.0  ;;  %v335_v51 = vld [vmem:[%s1846_s9 + $0xf8] sm:$0xff] }
  0xb5   : > { %883 = vmatmul.f32.gmra.mxu1 %v778_v52 }
  0xb8   : > { %v598_v53 = vpop.f32.mrf.mxu0 }
  0xb9   : > { %v599_v55 = vadd.f32 %v1931_v36, %v598_v53 }
  0xbb   : > { %1527 = vmatmul.msk.f32.gmra.mxu0 %vm375_vm1, %v324_v54  ;;  %v779_v56 = vmax.f32 %v599_v55, 0.0  ;;  %v2080_v54 = vld [vmem:[%s2483_s4] ss:$0 sm:$0xff] }
  0xbd   : > { %886 = vmatmul.f32.gmra.mxu1 %v779_v56  ;;  %v336_v56 = vld [vmem:[%s1846_s9 + $0x100] sm:$0xff] }
  0xc0   : > { %v601_v57 = vpop.f32.mrf.mxu0 }
  0xc1   : > { %v602_v59 = vadd.f32 %v1931_v36, %v601_v57 }
  0xc3   : > { %1528 = vmatmul.msk.f32.gmra.mxu0 %vm375_vm1, %v325_v58  ;;  %v780_v60 = vmax.f32 %v602_v59, 0.0 }
  0xc5   : > { %889 = vmatmul.f32.gmra.mxu1 %v780_v60 }
  0xc8   : > { %v604_v61 = vpop.f32.mrf.mxu0 }
  0xc9   : > { %v605_v63 = vadd.f32 %v1931_v36, %v604_v61 }
  0xcb   : > { %1529 = vmatmul.msk.f32.gmra.mxu0 %vm375_vm1, %v326_v62  ;;  %v781_v0 = vmax.f32 %v605_v63, 0.0  ;;  %v337_v63 = vld [vmem:[%s1846_s9 + $0x108] sm:$0xff] }
  0xcd   : > { %892 = vmatmul.f32.gmra.mxu1 %v781_v0 }
  0xd0   : > { %v607_v1 = vpop.f32.mrf.mxu0 }
  0xd1   : > { %v608_v3 = vadd.f32 %v1931_v36, %v607_v1 }
  0xd3   : > { %1530 = vmatmul.msk.f32.gmra.mxu0 %vm375_vm1, %v327_v2  ;;  %v782_v4 = vmax.f32 %v608_v3, 0.0 }
  0xd5   : > { %895 = vmatmul.f32.gmra.mxu1 %v782_v4 }
  0xd8   : > { %v610_v5 = vpop.f32.mrf.mxu0 }
  0xd9   : > { %v611_v7 = vadd.f32 %v1931_v36, %v610_v5 }
  0xdb   : > { %1531 = vmatmul.msk.f32.gmra.mxu0 %vm375_vm1, %v328_v6  ;;  %v783_v8 = vmax.f32 %v611_v7, 0.0  ;;  %v338_v6 = vld [vmem:[%s1846_s9 + $0x110] sm:$0xff] }
  0xdd   : > { %898 = vmatmul.f32.gmra.mxu1 %v783_v8 }
  0xe0   : > { %v613_v10 = vpop.f32.mrf.mxu0 }
  0xe1   : > { %v614_v12 = vadd.f32 %v1931_v36, %v613_v10 }
  0xe3   : > { %1532 = vmatmul.msk.f32.gmra.mxu0 %vm375_vm1, %v329_v11  ;;  %v784_v14 = vmax.f32 %v614_v12, 0.0 }
  0xe5   : > { %901 = vmatmul.f32.gmra.mxu1 %v784_v14 }
  0xe8   : > { %v616_v18 = vpop.f32.mrf.mxu0 }
  0xe9   : > { %v617_v20 = vadd.f32 %v1931_v36, %v616_v18  ;;  %v339_v18 = vld [vmem:[%s1846_s9 + $0x118] sm:$0xff] }
  0xeb   : > { %1533 = vmatmul.msk.f32.gmra.mxu0 %vm375_vm1, %v330_v19  ;;  %v785_v22 = vmax.f32 %v617_v20, 0.0 }
  0xed   : > { %904 = vmatmul.f32.gmra.mxu1 %v785_v22 }
  0xf0   : > { %v619_v26 = vpop.f32.mrf.mxu0 }
  0xf1   : > { %v620_v28 = vadd.f32 %v1931_v36, %v619_v26 }
  0xf3   : > { %1534 = vmatmul.msk.f32.gmra.mxu0 %vm375_vm1, %v331_v27  ;;  %v786_v30 = vmax.f32 %v620_v28, 0.0 }
  0xf5   : > { %907 = vmatmul.f32.gmra.mxu1 %v786_v30  ;;  %v340_v30 = vld [vmem:[%s1846_s9 + $0x120] sm:$0xff] }
  0xf8   : > { %v622_v34 = vpop.f32.mrf.mxu0 }
  0xf9   : > { %v623_v37 = vadd.f32 %v1931_v36, %v622_v34 }
  0xfb   : > { %1535 = vmatmul.msk.f32.gmra.mxu0 %vm375_vm1, %v332_v35  ;;  %v787_v39 = vmax.f32 %v623_v37, 0.0 }
  0xfd   : > { %910 = vmatmul.f32.gmra.mxu1 %v787_v39 }
 0x100   : > { %v625_v42 = vpop.f32.mrf.mxu0 }
 0x101   : > { %v626_v44 = vadd.f32 %v1931_v36, %v625_v42 }
 0x103   : > { %1536 = vmatmul.msk.f32.gmra.mxu0 %vm375_vm1, %v333_v43  ;;  %v788_v45 = vmax.f32 %v626_v44, 0.0  ;;  %v341_v44 = vld [vmem:[%s1846_s9 + $0x128] sm:$0xff] }
 0x105   : > { %913 = vmatmul.f32.gmra.mxu1 %v788_v45 }
 0x108   : > { %v628_v46 = vpop.f32.mrf.mxu0 }
 0x109   : > { %v629_v48 = vadd.f32 %v1931_v36, %v628_v46 }
 0x10b   : > { %1537 = vmatmul.msk.f32.gmra.mxu0 %vm375_vm1, %v334_v47  ;;  %v789_v49 = vmax.f32 %v629_v48, 0.0 }
 0x10d   : > { %916 = vmatmul.f32.gmra.mxu1 %v789_v49 }
 0x110   : > { %v631_v50 = vpop.f32.mrf.mxu0 }
 0x111   : > { %v632_v52 = vadd.f32 %v1931_v36, %v631_v50 }
 0x113   : > { %1538 = vmatmul.msk.f32.gmra.mxu0 %vm375_vm1, %v335_v51  ;;  %v790_v53 = vmax.f32 %v632_v52, 0.0  ;;  %v342_v51 = vld [vmem:[%s1846_s9 + $0x130] sm:$0xff] }
 0x115   : > { %919 = vmatmul.f32.gmra.mxu1 %v790_v53 }
 0x118   : > { %v634_v55 = vpop.f32.mrf.mxu0 }
 0x119   : > { %v635_v57 = vadd.f32 %v1931_v36, %v634_v55 }
 0x11a   : > { %v875_v58 = vpop.f32.mrf.mxu1 }
 0x11b   : > { %v876_v59 = vadd.f32 %v2080_v54, %v875_v58  ;;  %1539 = vmatmul.msk.f32.gmra.mxu0 %vm375_vm1, %v336_v56  ;;  %v791_v60 = vmax.f32 %v635_v57, 0.0 }
 0x11d   : > { %922 = vmatmul.f32.gmra.mxu1 %v791_v60  ;;  %v1064_v61 = vmax.f32 %v876_v59, 0.0  ;;  %v343_v59 = vld [vmem:[%s1846_s9 + $0x138] sm:$0xff] }
 0x11f   : > { %1163 = vmatmul.f32.vlgmr.msra.gmra.mxu2 %v1064_v61 }
 0x120   : > { %v637_v62 = vpop.f32.mrf.mxu0 }
 0x121   : > { %v638_v0 = vadd.f32 %v1931_v36, %v637_v62 }
 0x122   : > { %v878_v1 = vpop.f32.mrf.mxu1 }
 0x123   : > { %v879_v2 = vadd.f32 %v2080_v54, %v878_v1  ;;  %1540 = vmatmul.msk.f32.gmra.mxu0 %vm375_vm1, %v337_v63  ;;  %v792_v3 = vmax.f32 %v638_v0, 0.0 }
 0x125   : > { %925 = vmatmul.f32.gmra.mxu1 %v792_v3  ;;  %v1065_v4 = vmax.f32 %v879_v2, 0.0  ;;  %v344_v2 = vld [vmem:[%s1846_s9 + $0x140] sm:$0xff] }
 0x127   : > { %1166 = vmatmul.f32.gmra.mxu2 %v1065_v4 }
 0x128   : > { %v640_v5 = vpop.f32.mrf.mxu0 }
 0x129   : > { %v641_v7 = vadd.f32 %v1931_v36, %v640_v5 }
 0x12a   : > { %v881_v8 = vpop.f32.mrf.mxu1 }
 0x12b   : > { %v882_v10 = vadd.f32 %v2080_v54, %v881_v8  ;;  %1541 = vmatmul.msk.f32.gmra.mxu0 %vm375_vm1, %v338_v6  ;;  %v793_v11 = vmax.f32 %v641_v7, 0.0 }
 0x12d   : > { %928 = vmatmul.f32.gmra.mxu1 %v793_v11  ;;  %v1066_v12 = vmax.f32 %v882_v10, 0.0  ;;  %v345_v10 = vld [vmem:[%s1846_s9 + $0x148] sm:$0xff] }
 0x12f   : > { %1169 = vmatmul.f32.gmra.mxu2 %v1066_v12 }
 0x130   : > { %v643_v14 = vpop.f32.mrf.mxu0 }
 0x131   : > { %v644_v19 = vadd.f32 %v1931_v36, %v643_v14 }
 0x132   : > { %v884_v20 = vpop.f32.mrf.mxu1 }
 0x133   : > { %v885_v22 = vadd.f32 %v2080_v54, %v884_v20  ;;  %1542 = vmatmul.msk.f32.gmra.mxu0 %vm375_vm1, %v339_v18  ;;  %v794_v26 = vmax.f32 %v644_v19, 0.0 }
 0x135   : > { %931 = vmatmul.f32.gmra.mxu1 %v794_v26  ;;  %v1067_v27 = vmax.f32 %v885_v22, 0.0  ;;  %v346_v22 = vld [vmem:[%s1846_s9 + $0x150] sm:$0xff] }
 0x137   : > { %1172 = vmatmul.f32.gmra.mxu2 %v1067_v27 }
 0x138   : > { %v646_v28 = vpop.f32.mrf.mxu0 }
 0x139   : > { %v647_v34 = vadd.f32 %v1931_v36, %v646_v28 }
 0x13a   : > { %v887_v35 = vpop.f32.mrf.mxu1 }
 0x13b   : > { %v888_v37 = vadd.f32 %v2080_v54, %v887_v35  ;;  %1543 = vmatmul.msk.f32.gmra.mxu0 %vm375_vm1, %v340_v30  ;;  %v795_v39 = vmax.f32 %v647_v34, 0.0 }
 0x13d   : > { %934 = vmatmul.f32.gmra.mxu1 %v795_v39  ;;  %v1068_v42 = vmax.f32 %v888_v37, 0.0  ;;  %v347_v37 = vld [vmem:[%s1846_s9 + $0x158] sm:$0xff] }
 0x13f   : > { %1175 = vmatmul.f32.gmra.mxu2 %v1068_v42 }
 0x140   : > { %v649_v43 = vpop.f32.mrf.mxu0 }
 0x141   : > { %v650_v45 = vadd.f32 %v1931_v36, %v649_v43 }
 0x142   : > { %v890_v46 = vpop.f32.mrf.mxu1 }
 0x143   : > { %v891_v47 = vadd.f32 %v2080_v54, %v890_v46  ;;  %1544 = vmatmul.msk.f32.gmra.mxu0 %vm375_vm1, %v341_v44  ;;  %v796_v48 = vmax.f32 %v650_v45, 0.0 }
 0x145   : > { %937 = vmatmul.f32.gmra.mxu1 %v796_v48  ;;  %v1069_v49 = vmax.f32 %v891_v47, 0.0  ;;  %v348_v47 = vld [vmem:[%s1846_s9 + $0x160] sm:$0xff] }
 0x147   : > { %1178 = vmatmul.f32.gmra.mxu2 %v1069_v49 }
 0x148   : > { %v652_v50 = vpop.f32.mrf.mxu0 }
 0x149   : > { %v653_v52 = vadd.f32 %v1931_v36, %v652_v50 }
 0x14a   : > { %v893_v53 = vpop.f32.mrf.mxu1 }
 0x14b   : > { %v894_v55 = vadd.f32 %v2080_v54, %v893_v53  ;;  %1545 = vmatmul.msk.f32.gmra.mxu0 %vm375_vm1, %v342_v51  ;;  %v797_v56 = vmax.f32 %v653_v52, 0.0  ;;  %v353_v52 = vld [vmem:[%s1846_s9 + $0x188] sm:$0xff] }
 0x14c   : > { %1556 = vmatmul.msk.f32.vlgmr.msra.gmra.mxu3 %vm375_vm1, %v353_v52 }
 0x14d   : > { %940 = vmatmul.f32.gmra.mxu1 %v797_v56  ;;  %v1070_v57 = vmax.f32 %v894_v55, 0.0  ;;  %1598 = vmatpush.msra.mxu3 %v1963_v9  ;;  %v349_v56 = vld [vmem:[%s1846_s9 + $0x168] sm:$0xff]  ;;  %v354_v9 = vld [vmem:[%s1846_s9 + $0x190] sm:$0xff] }
 0x14f   : > { %1181 = vmatmul.f32.gmra.mxu2 %v1070_v57  ;;  %1599 = vmatpush.msra.mxu3 %v1971_v13 }
 0x150   : > { %v655_v58 = vpop.f32.mrf.mxu0 }
 0x151   : > { %v656_v60 = vadd.f32 %v1931_v36, %v655_v58  ;;  %1600 = vmatpush.msra.mxu3 %v1978_v15 }
 0x152   : > { %v896_v61 = vpop.f32.mrf.mxu1 }
 0x153   : > { %v897_v62 = vadd.f32 %v2080_v54, %v896_v61  ;;  %1546 = vmatmul.msk.f32.gmra.mxu0 %vm375_vm1, %v343_v59  ;;  %v798_v63 = vmax.f32 %v656_v60, 0.0  ;;  %1601 = vmatpush.msra.mxu3 %v1984_v16 }
 0x154   : > { %1557 = vmatmul.msk.f32.gmra.mxu3 %vm375_vm1, %v354_v9 }
 0x155   : > { %943 = vmatmul.f32.gmra.mxu1 %v798_v63  ;;  %v1071_v0 = vmax.f32 %v897_v62, 0.0  ;;  %1602 = vmatpush.msra.mxu3 %v1990_v17  ;;  %v350_v62 = vld [vmem:[%s1846_s9 + $0x170] sm:$0xff] }
 0x157   : > { %1184 = vmatmul.f32.gmra.mxu2 %v1071_v0  ;;  %1603 = vmatpush.msra.mxu3 %v1998_v21 }
 0x158   : > { %v658_v1 = vpop.f32.mrf.mxu0 }
 0x159   : > { %v659_v3 = vadd.f32 %v1931_v36, %v658_v1  ;;  %1604 = vmatpush.msra.mxu3 %v2005_v23  ;;  %v355_v1 = vld [vmem:[%s1846_s9 + $0x198] sm:$0xff] }
 0x15a   : > { %v899_v4 = vpop.f32.mrf.mxu1 }
 0x15b   : > { %v799_v5 = vmax.f32 %v659_v3, 0.0  ;;  %v900_v6 = vadd.f32 %v2080_v54, %v899_v4  ;;  %1547 = vmatmul.msk.f32.gmra.mxu0 %vm375_vm1, %v344_v2  ;;  %1605 = vmatpush.msra.mxu3 %v2011_v24  ;;  %v351_v2 = vld [vmem:[%s1846_s9 + $0x178] sm:$0xff] }
 0x15c   : > { %1558 = vmatmul.msk.f32.gmra.mxu3 %vm375_vm1, %v355_v1  ;;  %v362_v1 = vld [vmem:[%s1846_s9 + $0x1d0] sm:$0xff] }
 0x15d   : > { %946 = vmatmul.f32.gmra.mxu1 %v799_v5  ;;  %v1072_v7 = vmax.f32 %v900_v6, 0.0  ;;  %1606 = vmatpush.msra.mxu3 %v2017_v25  ;;  %v356_v5 = vld [vmem:[%s1846_s9 + $0x1a0] sm:$0xff] }
 0x15f   : > { %1187 = vmatmul.f32.gmra.mxu2 %v1072_v7  ;;  %1607 = vmatpush.msra.mxu3 %v2025_v29 }
 0x160   : > { %v661_v8 = vpop.f32.mrf.mxu0 }
 0x161   : > { %v662_v11 = vadd.f32 %v1931_v36, %v661_v8  ;;  %1608 = vmatpush.msra.mxu3 %v2032_v31  ;;  %v352_v31 = vld [vmem:[%s1846_s9 + $0x180] sm:$0xff] }
 0x162   : > { %v902_v12 = vpop.f32.mrf.mxu1 }
 0x163   : > { %v800_v14 = vmax.f32 %v662_v11, 0.0  ;;  %v903_v18 = vadd.f32 %v2080_v54, %v902_v12  ;;  %1548 = vmatmul.msk.f32.gmra.mxu0 %vm375_vm1, %v345_v10  ;;  %1609 = vmatpush.msra.mxu3 %v2038_v32  ;;  %v357_v10 = vld [vmem:[%s1846_s9 + $0x1a8] sm:$0xff] }
 0x164   : > { %1559 = vmatmul.msk.f32.gmra.mxu3 %vm375_vm1, %v356_v5 }
 0x165   : > { %949 = vmatmul.f32.gmra.mxu1 %v800_v14  ;;  %v1073_v19 = vmax.f32 %v903_v18, 0.0  ;;  %1610 = vmatpush.msra.mxu3 %v2044_v33 }
 0x167   : > { %1190 = vmatmul.f32.gmra.mxu2 %v1073_v19  ;;  %1611 = vmatpush.msra.mxu3 %v2052_v38  ;;  %v2182_v38 = vld [vmem:[%s2485_s6] ss:$0 sm:$0xff] }
 0x168   : > { %v664_v20 = vpop.f32.mrf.mxu0 }
 0x169   : > { %v665_v26 = vadd.f32 %v1931_v36, %v664_v20  ;;  %1612 = vmatpush.msra.mxu3 %v2059_v40  ;;  %v358_v20 = vld [vmem:[%s1846_s9 + $0x1b0] sm:$0xff] }
 0x16a   : > { %v905_v27 = vpop.f32.mrf.mxu1 }
 0x16b   : > { %v801_v28 = vmax.f32 %v665_v26, 0.0  ;;  %v906_v30 = vadd.f32 %v2080_v54, %v905_v27  ;;  %1549 = vmatmul.msk.f32.gmra.mxu0 %vm375_vm1, %v346_v22  ;;  %1613 = vmatpush.msra.mxu3 %v2065_v41 }
 0x16c   : > { %1560 = vmatmul.msk.f32.gmra.mxu3 %vm375_vm1, %v357_v10 }
 0x16d   : > { %952 = vmatmul.f32.gmra.mxu1 %v801_v28  ;;  %v1074_v34 = vmax.f32 %v906_v30, 0.0 }
 0x16f   : > { %1193 = vmatmul.f32.gmra.mxu2 %v1074_v34 }
 0x170   : > { %v667_v35 = vpop.f32.mrf.mxu0 }
 0x171   : > { %v668_v39 = vadd.f32 %v1931_v36, %v667_v35 }
 0x172   : > { %v908_v42 = vpop.f32.mrf.mxu1 }
 0x173   : > { %v802_v43 = vmax.f32 %v668_v39, 0.0  ;;  %v909_v44 = vadd.f32 %v2080_v54, %v908_v42  ;;  %1550 = vmatmul.msk.f32.gmra.mxu0 %vm375_vm1, %v347_v37  ;;  %v359_v39 = vld [vmem:[%s1846_s9 + $0x1b8] sm:$0xff] }
 0x174   : > { %1561 = vmatmul.msk.f32.gmra.mxu3 %vm375_vm1, %v358_v20 }
 0x175   : > { %955 = vmatmul.f32.gmra.mxu1 %v802_v43  ;;  %v1075_v45 = vmax.f32 %v909_v44, 0.0 }
 0x177   : > { %1196 = vmatmul.f32.gmra.mxu2 %v1075_v45 }
 0x178   : > { %v670_v46 = vpop.f32.mrf.mxu0 }
 0x179   : > { %v671_v48 = vadd.f32 %v1931_v36, %v670_v46 }
 0x17a   : > { %v911_v49 = vpop.f32.mrf.mxu1 }
 0x17b   : > { %v803_v50 = vmax.f32 %v671_v48, 0.0  ;;  %v912_v51 = vadd.f32 %v2080_v54, %v911_v49  ;;  %1551 = vmatmul.msk.f32.gmra.mxu0 %vm375_vm1, %v348_v47 }
 0x17c   : > { %1562 = vmatmul.msk.f32.gmra.mxu3 %vm375_vm1, %v359_v39 }
 0x17d   : > { %958 = vmatmul.f32.gmra.mxu1 %v803_v50  ;;  %v1076_v53 = vmax.f32 %v912_v51, 0.0  ;;  %v360_v50 = vld [vmem:[%s1846_s9 + $0x1c0] sm:$0xff] }
 0x17f   : > { %1199 = vmatmul.f32.gmra.mxu2 %v1076_v53 }
 0x180   : > { %v673_v55 = vpop.f32.mrf.mxu0 }
 0x181   : > { %v674_v57 = vadd.f32 %v1931_v36, %v673_v55 }
 0x182   : > { %v914_v58 = vpop.f32.mrf.mxu1 }
 0x183   : > { %v804_v59 = vmax.f32 %v674_v57, 0.0  ;;  %v915_v60 = vadd.f32 %v2080_v54, %v914_v58  ;;  %1552 = vmatmul.msk.f32.gmra.mxu0 %vm375_vm1, %v349_v56 }
 0x184   : > { %1563 = vmatmul.msk.f32.gmra.mxu3 %vm375_vm1, %v360_v50 }
 0x185   : > { %961 = vmatmul.f32.gmra.mxu1 %v804_v59  ;;  %v1077_v61 = vmax.f32 %v915_v60, 0.0  ;;  %v361_v60 = vld [vmem:[%s1846_s9 + $0x1c8] sm:$0xff] }
 0x187   : > { %1202 = vmatmul.f32.gmra.mxu2 %v1077_v61 }
 0x188   : > { %v676_v13 = vpop.f32.mrf.mxu0 }
 0x189   : > { %v677_v15 = vadd.f32 %v1931_v36, %v676_v13 }
 0x18a   : > { %v917_v63 = vpop.f32.mrf.mxu1 }
 0x18b   : > { %v805_v16 = vmax.f32 %v677_v15, 0.0  ;;  %v918_v0 = vadd.f32 %v2080_v54, %v917_v63  ;;  %1553 = vmatmul.msk.f32.gmra.mxu0 %vm375_vm1, %v350_v62 }
 0x18c   : > { %1564 = vmatmul.msk.f32.gmra.mxu3 %vm375_vm1, %v361_v60 }
 0x18d   : > { %964 = vmatmul.f32.gmra.mxu1 %v805_v16  ;;  %v1078_v17 = vmax.f32 %v918_v0, 0.0 }
 0x18f   : > { %1205 = vmatmul.f32.gmra.mxu2 %v1078_v17 }
 0x190   : > { %v679_v21 = vpop.f32.mrf.mxu0 }
 0x191   : > { %v680_v23 = vadd.f32 %v1931_v36, %v679_v21 }
 0x192   : > { %v920_v3 = vpop.f32.mrf.mxu1 }
 0x193   : > { %v806_v4 = vmax.f32 %v680_v23, 0.0  ;;  %v921_v24 = vadd.f32 %v2080_v54, %v920_v3  ;;  %1554 = vmatmul.msk.f32.gmra.mxu0 %vm375_vm1, %v351_v2 }
 0x194   : > { %1565 = vmatmul.msk.f32.gmra.mxu3 %vm375_vm1, %v362_v1 }
 0x195   : > { %967 = vmatmul.f32.gmra.mxu1 %v806_v4  ;;  %v1079_v25 = vmax.f32 %v921_v24, 0.0 }
 0x197   : > { %1208 = vmatmul.f32.gmra.mxu2 %v1079_v25  ;;  %v363_v25 = vld [vmem:[%s1846_s9 + $0x1d8] sm:$0xff] }
 0x198   : > { %v682_v29 = vpop.f32.mrf.mxu0 }
 0x199   : > { %v683_v6 = vadd.f32 %v1931_v36, %v682_v29 }
 0x19a   : > { %v923_v7 = vpop.f32.mrf.mxu1 }
 0x19b   : > { %v807_v8 = vmax.f32 %v683_v6, 0.0  ;;  %v924_v32 = vadd.f32 %v2080_v54, %v923_v7  ;;  %1555 = vmatmul.msk.f32.gmra.mxu0 %vm375_vm1, %v352_v31 }
 0x19c   : > { %1566 = vmatmul.msk.f32.gmra.mxu3 %vm375_vm1, %v363_v25 }
 0x19d   : > { %970 = vmatmul.f32.gmra.mxu1 %v807_v8  ;;  %v1080_v33 = vmax.f32 %v924_v32, 0.0 }
 0x19f   : > { %1211 = vmatmul.f32.gmra.mxu2 %v1080_v33 }
 0x1a0   : > { %v685_v40 = vpop.f32.mrf.mxu0 }
 0x1a1   : > { %v686_v11 = vadd.f32 %v1931_v36, %v685_v40  ;;  %v364_v40 = vld [vmem:[%s1846_s9 + $0x1e0] sm:$0xff] }
 0x1a2   : > { %v926_v12 = vpop.f32.mrf.mxu1  ;;  %v1164_v14 = vpop.f32.mrf.mxu2 }
 0x1a3   : > { %v808_v18 = vmax.f32 %v686_v11, 0.0  ;;  %v927_v41 = vadd.f32 %v2080_v54, %v926_v12  ;;  %v1165_v19 = vadd.f32 %v2182_v38, %v1164_v14 }
 0x1a4   : > { %1567 = vmatmul.msk.f32.gmra.mxu3 %vm375_vm1, %v364_v40 }
 0x1a5   : > { %1353 = vst [vmem:[%s2188_s13] sm:$0xff] %v1165_v19  ;;  %973 = vmatmul.f32.gmra.mxu1 %v808_v18  ;;  %v1081_v22 = vmax.f32 %v927_v41, 0.0 }
 0x1a7   : > { %1214 = vmatmul.f32.gmra.mxu2 %v1081_v22 }
 0x1a8   : > { %v688_v26 = vpop.f32.mrf.mxu0 }
 0x1a9   : > { %v689_v27 = vadd.f32 %v1931_v36, %v688_v26  ;;  %v365_v26 = vld [vmem:[%s1846_s9 + $0x1e8] sm:$0xff] }
 0x1aa   : > { %v929_v28 = vpop.f32.mrf.mxu1  ;;  %v1167_v30 = vpop.f32.mrf.mxu2 }
 0x1ab   : > { %v809_v34 = vmax.f32 %v689_v27, 0.0  ;;  %v930_v35 = vadd.f32 %v2080_v54, %v929_v28  ;;  %v1168_v37 = vadd.f32 %v2182_v38, %v1167_v30 }
 0x1ac   : > { %1568 = vmatmul.msk.f32.gmra.mxu3 %vm375_vm1, %v365_v26 }
 0x1ad   : > { %1354 = vst [vmem:[%s2188_s13 + $0x8] sm:$0xff] %v1168_v37  ;;  %976 = vmatmul.f32.gmra.mxu1 %v809_v34  ;;  %v1082_v42 = vmax.f32 %v930_v35, 0.0 }
 0x1af   : > { %1217 = vmatmul.f32.gmra.mxu2 %v1082_v42 }
 0x1b0   : > { %v691_v43 = vpop.f32.mrf.mxu0 }
 0x1b1   : > { %v692_v44 = vadd.f32 %v1931_v36, %v691_v43  ;;  %v366_v43 = vld [vmem:[%s1846_s9 + $0x1f0] sm:$0xff] }
 0x1b2   : > { %v932_v45 = vpop.f32.mrf.mxu1  ;;  %v1170_v46 = vpop.f32.mrf.mxu2 }
 0x1b3   : > { %v810_v47 = vmax.f32 %v692_v44, 0.0  ;;  %v933_v48 = vadd.f32 %v2080_v54, %v932_v45  ;;  %v1171_v49 = vadd.f32 %v2182_v38, %v1170_v46 }
 0x1b4   : > { %1569 = vmatmul.msk.f32.gmra.mxu3 %vm375_vm1, %v366_v43 }
 0x1b5   : > { %1355 = vst [vmem:[%s2188_s13 + $0x10] sm:$0xff] %v1171_v49  ;;  %979 = vmatmul.f32.gmra.mxu1 %v810_v47  ;;  %v1083_v51 = vmax.f32 %v933_v48, 0.0 }
 0x1b7   : > { %1220 = vmatmul.f32.gmra.mxu2 %v1083_v51 }
 0x1b8   : > { %v694_v52 = vpop.f32.mrf.mxu0 }
 0x1b9   : > { %v695_v53 = vadd.f32 %v1931_v36, %v694_v52 }
 0x1ba   : > { %v935_v55 = vpop.f32.mrf.mxu1  ;;  %v1173_v56 = vpop.f32.mrf.mxu2 }
 0x1bb   : > { %v811_v57 = vmax.f32 %v695_v53, 0.0  ;;  %v936_v58 = vadd.f32 %v2080_v54, %v935_v55  ;;  %v1174_v59 = vadd.f32 %v2182_v38, %v1173_v56 }
 0x1bd   : > { %1356 = vst [vmem:[%s2188_s13 + $0x18] sm:$0xff] %v1174_v59  ;;  %982 = vmatmul.f32.gmra.mxu1 %v811_v57  ;;  %v1084_v9 = vmax.f32 %v936_v58, 0.0 }
 0x1bf   : > { %1223 = vmatmul.f32.gmra.mxu2 %v1084_v9 }
 0x1c0   : > { %v697_v61 = vpop.f32.mrf.mxu0 }
 0x1c1   : > { %v698_v13 = vadd.f32 %v1931_v36, %v697_v61 }
 0x1c2   : > { %v938_v62 = vpop.f32.mrf.mxu1  ;;  %v1176_v15 = vpop.f32.mrf.mxu2 }
 0x1c3   : > { %v812_v63 = vmax.f32 %v698_v13, 0.0  ;;  %v939_v16 = vadd.f32 %v2080_v54, %v938_v62  ;;  %v1177_v0 = vadd.f32 %v2182_v38, %v1176_v15 }
 0x1c5   : > { %1357 = vst [vmem:[%s2188_s13 + $0x20] sm:$0xff] %v1177_v0  ;;  %985 = vmatmul.f32.gmra.mxu1 %v812_v63  ;;  %v1085_v17 = vmax.f32 %v939_v16, 0.0 }
 0x1c7   : > { %1226 = vmatmul.f32.gmra.mxu2 %v1085_v17 }
 0x1c8   : > { %v700_v21 = vpop.f32.mrf.mxu0 }
 0x1c9   : > { %v701_v2 = vadd.f32 %v1931_v36, %v700_v21 }
 0x1ca   : > { %v941_v23 = vpop.f32.mrf.mxu1  ;;  %v1179_v3 = vpop.f32.mrf.mxu2 }
 0x1cb   : > { %v813_v4 = vmax.f32 %v701_v2, 0.0  ;;  %v942_v24 = vadd.f32 %v2080_v54, %v941_v23  ;;  %v1180_v5 = vadd.f32 %v2182_v38, %v1179_v3 }
 0x1cd   : > { %1358 = vst [vmem:[%s2188_s13 + $0x28] sm:$0xff] %v1180_v5  ;;  %988 = vmatmul.f32.gmra.mxu1 %v813_v4  ;;  %v1086_v29 = vmax.f32 %v942_v24, 0.0 }
 0x1cf   : > { %1229 = vmatmul.f32.gmra.mxu2 %v1086_v29  ;;  %v733_v17 = vpop.f32.mrf.mxu3 }
 0x1d0   : > { %v703_v31 = vpop.f32.mrf.mxu0 }
 0x1d1   : > { %v704_v6 = vadd.f32 %v1931_v36, %v703_v31 }
 0x1d2   : > { %v944_v7 = vpop.f32.mrf.mxu1  ;;  %v1182_v8 = vpop.f32.mrf.mxu2 }
 0x1d3   : > { %v814_v32 = vmax.f32 %v704_v6, 0.0  ;;  %v945_v10 = vadd.f32 %v2080_v54, %v944_v7  ;;  %v1183_v33 = vadd.f32 %v2182_v38, %v1182_v8 }
 0x1d5   : > { %v1087_v11 = vmax.f32 %v945_v10, 0.0  ;;  %1359 = vst [vmem:[%s2188_s13 + $0x30] sm:$0xff] %v1183_v33  ;;  %991 = vmatmul.f32.gmra.mxu1 %v814_v32 }
 0x1d7   : > { %1232 = vmatmul.f32.gmra.mxu2 %v1087_v11  ;;  %v736_v6 = vpop.f32.mrf.mxu3 }
 0x1d8   : > { %v706_v12 = vpop.f32.mrf.mxu0 }
 0x1d9   : > { %v707_v14 = vadd.f32 %v1931_v36, %v706_v12 }
 0x1da   : > { %v947_v18 = vpop.f32.mrf.mxu1  ;;  %v1185_v41 = vpop.f32.mrf.mxu2 }
 0x1db   : > { %v815_v19 = vmax.f32 %v707_v14, 0.0  ;;  %v948_v20 = vadd.f32 %v2080_v54, %v947_v18  ;;  %v1186_v22 = vadd.f32 %v2182_v38, %v1185_v41 }
 0x1dd   : > { %v1088_v27 = vmax.f32 %v948_v20, 0.0  ;;  %1360 = vst [vmem:[%s2188_s13 + $0x38] sm:$0xff] %v1186_v22  ;;  %994 = vmatmul.f32.gmra.mxu1 %v815_v19 }
 0x1df   : > { %1235 = vmatmul.f32.gmra.mxu2 %v1088_v27  ;;  %v739_v22 = vpop.f32.mrf.mxu3 }
 0x1e0   : > { %v709_v28 = vpop.f32.mrf.mxu0 }
 0x1e1   : > { %v710_v30 = vadd.f32 %v1931_v36, %v709_v28  ;;  %v2267_v28 = vld [vmem:[%s2481_s2] ss:$0 sm:$0xff] }
 0x1e2   : > { %v950_v34 = vpop.f32.mrf.mxu1  ;;  %v1188_v35 = vpop.f32.mrf.mxu2  ;;  %v734_v43 = vadd.f32 %v2267_v28, %v733_v17 }
 0x1e3   : > { %v816_v37 = vmax.f32 %v710_v30, 0.0  ;;  %v951_v39 = vadd.f32 %v2080_v54, %v950_v34  ;;  %v1189_v42 = vadd.f32 %v2182_v38, %v1188_v35 }
 0x1e5   : > { %v1089_v44 = vmax.f32 %v951_v39, 0.0  ;;  %1361 = vst [vmem:[%s2188_s13 + $0x40] sm:$0xff] %v1189_v42  ;;  %997 = vmatmul.f32.gmra.mxu1 %v816_v37 }
 0x1e7   : > { %1238 = vmatmul.f32.gmra.mxu2 %v1089_v44  ;;  %v742_v44 = vpop.f32.mrf.mxu3 }
 0x1e8   : > { %v712_v45 = vpop.f32.mrf.mxu0 }
 0x1e9   : > { %v713_v46 = vadd.f32 %v1931_v36, %v712_v45  ;;  %v824_v45 = vmax.f32 %v734_v43, 0.0 }
 0x1ea   : > { %v953_v47 = vpop.f32.mrf.mxu1  ;;  %v1191_v48 = vpop.f32.mrf.mxu2 }
 0x1eb   : > { %v817_v49 = vmax.f32 %v713_v46, 0.0  ;;  %v954_v50 = vadd.f32 %v2080_v54, %v953_v47  ;;  %v1192_v51 = vadd.f32 %v2182_v38, %v1191_v48 }
 0x1ed   : > { %v1090_v52 = vmax.f32 %v954_v50, 0.0  ;;  %1362 = vst [vmem:[%s2188_s13 + $0x48] sm:$0xff] %v1192_v51  ;;  %1000 = vmatmul.f32.gmra.mxu1 %v817_v49  ;;  %v737_v51 = vadd.f32 %v2267_v28, %v736_v6 }
 0x1ef   : > { %1241 = vmatmul.f32.gmra.mxu2 %v1090_v52  ;;  %v745_v52 = vpop.f32.mrf.mxu3 }
 0x1f0   : > { %v715_v53 = vpop.f32.mrf.mxu0 }
 0x1f1   : > { %v716_v55 = vadd.f32 %v1931_v36, %v715_v53  ;;  %v825_v53 = vmax.f32 %v737_v51, 0.0 }
 0x1f2   : > { %v956_v56 = vpop.f32.mrf.mxu1  ;;  %v1194_v57 = vpop.f32.mrf.mxu2 }
 0x1f3   : > { %v818_v58 = vmax.f32 %v716_v55, 0.0  ;;  %v957_v59 = vadd.f32 %v2080_v54, %v956_v56  ;;  %v1195_v60 = vadd.f32 %v2182_v38, %v1194_v57 }
 0x1f5   : > { %v1091_v9 = vmax.f32 %v957_v59, 0.0  ;;  %1363 = vst [vmem:[%s2188_s13 + $0x50] sm:$0xff] %v1195_v60  ;;  %1003 = vmatmul.f32.gmra.mxu1 %v818_v58  ;;  %v740_v60 = vadd.f32 %v2267_v28, %v739_v22 }
 0x1f7   : > { %1244 = vmatmul.f32.gmra.mxu2 %v1091_v9  ;;  %v826_v9 = vmax.f32 %v740_v60, 0.0 }
 0x1f8   : > { %v718_v61 = vpop.f32.mrf.mxu0 }
 0x1f9   : > { %v719_v13 = vadd.f32 %v1931_v36, %v718_v61  ;;  %v748_v61 = vpop.f32.mrf.mxu3 }
 0x1fa   : > { %v959_v62 = vpop.f32.mrf.mxu1  ;;  %v1197_v15 = vpop.f32.mrf.mxu2 }
 0x1fb   : > { %v819_v63 = vmax.f32 %v719_v13, 0.0  ;;  %v960_v16 = vadd.f32 %v2080_v54, %v959_v62  ;;  %v1198_v0 = vadd.f32 %v2182_v38, %v1197_v15 }
 0x1fd   : > { %v1092_v1 = vmax.f32 %v960_v16, 0.0  ;;  %1364 = vst [vmem:[%s2188_s13 + $0x58] sm:$0xff] %v1198_v0  ;;  %1006 = vmatmul.f32.gmra.mxu1 %v819_v63  ;;  %v743_v0 = vadd.f32 %v2267_v28, %v742_v44 }
 0x1ff   : > { %1247 = vmatmul.f32.gmra.mxu2 %v1092_v1  ;;  %v827_v1 = vmax.f32 %v743_v0, 0.0 }
 0x200   : > { %v721_v21 = vpop.f32.mrf.mxu0 }
 0x201   : > { %v722_v2 = vadd.f32 %v1931_v36, %v721_v21 }
 0x202   : > { %v962_v23 = vpop.f32.mrf.mxu1  ;;  %v1200_v3 = vpop.f32.mrf.mxu2 }
 0x203   : > { %v820_v4 = vmax.f32 %v722_v2, 0.0  ;;  %v963_v24 = vadd.f32 %v2080_v54, %v962_v23  ;;  %v1201_v5 = vadd.f32 %v2182_v38, %v1200_v3  ;;  %v751_v3 = vpop.f32.mrf.mxu3 }
 0x205   : > { %v1093_v25 = vmax.f32 %v963_v24, 0.0  ;;  %1365 = vst [vmem:[%s2188_s13 + $0x60] sm:$0xff] %v1201_v5  ;;  %1009 = vmatmul.f32.gmra.mxu1 %v820_v4  ;;  %v746_v24 = vadd.f32 %v2267_v28, %v745_v52 }
 0x207   : > { %1250 = vmatmul.f32.gmra.mxu2 %v1093_v25  ;;  %v828_v5 = vmax.f32 %v746_v24, 0.0 }
 0x208   : > { %v724_v29 = vpop.f32.mrf.mxu0 }
 0x209   : > { %v725_v31 = vadd.f32 %v1931_v36, %v724_v29 }
 0x20a   : > { %v965_v7 = vpop.f32.mrf.mxu1  ;;  %v1203_v8 = vpop.f32.mrf.mxu2 }
 0x20b   : > { %v821_v32 = vmax.f32 %v725_v31, 0.0  ;;  %v966_v10 = vadd.f32 %v2080_v54, %v965_v7  ;;  %v1204_v33 = vadd.f32 %v2182_v38, %v1203_v8  ;;  %v749_v8 = vadd.f32 %v2267_v28, %v748_v61 }
 0x20d   : > { %v1094_v40 = vmax.f32 %v966_v10, 0.0  ;;  %1366 = vst [vmem:[%s2188_s13 + $0x68] sm:$0xff] %v1204_v33  ;;  %1012 = vmatmul.f32.gmra.mxu1 %v821_v32  ;;  %v754_v32 = vpop.f32.mrf.mxu3  ;;  %v829_v10 = vmax.f32 %v749_v8, 0.0 }
 0x20f   : > { %1253 = vmatmul.f32.gmra.mxu2 %v1094_v40 }
 0x210   : > { %v727_v11 = vpop.f32.mrf.mxu0 }
 0x211   : > { %v728_v12 = vadd.f32 %v1931_v36, %v727_v11 }
 0x212   : > { %v968_v14 = vpop.f32.mrf.mxu1  ;;  %v1206_v18 = vpop.f32.mrf.mxu2 }
 0x213   : > { %v822_v41 = vmax.f32 %v728_v12, 0.0  ;;  %v969_v19 = vadd.f32 %v2080_v54, %v968_v14  ;;  %v1207_v20 = vadd.f32 %v2182_v38, %v1206_v18  ;;  %v752_v18 = vadd.f32 %v2267_v28, %v751_v3  ;;  %v2321_v3 = vld [vmem:[%s2483_s4] ss:$0 sm:$0xff] }
 0x215   : > { %v1095_v26 = vmax.f32 %v969_v19, 0.0  ;;  %1367 = vst [vmem:[%s2188_s13 + $0x70] sm:$0xff] %v1207_v20  ;;  %1015 = vmatmul.f32.vlgmr.msrb.gmra.mxu3 %v822_v41  ;;  %v757_v41 = vpop.f32.mrf.mxu3  ;;  %v830_v19 = vmax.f32 %v752_v18, 0.0 }
 0x217   : > { %1256 = vmatmul.f32.gmra.mxu2 %v1095_v26 }
 0x218   : > { %v730_v27 = vpop.f32.mrf.mxu0 }
 0x219   : > { %v731_v36 = vadd.f32 %v2267_v28, %v730_v27 }
 0x21a   : > { %v971_v30 = vpop.f32.mrf.mxu1  ;;  %v1209_v34 = vpop.f32.mrf.mxu2 }
 0x21b   : > { %v823_v35 = vmax.f32 %v731_v36, 0.0  ;;  %v972_v37 = vadd.f32 %v2080_v54, %v971_v30  ;;  %v1210_v39 = vadd.f32 %v2182_v38, %v1209_v34  ;;  %v755_v30 = vadd.f32 %v2267_v28, %v754_v32 }
 0x21d   : > { %v1096_v42 = vmax.f32 %v972_v37, 0.0  ;;  %1368 = vst [vmem:[%s2188_s13 + $0x78] sm:$0xff] %v1210_v39  ;;  %1018 = vmatmul.f32.gmra.mxu3 %v823_v35  ;;  %v831_v34 = vmax.f32 %v755_v30, 0.0  ;;  %v760_v35 = vpop.f32.mrf.mxu3 }
 0x21f   : > { %1259 = vmatmul.f32.gmra.mxu2 %v1096_v42 }
 0x222   : > { %v974_v46 = vpop.f32.mrf.mxu1  ;;  %v1212_v47 = vpop.f32.mrf.mxu2 }
 0x223   : > { %v975_v48 = vadd.f32 %v2080_v54, %v974_v46  ;;  %v1213_v49 = vadd.f32 %v2182_v38, %v1212_v47 }
 0x225   : > { %v1097_v50 = vmax.f32 %v975_v48, 0.0  ;;  %1369 = vst [vmem:[%s2188_s13 + $0x80] sm:$0xff] %v1213_v49  ;;  %1021 = vmatmul.f32.gmra.mxu3 %v824_v45  ;;  %v758_v45 = vadd.f32 %v2267_v28, %v757_v41  ;;  %v763_v51 = vpop.f32.mrf.mxu3 }
 0x227   : > { %1262 = vmatmul.f32.gmra.mxu2 %v1097_v50  ;;  %v832_v46 = vmax.f32 %v758_v45, 0.0 }
 0x22a   : > { %v977_v55 = vpop.f32.mrf.mxu1  ;;  %v1215_v56 = vpop.f32.mrf.mxu2 }
 0x22b   : > { %v978_v57 = vadd.f32 %v2080_v54, %v977_v55  ;;  %v1216_v58 = vadd.f32 %v2182_v38, %v1215_v56 }
 0x22d   : > { %v1098_v59 = vmax.f32 %v978_v57, 0.0  ;;  %1370 = vst [vmem:[%s2188_s13 + $0x88] sm:$0xff] %v1216_v58  ;;  %1024 = vmatmul.f32.gmra.mxu3 %v825_v53  ;;  %v761_v53 = vadd.f32 %v2267_v28, %v760_v35  ;;  %v766_v61 = vpop.f32.mrf.mxu3 }
 0x22f   : > { %1265 = vmatmul.f32.gmra.mxu2 %v1098_v59  ;;  %v833_v55 = vmax.f32 %v761_v53, 0.0 }
 0x232   : > { %v980_v13 = vpop.f32.mrf.mxu1  ;;  %v1218_v62 = vpop.f32.mrf.mxu2 }
 0x233   : > { %v981_v15 = vadd.f32 %v2080_v54, %v980_v13  ;;  %v1219_v63 = vadd.f32 %v2182_v38, %v1218_v62 }
 0x235   : > { %v1099_v16 = vmax.f32 %v981_v15, 0.0  ;;  %1371 = vst [vmem:[%s2188_s13 + $0x90] sm:$0xff] %v1219_v63  ;;  %1027 = vmatmul.f32.gmra.mxu3 %v826_v9  ;;  %v764_v9 = vadd.f32 %v2267_v28, %v763_v51 }
 0x237   : > { %1268 = vmatmul.f32.gmra.mxu2 %v1099_v16  ;;  %v834_v13 = vmax.f32 %v764_v9, 0.0 }
 0x23a   : > { %v983_v17 = vpop.f32.mrf.mxu1  ;;  %v1221_v21 = vpop.f32.mrf.mxu2 }
 0x23b   : > { %v984_v2 = vadd.f32 %v2080_v54, %v983_v17  ;;  %v1222_v23 = vadd.f32 %v2182_v38, %v1221_v21  ;;  %v769_v17 = vpop.f32.mrf.mxu3 }
 0x23d   : > { %v1100_v4 = vmax.f32 %v984_v2, 0.0  ;;  %1372 = vst [vmem:[%s2188_s13 + $0x98] sm:$0xff] %v1222_v23  ;;  %1030 = vmatmul.f32.gmra.mxu3 %v827_v1  ;;  %v767_v1 = vadd.f32 %v2267_v28, %v766_v61 }
 0x23f   : > { %1271 = vmatmul.f32.gmra.mxu2 %v1100_v4  ;;  %v835_v21 = vmax.f32 %v767_v1, 0.0 }
 0x242   : > { %v986_v25 = vpop.f32.mrf.mxu1  ;;  %v1224_v29 = vpop.f32.mrf.mxu2 }
 0x243   : > { %v987_v31 = vadd.f32 %v2080_v54, %v986_v25  ;;  %v1225_v6 = vadd.f32 %v2182_v38, %v1224_v29  ;;  %v772_v29 = vpop.f32.mrf.mxu3 }
 0x245   : > { %v1101_v7 = vmax.f32 %v987_v31, 0.0  ;;  %1373 = vst [vmem:[%s2188_s13 + $0xa0] sm:$0xff] %v1225_v6  ;;  %1033 = vmatmul.f32.gmra.mxu3 %v828_v5  ;;  %v770_v5 = vadd.f32 %v2267_v28, %v769_v17 }
 0x247   : > { %1274 = vmatmul.f32.gmra.mxu2 %v1101_v7  ;;  %v836_v25 = vmax.f32 %v770_v5, 0.0 }
 0x24a   : > { %v989_v33 = vpop.f32.mrf.mxu1  ;;  %v1227_v40 = vpop.f32.mrf.mxu2 }
 0x24b   : > { %v990_v11 = vadd.f32 %v2080_v54, %v989_v33  ;;  %v1228_v12 = vadd.f32 %v2182_v38, %v1227_v40 }
 0x24d   : > { %v1102_v14 = vmax.f32 %v990_v11, 0.0  ;;  %1374 = vst [vmem:[%s2188_s13 + $0xa8] sm:$0xff] %v1228_v12  ;;  %1036 = vmatmul.f32.gmra.mxu3 %v829_v10  ;;  %v773_v10 = vadd.f32 %v2267_v28, %v772_v29 }
 0x24f   : > { %1277 = vmatmul.f32.gmra.mxu2 %v1102_v14  ;;  %v837_v33 = vmax.f32 %v773_v10, 0.0 }
 0x252   : > { %v992_v20 = vpop.f32.mrf.mxu1  ;;  %v1230_v22 = vpop.f32.mrf.mxu2 }
 0x253   : > { %v993_v26 = vadd.f32 %v2080_v54, %v992_v20  ;;  %v1231_v27 = vadd.f32 %v2182_v38, %v1230_v22 }
 0x255   : > { %v1103_v36 = vmax.f32 %v993_v26, 0.0  ;;  %1375 = vst [vmem:[%s2188_s13 + $0xb0] sm:$0xff] %v1231_v27  ;;  %1039 = vmatmul.f32.gmra.mxu3 %v830_v19 }
 0x257   : > { %1280 = vmatmul.f32.gmra.mxu2 %v1103_v36 }
 0x25a   : > { %v995_v37 = vpop.f32.mrf.mxu1  ;;  %v1233_v39 = vpop.f32.mrf.mxu2 }
 0x25b   : > { %v996_v42 = vadd.f32 %v2080_v54, %v995_v37  ;;  %v1234_v43 = vadd.f32 %v2182_v38, %v1233_v39 }
 0x25d   : > { %v1104_v44 = vmax.f32 %v996_v42, 0.0  ;;  %1376 = vst [vmem:[%s2188_s13 + $0xb8] sm:$0xff] %v1234_v43  ;;  %1042 = vmatmul.f32.gmra.mxu3 %v831_v34 }
 0x25f   : > { %1283 = vmatmul.f32.gmra.mxu2 %v1104_v44 }
 0x262   : > { %v998_v47 = vpop.f32.mrf.mxu1  ;;  %v1236_v48 = vpop.f32.mrf.mxu2 }
 0x263   : > { %v999_v49 = vadd.f32 %v2080_v54, %v998_v47  ;;  %v1237_v50 = vadd.f32 %v2182_v38, %v1236_v48 }
 0x265   : > { %v1105_v52 = vmax.f32 %v999_v49, 0.0  ;;  %1377 = vst [vmem:[%s2188_s13 + $0xc0] sm:$0xff] %v1237_v50  ;;  %1045 = vmatmul.f32.gmra.mxu3 %v832_v46 }
 0x267   : > { %1286 = vmatmul.f32.gmra.mxu2 %v1105_v52 }
 0x26a   : > { %v1001_v56 = vpop.f32.mrf.mxu1  ;;  %v1239_v57 = vpop.f32.mrf.mxu2 }
 0x26b   : > { %v1002_v58 = vadd.f32 %v2080_v54, %v1001_v56  ;;  %v1240_v59 = vadd.f32 %v2182_v38, %v1239_v57 }
 0x26d   : > { %v1106_v60 = vmax.f32 %v1002_v58, 0.0  ;;  %1378 = vst [vmem:[%s2188_s13 + $0xc8] sm:$0xff] %v1240_v59  ;;  %1048 = vmatmul.f32.gmra.mxu3 %v833_v55 }
 0x26f   : > { %1289 = vmatmul.f32.gmra.mxu2 %v1106_v60 }
 0x272   : > { %v1004_v62 = vpop.f32.mrf.mxu1  ;;  %v1242_v15 = vpop.f32.mrf.mxu2 }
 0x273   : > { %v1005_v63 = vadd.f32 %v2080_v54, %v1004_v62  ;;  %v1243_v16 = vadd.f32 %v2182_v38, %v1242_v15 }
 0x275   : > { %v1107_v0 = vmax.f32 %v1005_v63, 0.0  ;;  %1379 = vst [vmem:[%s2188_s13 + $0xd0] sm:$0xff] %v1243_v16  ;;  %1051 = vmatmul.f32.gmra.mxu3 %v834_v13 }
 0x277   : > { %1292 = vmatmul.f32.gmra.mxu2 %v1107_v0 }
 0x27a   : > { %v1007_v2 = vpop.f32.mrf.mxu1  ;;  %v1245_v23 = vpop.f32.mrf.mxu2 }
 0x27b   : > { %v1008_v54 = vadd.f32 %v2321_v3, %v1007_v2  ;;  %v1246_v4 = vadd.f32 %v2182_v38, %v1245_v23 }
 0x27d   : > { %v1108_v24 = vmax.f32 %v1008_v54, 0.0  ;;  %1380 = vst [vmem:[%s2188_s13 + $0xd8] sm:$0xff] %v1246_v4  ;;  %1054 = vmatmul.f32.gmra.mxu3 %v835_v21 }
 0x27f   : > { %1295 = vmatmul.f32.gmra.mxu2 %v1108_v24 }
 0x282   : > { %v1010_v31 = vpop.f32.mrf.mxu1  ;;  %v1248_v6 = vpop.f32.mrf.mxu2 }
 0x283   : > { %v1011_v7 = vadd.f32 %v2321_v3, %v1010_v31  ;;  %v1249_v8 = vadd.f32 %v2182_v38, %v1248_v6 }
 0x285   : > { %v1109_v32 = vmax.f32 %v1011_v7, 0.0  ;;  %1381 = vst [vmem:[%s2188_s13 + $0xe0] sm:$0xff] %v1249_v8  ;;  %1057 = vmatmul.f32.gmra.mxu3 %v836_v25 }
 0x287   : > { %1298 = vmatmul.f32.gmra.mxu2 %v1109_v32 }
 0x28a   : > { %v1013_v40 = vpop.f32.mrf.mxu1  ;;  %v1251_v11 = vpop.f32.mrf.mxu2 }
 0x28b   : > { %v1014_v12 = vadd.f32 %v2321_v3, %v1013_v40  ;;  %v1252_v14 = vadd.f32 %v2182_v38, %v1251_v11 }
 0x28d   : > { %v1110_v18 = vmax.f32 %v1014_v12, 0.0  ;;  %1382 = vst [vmem:[%s2188_s13 + $0xe8] sm:$0xff] %v1252_v14  ;;  %1060 = vmatmul.f32.gmra.mxu3 %v837_v33 }
 0x28f   : > { %1301 = vmatmul.f32.gmra.mxu2 %v1110_v18 }
 0x292   : > { %v1254_v41 = vpop.f32.mrf.mxu2 }
 0x293   : > { %v1255_v19 = vadd.f32 %v2182_v38, %v1254_v41 }
 0x295   : > { %1383 = vst [vmem:[%s2188_s13 + $0xf0] sm:$0xff] %v1255_v19 }
 0x298   : > { %v1016_v20 = vpop.f32.mrf.mxu3 }
 0x299   : > { %v1017_v28 = vadd.f32 %v2321_v3, %v1016_v20 }
 0x29a   : > { %v1257_v22 = vpop.f32.mrf.mxu2 }
 0x29b   : > { %v1111_v26 = vmax.f32 %v1017_v28, 0.0  ;;  %v1258_v27 = vadd.f32 %v2182_v38, %v1257_v22 }
 0x29d   : > { %1384 = vst [vmem:[%s2188_s13 + $0xf8] sm:$0xff] %v1258_v27  ;;  %1304 = vmatmul.f32.vlgmr.msra.gmra.mxu3 %v1111_v26 }
 0x2a0   : > { %v1019_v36 = vpop.f32.mrf.mxu3 }
 0x2a1   : > { %v1020_v30 = vadd.f32 %v2321_v3, %v1019_v36 }
 0x2a2   : > { %v1260_v34 = vpop.f32.mrf.mxu2 }
 0x2a3   : > { %v1112_v35 = vmax.f32 %v1020_v30, 0.0  ;;  %v1261_v37 = vadd.f32 %v2182_v38, %v1260_v34 }
 0x2a5   : > { %1385 = vst [vmem:[%s2188_s13 + $0x100] sm:$0xff] %v1261_v37  ;;  %1307 = vmatmul.f32.gmra.mxu3 %v1112_v35 }
 0x2a8   : > { %v1022_v39 = vpop.f32.mrf.mxu3 }
 0x2a9   : > { %v1023_v42 = vadd.f32 %v2321_v3, %v1022_v39 }
 0x2aa   : > { %v1263_v43 = vpop.f32.mrf.mxu2 }
 0x2ab   : > { %v1113_v44 = vmax.f32 %v1023_v42, 0.0  ;;  %v1264_v45 = vadd.f32 %v2182_v38, %v1263_v43 }
 0x2ad   : > { %1386 = vst [vmem:[%s2188_s13 + $0x108] sm:$0xff] %v1264_v45  ;;  %1310 = vmatmul.f32.gmra.mxu3 %v1113_v44 }
 0x2b0   : > { %v1025_v46 = vpop.f32.mrf.mxu3 }
 0x2b1   : > { %v1026_v47 = vadd.f32 %v2321_v3, %v1025_v46 }
 0x2b2   : > { %v1266_v48 = vpop.f32.mrf.mxu2 }
 0x2b3   : > { %v1114_v49 = vmax.f32 %v1026_v47, 0.0  ;;  %v1267_v50 = vadd.f32 %v2182_v38, %v1266_v48 }
 0x2b5   : > { %1387 = vst [vmem:[%s2188_s13 + $0x110] sm:$0xff] %v1267_v50  ;;  %1313 = vmatmul.f32.gmra.mxu3 %v1114_v49 }
 0x2b8   : > { %v1028_v51 = vpop.f32.mrf.mxu3 }
 0x2b9   : > { %v1029_v52 = vadd.f32 %v2321_v3, %v1028_v51 }
 0x2ba   : > { %v1269_v53 = vpop.f32.mrf.mxu2 }
 0x2bb   : > { %v1115_v55 = vmax.f32 %v1029_v52, 0.0  ;;  %v1270_v56 = vadd.f32 %v2182_v38, %v1269_v53 }
 0x2bd   : > { %1388 = vst [vmem:[%s2188_s13 + $0x118] sm:$0xff] %v1270_v56  ;;  %1316 = vmatmul.f32.gmra.mxu3 %v1115_v55 }
 0x2c0   : > { %v1031_v57 = vpop.f32.mrf.mxu3 }
 0x2c1   : > { %v1032_v58 = vadd.f32 %v2321_v3, %v1031_v57 }
 0x2c2   : > { %v1272_v59 = vpop.f32.mrf.mxu2 }
 0x2c3   : > { %v1116_v60 = vmax.f32 %v1032_v58, 0.0  ;;  %v1273_v9 = vadd.f32 %v2182_v38, %v1272_v59 }
 0x2c5   : > { %1389 = vst [vmem:[%s2188_s13 + $0x120] sm:$0xff] %v1273_v9  ;;  %1319 = vmatmul.f32.gmra.mxu3 %v1116_v60 }
 0x2c8   : > { %v1034_v61 = vpop.f32.mrf.mxu3 }
 0x2c9   : > { %v1035_v13 = vadd.f32 %v2321_v3, %v1034_v61 }
 0x2ca   : > { %v1275_v62 = vpop.f32.mrf.mxu2 }
 0x2cb   : > { %v1117_v15 = vmax.f32 %v1035_v13, 0.0  ;;  %v1276_v63 = vadd.f32 %v2182_v38, %v1275_v62 }
 0x2cd   : > { %1390 = vst [vmem:[%s2188_s13 + $0x128] sm:$0xff] %v1276_v63  ;;  %1322 = vmatmul.f32.gmra.mxu3 %v1117_v15 }
 0x2d0   : > { %v1037_v16 = vpop.f32.mrf.mxu3 }
 0x2d1   : > { %v1038_v0 = vadd.f32 %v2321_v3, %v1037_v16 }
 0x2d2   : > { %v1278_v1 = vpop.f32.mrf.mxu2 }
 0x2d3   : > { %v1118_v17 = vmax.f32 %v1038_v0, 0.0  ;;  %v1279_v21 = vadd.f32 %v2182_v38, %v1278_v1 }
 0x2d5   : > { %1391 = vst [vmem:[%s2188_s13 + $0x130] sm:$0xff] %v1279_v21  ;;  %1325 = vmatmul.f32.gmra.mxu3 %v1118_v17 }
 0x2d8   : > { %v1040_v2 = vpop.f32.mrf.mxu3 }
 0x2d9   : > { %v1041_v23 = vadd.f32 %v2321_v3, %v1040_v2 }
 0x2da   : > { %v1281_v54 = vpop.f32.mrf.mxu2 }
 0x2db   : > { %v1119_v4 = vmax.f32 %v1041_v23, 0.0  ;;  %v1282_v24 = vadd.f32 %v2182_v38, %v1281_v54 }
 0x2dd   : > { %1392 = vst [vmem:[%s2188_s13 + $0x138] sm:$0xff] %v1282_v24  ;;  %1328 = vmatmul.f32.gmra.mxu3 %v1119_v4 }
 0x2e0   : > { %v1043_v5 = vpop.f32.mrf.mxu3 }
 0x2e1   : > { %v1044_v25 = vadd.f32 %v2321_v3, %v1043_v5 }
 0x2e2   : > { %v1284_v29 = vpop.f32.mrf.mxu2 }
 0x2e3   : > { %v1120_v31 = vmax.f32 %v1044_v25, 0.0  ;;  %v1285_v6 = vadd.f32 %v2182_v38, %v1284_v29 }
 0x2e5   : > { %1393 = vst [vmem:[%s2188_s13 + $0x140] sm:$0xff] %v1285_v6  ;;  %1331 = vmatmul.f32.gmra.mxu3 %v1120_v31 }
 0x2e8   : > { %v1046_v7 = vpop.f32.mrf.mxu3 }
 0x2e9   : > { %v1047_v8 = vadd.f32 %v2321_v3, %v1046_v7 }
 0x2ea   : > { %v1287_v32 = vpop.f32.mrf.mxu2 }
 0x2eb   : > { %v1121_v10 = vmax.f32 %v1047_v8, 0.0  ;;  %v1288_v33 = vadd.f32 %v2182_v38, %v1287_v32 }
 0x2ed   : > { %1394 = vst [vmem:[%s2188_s13 + $0x148] sm:$0xff] %v1288_v33  ;;  %1334 = vmatmul.f32.gmra.mxu3 %v1121_v10 }
 0x2f0   : > { %v1049_v40 = vpop.f32.mrf.mxu3 }
 0x2f1   : > { %v1050_v11 = vadd.f32 %v2321_v3, %v1049_v40 }
 0x2f2   : > { %v1290_v12 = vpop.f32.mrf.mxu2 }
 0x2f3   : > { %v1122_v14 = vmax.f32 %v1050_v11, 0.0  ;;  %v1291_v18 = vadd.f32 %v2182_v38, %v1290_v12 }
 0x2f5   : > { %1395 = vst [vmem:[%s2188_s13 + $0x150] sm:$0xff] %v1291_v18  ;;  %1337 = vmatmul.f32.gmra.mxu3 %v1122_v14 }
 0x2f8   : > { %v1052_v41 = vpop.f32.mrf.mxu3 }
 0x2f9   : > { %v1053_v19 = vadd.f32 %v2321_v3, %v1052_v41 }
 0x2fa   : > { %v1293_v20 = vpop.f32.mrf.mxu2 }
 0x2fb   : > { %v1123_v28 = vmax.f32 %v1053_v19, 0.0  ;;  %v1294_v22 = vadd.f32 %v2182_v38, %v1293_v20 }
 0x2fd   : > { %1396 = vst [vmem:[%s2188_s13 + $0x158] sm:$0xff] %v1294_v22  ;;  %1340 = vmatmul.f32.gmra.mxu3 %v1123_v28 }
 0x300   : > { %v1055_v26 = vpop.f32.mrf.mxu3 }
 0x301   : > { %v1056_v27 = vadd.f32 %v2321_v3, %v1055_v26 }
 0x302   : > { %v1296_v36 = vpop.f32.mrf.mxu2 }
 0x303   : > { %v1124_v30 = vmax.f32 %v1056_v27, 0.0  ;;  %v1297_v34 = vadd.f32 %v2182_v38, %v1296_v36 }
 0x305   : > { %1397 = vst [vmem:[%s2188_s13 + $0x160] sm:$0xff] %v1297_v34  ;;  %1343 = vmatmul.f32.gmra.mxu3 %v1124_v30 }
 0x308   : > { %v1058_v35 = vpop.f32.mrf.mxu3 }
 0x309   : > { %v1059_v37 = vadd.f32 %v2321_v3, %v1058_v35 }
 0x30a   : > { %v1299_v39 = vpop.f32.mrf.mxu2 }
 0x30b   : > { %v1125_v42 = vmax.f32 %v1059_v37, 0.0  ;;  %v1300_v43 = vadd.f32 %v2182_v38, %v1299_v39 }
 0x30d   : > { %1398 = vst [vmem:[%s2188_s13 + $0x168] sm:$0xff] %v1300_v43  ;;  %1346 = vmatmul.f32.gmra.mxu3 %v1125_v42 }
 0x310   : > { %v1061_v44 = vpop.f32.mrf.mxu3 }
 0x311   : > { %v1062_v45 = vadd.f32 %v2321_v3, %v1061_v44 }
 0x312   : > { %v1302_v46 = vpop.f32.mrf.mxu2 }
 0x313   : > { %v1126_v47 = vmax.f32 %v1062_v45, 0.0  ;;  %v1303_v48 = vadd.f32 %v2182_v38, %v1302_v46 }
 0x315   : > { %1399 = vst [vmem:[%s2188_s13 + $0x170] sm:$0xff] %v1303_v48  ;;  %1349 = vmatmul.f32.gmra.mxu3 %v1126_v47 }
 0x320   : > { %v1305_v49 = vpop.f32.mrf.mxu3 }
 0x321   : > { %v1306_v50 = vadd.f32 %v2182_v38, %v1305_v49 }
 0x323   : > { %1400 = vst [vmem:[%s2188_s13 + $0x178] sm:$0xff] %v1306_v50 }
 0x328   : > { %v1308_v51 = vpop.f32.mrf.mxu3 }
 0x329   : > { %v1309_v52 = vadd.f32 %v2182_v38, %v1308_v51 }
 0x32b   : > { %1401 = vst [vmem:[%s2188_s13 + $0x180] sm:$0xff] %v1309_v52 }
 0x330   : > { %v1311_v53 = vpop.f32.mrf.mxu3 }
 0x331   : > { %v1312_v3 = vadd.f32 %v2182_v38, %v1311_v53 }
 0x333   : > { %1402 = vst [vmem:[%s2188_s13 + $0x188] sm:$0xff] %v1312_v3 }
 0x338   : > { %v1314_v55 = vpop.f32.mrf.mxu3 }
 0x339   : > { %v1315_v56 = vadd.f32 %v2182_v38, %v1314_v55 }
 0x33b   : > { %1403 = vst [vmem:[%s2188_s13 + $0x190] sm:$0xff] %v1315_v56 }
 0x340   : > { %v1317_v57 = vpop.f32.mrf.mxu3 }
 0x341   : > { %v1318_v58 = vadd.f32 %v2182_v38, %v1317_v57 }
 0x343   : > { %1404 = vst [vmem:[%s2188_s13 + $0x198] sm:$0xff] %v1318_v58 }
 0x348   : > { %v1320_v59 = vpop.f32.mrf.mxu3 }
 0x349   : > { %v1321_v60 = vadd.f32 %v2182_v38, %v1320_v59 }
 0x34b   : > { %1405 = vst [vmem:[%s2188_s13 + $0x1a0] sm:$0xff] %v1321_v60 }
 0x350   : > { %v1323_v9 = vpop.f32.mrf.mxu3 }
 0x351   : > { %v1324_v61 = vadd.f32 %v2182_v38, %v1323_v9 }
 0x353   : > { %1406 = vst [vmem:[%s2188_s13 + $0x1a8] sm:$0xff] %v1324_v61 }
 0x358   : > { %v1326_v13 = vpop.f32.mrf.mxu3 }
 0x359   : > { %v1327_v62 = vadd.f32 %v2182_v38, %v1326_v13 }
 0x35b   : > { %1407 = vst [vmem:[%s2188_s13 + $0x1b0] sm:$0xff] %v1327_v62 }
 0x360   : > { %v1329_v15 = vpop.f32.mrf.mxu3 }
 0x361   : > { %v1330_v63 = vadd.f32 %v2182_v38, %v1329_v15 }
 0x363   : > { %1408 = vst [vmem:[%s2188_s13 + $0x1b8] sm:$0xff] %v1330_v63 }
 0x368   : > { %v1332_v16 = vpop.f32.mrf.mxu3 }
 0x369   : > { %v1333_v0 = vadd.f32 %v2182_v38, %v1332_v16 }
 0x36b   : > { %1409 = vst [vmem:[%s2188_s13 + $0x1c0] sm:$0xff] %v1333_v0 }
 0x370   : > { %v1335_v1 = vpop.f32.mrf.mxu3 }
 0x371   : > { %v1336_v17 = vadd.f32 %v2182_v38, %v1335_v1 }
 0x373   : > { %1410 = vst [vmem:[%s2188_s13 + $0x1c8] sm:$0xff] %v1336_v17 }
 0x378   : > { %v1338_v21 = vpop.f32.mrf.mxu3 }
 0x379   : > { %v1339_v2 = vadd.f32 %v2182_v38, %v1338_v21 }
 0x37b   : > { %1411 = vst [vmem:[%s2188_s13 + $0x1d0] sm:$0xff] %v1339_v2 }
 0x380   : > { %v1341_v23 = vpop.f32.mrf.mxu3 }
 0x381   : > { %v1342_v54 = vadd.f32 %v2182_v38, %v1341_v23 }
 0x383   : > { %1412 = vst [vmem:[%s2188_s13 + $0x1d8] sm:$0xff] %v1342_v54 }
 0x388   : > { %v1344_v4 = vpop.f32.mrf.mxu3 }
 0x389   : > { %v1345_v24 = vadd.f32 %v2182_v38, %v1344_v4 }
 0x38b   : > { %1413 = vst [vmem:[%s2188_s13 + $0x1e0] sm:$0xff] %v1345_v24 }
 0x390   : > { %v1347_v5 = vpop.f32.mrf.mxu3 }
 0x391   : > { %v1348_v25 = vadd.f32 %v2182_v38, %v1347_v5 }
 0x393   : > { %1414 = vst [vmem:[%s2188_s13 + $0x1e8] sm:$0xff] %v1348_v25 }
 0x397   : > { %1423 = sbr.rel (!%p1816_p5) target bundleno = 956 (0x3bc), region = 52 }
 0x398   : > { %v1350_v29 = vpop.f32.mrf.mxu3 }
 0x399   : > { %v1351_v31 = vadd.f32 %v2182_v38, %v1350_v29 }
 0x39b   : > { %1415 = vst [vmem:[%s2188_s13 + $0x1f0] sm:$0xff] %v1351_v31 }
 0x39c   : > { %s2497_s19 = smov (!%p1426_p11, %s1425_s19), 63 }
 0x39d   : > { %s1570_s20 = sshll.u32 %s2497_s19, 3 }
 0x39e   : > { %s1429_s21 = ssub.s32 504, %s1570_s20 }
 0x39f   : > { %s1430_s23 = sshll.u32 %s1429_s21, 4 }
 0x3a0   : > { %1431 = vsyncadd %s2418_s18, %s1430_s23  ;;  %p2427_p12 = scmp.ne.s32.totalorder %s1570_s20, 0  ;;  %s1577_s11 = smul.u32 504, %s1799_s28 }
 0x3a1   : > { %s1436_s29 = sshll.u32 %s2188_s13, 4  ;;  %s2487_s17 = sshll.u32 %s2497_s19, 7  ;;  %s2437_s29 = int_to_ptr.vmem [resolvable:$true] %s1436_s29 }
 0x3a2   : > { %s1434_s14 = scalar_lea.hbm %s2486_s7, %s1577_s11  ;;  %s1660_s16 = sshra.s32 %s2437_s29, 4  ;;  %s1661_s16 = int_to_ptr.vmem [resolvable:$true] %s1660_s16 }
 0x3a3   : > { %s1438_s15 = sshll.u32 %s1434_s14, 4  ;;  %s1662_s20 = sshrl.u32 %s2487_s17, 4  ;;  %s2439_s15 = int_to_ptr.hbm [resolvable:$true] %s1438_s15 }
 0x3a4   : > { %s1667_s21 = scalar_lea.vmem %s1661_s16, %s1662_s20  ;;  %s1735_s28 = smov [#allocation2]  }
 0x3a5   : > { %p1668_p13 = scmp.ne.s32.totalorder %s1661_s16, %s1667_s21  ;;  %s1671_s13 = scalar_lea.vmem %s1735_s28, 1008 }
 0x3a6   : > { %p1673_p2 = scmp.lt.s32.totalorder %s1671_s13, %s1667_s21 }
 0x3a7   : > { %p1669_p0 = pnand %p1668_p13, %p2427_p12 }
 0x3a9   : > { %p1670_p1 = pneg %p1669_p0 }
 0x3ab   : > { %p1675_p3 = pnand %p1673_p2, %p1670_p1 }
 0x3ad   : > { %1678 = shalt.err (!%p1675_p3)
}
 0x3ae   : > { %s1679_s23 = sshra.s32 %s2439_s15, 4  ;;  %s1690_s14 = scalar_lea.hbm %s2486_s7, 1000  ;;  %s1680_s23 = int_to_ptr.hbm [resolvable:$true] %s1679_s23 }
 0x3af   : > { %s1686_s11 = scalar_lea.hbm %s1680_s23, %s1662_s20  ;;  %p1691_p8 = scmp.lt.s32.totalorder %s1680_s23, %s2486_s7 }
 0x3b0   : > { %p1687_p4 = scmp.ne.s32.totalorder %s1680_s23, %s1686_s11  ;;  %p1692_p9 = scmp.lt.s32.totalorder %s1690_s14, %s1686_s11 }
 0x3b2   : > { %p1688_p5 = pnand %p1687_p4, %p2427_p12  ;;  %p1693_p10 = por %p1692_p9, %p1691_p8 }
 0x3b4   : > { %p1689_p7 = pneg %p1688_p5 }
 0x3b6   : > { %p1694_p11 = pnand %p1693_p10, %p1689_p7 }
 0x3b8   : > { %1697 = shalt.err (!%p1694_p11)
}
 0x3b9   : > { %s1736_s21 = smov 128   ;;  %s1737_s20 = smov 8  }
 0x3ba   : > { %s2491_s28 = sshll.u32 %s2497_s19, 7 }
 0x3bb   : > { %1444 = dma.vmem_to_hbm [thread:$0]  (%p2427_p12), %s2437_s29, %s2491_s28, %s2439_s15, %s2418_s18, %s1736_s21, %s1736_s21, %s1737_s20  }
 0x3bc PF: > { %p1620_p13 = scmp.ge.s32.totalorder %s1733_s27, 2  ;;  %s1453_s17 = sand.u32 1, %s1721_s24  }
 0x3bd   : > { %s1454_s13 = scalar_lea.sflag [#allocation3], %s1453_s17 }
 0x3be   : > { %p1617_p0 = pnand %p1620_p13, %p1820_p6 }
 0x3c0   : > { %p1618_p1 = pneg %p1617_p0 }
 0x3c2   : > { %1716 = dma.done.wait (%p1618_p1), %s1454_s13, 8064  }
 0x3c3   : > { %1718 = vsyncadd (%p1618_p1), %s1454_s13, 4294959232  ;;  %p17_p2 = scmp.ge.s32.totalorder %s1803_s30, 4   ;;  %s2492_s24 = smov %s1725_s25 }
 0x3c4   : > { %s2493_s25 = smov %s1729_s26  ;;  %s2494_s26 = smov %s1814_s10 }
 0x3c5   : > { %s2495_s27 = smov %s1803_s30  ;;  %19 = sbr.rel (!%p17_p2) target bundleno = 3 (0x3), region = 83 }
 0x3ca   :  { %1460 = vsyncpa [#allocation3], 1 }
 0x3cb   :  { %1462 = vsyncpa [#allocation3 + $0x1], 1 }

</bundles_post_ra>
